<compile_context>
chip_gen: v7x
topology: tpu7x:2x2x1
jax: 0.10.0
libtpu: 0.0.40
codegen_flags: <defaults>
</compile_context>

<pallas_src>
import jax
import jax.numpy as jnp
from jax import lax
from jax.experimental import pallas as pl
from jax.experimental.pallas import tpu as pltpu


def gru_seq_kernel(
    xz_ref,      # (Lt, 4H, Bt)  precomputed x-side preactivations [r|u|c|ng], feature-major
    h0_ref,      # (H, Bt)       initial hidden state (feature-major)
    w_ru_t_ref,  # (2H, H)       state-side weights for r and u, transposed
    w_c_t_ref,   # (H, H)        state-side weight for the candidate, transposed
    out_ref,     # (Lt, H, Bt)   per-step hidden states (feature-major)
    state_ref,   # (H, Bt)       VMEM scratch: state carried across time chunks
):
    f32 = jnp.float32
    H = w_c_t_ref.shape[0]
    Lt = xz_ref.shape[0]

    @pl.when(pl.program_id(1) == 0)
    def _():
        state_ref[...] = h0_ref[...]

    # Weights loaded once per grid step, reused by every unrolled iteration.
    w_ru_t = w_ru_t_ref[...]     # (2H, H)
    w_c_t = w_c_t_ref[...]       # (H, H)

    def step(t, state):          # state: (H, Bt) register-carried
        xz = xz_ref[t]           # (4H, Bt)
        # State-side r/u projections fused into one MXU push.
        hz = jnp.dot(w_ru_t, state, preferred_element_type=f32)      # (2H, Bt)
        r = jax.nn.sigmoid(xz[0:H] + hz[0:H])
        u = jax.nn.sigmoid(xz[H:2 * H] + hz[H:2 * H])
        c = jnp.tanh(xz[2 * H:3 * H]
                     + jnp.dot(w_c_t, r * state, preferred_element_type=f32))
        new_gate = xz[3 * H:4 * H]
        new_h = u * state + (1.0 - u) * c * new_gate
        out_ref[t] = new_h.astype(out_ref.dtype)                      # lane-dense store
        return new_h

    unroll = Lt if Lt <= 8 else 4
    state = lax.fori_loop(0, Lt, step, state_ref[...], unroll=unroll)
    state_ref[...] = state


def modified_gru_forward(x, params, h=None, *, batch_tile=128, time_chunk=32):
    """Returns (outputs (B, L, H), final_state (B, H)) like torch ModifiedGRU."""
    B, L, input_size = x.shape
    H = params["w_r"].shape[1]
    E = params["w_l1"].shape[0]
    f32 = jnp.float32

    x = x.astype(f32)
    # inputs = x[..., :E], neighbors = x[..., -E:]  (handles odd input_size too)
    x2 = jnp.concatenate([x[..., :E], x[..., input_size - E:]], axis=-1)   # (B, L, 2E)

    # ---- host-side weight fusion (once, outside the kernel) ----
    w_ng_s = params["w_ng"][:H]          # semantic_emb -> new_gate
    w_ng_n = params["w_ng"][H:]          # neighbor_emb -> new_gate
    top = jnp.concatenate(
        [params["w_r"][:E], params["w_u"][:E], params["w_c"][:E],
         params["w_l1"] @ w_ng_s], axis=1)                                  # (E, 4H)
    bot = jnp.concatenate(
        [jnp.zeros((E, 3 * H), f32), params["w_l2"] @ w_ng_n], axis=1)      # (E, 4H)
    w_x_fused = jnp.concatenate([top, bot], axis=0)                         # (2E, 4H)
    b_ng_fused = (params["b_l1"] @ w_ng_s + params["b_l2"] @ w_ng_n
                  + params["b_ng"])
    b_x_fused = jnp.concatenate(
        [params["b_r"], params["b_u"], params["b_c"], b_ng_fused])          # (4H,)

    # Hoisted state-independent projection: ONE big (B*L, 2E) @ (2E, 4H) matmul
    # (fills the MXU), bias added once -- nothing x-side remains in the loop.
    xz_all = jnp.einsum("ble,ef->blf", x2, w_x_fused) + b_x_fused           # (B, L, 4H)

    # ---- batch blocking (lane dimension) ----
    if B <= batch_tile:
        Bt = -(-B // 8) * 8                      # single block: round up to sublanes
    else:
        Bt = max(128, (batch_tile // 128) * 128)  # multi-block: lane-aligned tiles
    nb = pl.cdiv(B, Bt)
    B_pad = nb * Bt

    # ---- time chunking ("arbitrary" grid axis; recurrence runs inside) ----
    Lt = min(time_chunk, L)
    nt = pl.cdiv(L, Lt)
    L_pad = nt * Lt

    if h is None:
        h0 = jnp.zeros((B, H), f32)
    else:
        h0 = h.astype(f32)
    if B_pad != B:
        xz_all = jnp.pad(xz_all, ((0, B_pad - B), (0, 0), (0, 0)))
        h0 = jnp.pad(h0, ((0, B_pad - B), (0, 0)))
    if L_pad != L:
        # Padded trailing steps only corrupt state past step L-1; outputs[:, :L]
        # are unaffected and the final state is read from step L-1.
        xz_all = jnp.pad(xz_all, ((0, 0), (0, L_pad - L), (0, 0)))

    # Feature-major (batch-in-lanes) layouts.
    xz_fm = jnp.transpose(xz_all, (1, 2, 0))     # (L_pad, 4H, B_pad)
    h0_fm = jnp.transpose(h0, (1, 0))            # (H, B_pad)
    w_ru_t = jnp.concatenate([params["w_r"][E:], params["w_u"][E:]], axis=1).T  # (2H, H)
    w_c_t = params["w_c"][E:].T                                                  # (H, H)

    const = lambda shape: pl.BlockSpec(shape, lambda b, t: (0, 0))

    out_fm = pl.pallas_call(
        gru_seq_kernel,
        out_shape=jax.ShapeDtypeStruct((L_pad, H, B_pad), f32),
        grid_spec=pltpu.PrefetchScalarGridSpec(
            num_scalar_prefetch=0,
            grid=(nb, nt),
            in_specs=[
                pl.BlockSpec((Lt, 4 * H, Bt), lambda b, t: (t, 0, b)),   # xz (feature-major)
                pl.BlockSpec((H, Bt), lambda b, t: (0, b)),              # h0
                const((2 * H, H)),                                       # w_ru^T
                const((H, H)),                                           # w_c^T
            ],
            out_specs=pl.BlockSpec((Lt, H, Bt), lambda b, t: (t, 0, b)),
            scratch_shapes=[pltpu.VMEM((H, Bt), f32)],
        ),
        compiler_params=pltpu.CompilerParams(
            dimension_semantics=("parallel", "arbitrary")),
    )(xz_fm, h0_fm, w_ru_t, w_c_t)

    outputs = jnp.transpose(out_fm, (2, 0, 1))[:B, :L]   # (B, L, H)
    state = outputs[:, -1, :]                            # final hidden state
    return outputs, state


def modified_gru_reference(x, params, h=None):
    """Plain-JAX reference mirroring the torch ModifiedGRU forward."""
    B, L, input_size = x.shape
    H = params["w_r"].shape[1]
    E = params["w_l1"].shape[0]
    if h is None:
        h = jnp.zeros((B, H), jnp.float32)

    def cell(state, x_t):
        inp = x_t[:, :E]
        nbr = x_t[:, input_size - E:]
        gi = jnp.concatenate([inp, state], axis=1)
        r = jax.nn.sigmoid(gi @ params["w_r"] + params["b_r"])
        u = jax.nn.sigmoid(gi @ params["w_u"] + params["b_u"])
        r_state = r * state
        c = jnp.tanh(jnp.concatenate([inp, r_state], axis=1) @ params["w_c"]
                     + params["b_c"])
        sem = inp @ params["w_l1"] + params["b_l1"]
        nb = nbr @ params["w_l2"] + params["b_l2"]
        ng = jnp.concatenate([sem, nb], axis=1) @ params["w_ng"] + params["b_ng"]
        new_h = u * state + (1.0 - u) * c * ng
        return new_h, new_h

    state, outs = jax.lax.scan(cell, h, jnp.transpose(x, (1, 0, 2)))
    return jnp.transpose(outs, (1, 0, 2)), state


def make_params(key, input_size, hidden_size):
    """Weights stored (in_features, out_features); biases (out_features,)."""
    E = input_size // 2
    H = hidden_size
    ks = jax.random.split(key, 12)
    u = lambda k, shape, fan_in: (
        (jax.random.uniform(k, shape, jnp.float32) - 0.5) * 2.0 * fan_in ** -0.5)
    return {
        "w_r": u(ks[0], (E + H, H), E + H), "b_r": u(ks[1], (H,), E + H),
        "w_u": u(ks[2], (E + H, H), E + H), "b_u": u(ks[3], (H,), E + H),
        "w_c": u(ks[4], (E + H, H), E + H), "b_c": u(ks[5], (H,), E + H),
        "w_l1": u(ks[6], (E, H), E), "b_l1": u(ks[7], (H,), E),
        "w_l2": u(ks[8], (E, H), E), "b_l2": u(ks[9], (H,), E),
        "w_ng": u(ks[10], (2 * H, H), 2 * H), "b_ng": u(ks[11], (H,), 2 * H),
        # new_r_gate / relu_activation exist in __init__ but are unused in forward().
    }


if __name__ == "__main__":
    # Pin host-side matmul precision so the fused-weight prep and the reference
    # round the same way as true-f32 torch (kernel dots already accumulate f32).
    jax.config.update("jax_default_matmul_precision", "highest")

    # batch=128 (one lane-dense 128-wide block), seq=8, input_size=64
    # (embedding_size=32), hidden=32.
    B, L, INPUT_SIZE, HIDDEN = 128, 8, 64, 32

    key = jax.random.PRNGKey(0)
    kx, kp = jax.random.split(key)
    x = jax.random.normal(kx, (B, L, INPUT_SIZE), jnp.float32)
    params = make_params(kp, INPUT_SIZE, HIDDEN)

    fwd = jax.jit(modified_gru_forward)
    outputs, state = fwd(x, params)
    outputs = jax.block_until_ready(outputs)
    state = jax.block_until_ready(state)

    ref_out, ref_state = modified_gru_reference(x, params)
    assert outputs.shape == (B, L, HIDDEN)
    assert state.shape == (B, HIDDEN)
    assert jnp.allclose(outputs, ref_out, rtol=1e-4, atol=1e-4), "outputs mismatch"
    assert jnp.allclose(state, ref_state, rtol=1e-4, atol=1e-4), "state mismatch"

    print("KERNEL_OK")
</pallas_src>

<mosaic_0001>
module attributes {stable_mosaic.version = 11 : i64} {
  func.func @gru_seq_kernel(%arg0: i32, %arg1: i32, %arg2: memref<8x128x128xf32, #tpu.memory_space<vmem>>, %arg3: memref<32x128xf32, #tpu.memory_space<vmem>>, %arg4: memref<64x32xf32, #tpu.memory_space<vmem>>, %arg5: memref<32x32xf32, #tpu.memory_space<vmem>>, %arg6: memref<8x32x128xf32, #tpu.memory_space<vmem>>, %arg7: memref<32x128xf32, #tpu.memory_space<vmem>>) attributes {dimension_semantics = [#tpu.dimension_semantics<parallel>, #tpu.dimension_semantics<arbitrary>], iteration_bounds = array<i64: 1, 1>, scalar_prefetch = 0 : i64, scratch_operands = 1 : i64, tpu.core_type = #tpu.core_type<tc>, window_params = [{transform_indices = @transform_0, window_bounds = array<i64: 8, 128, 128>}, {transform_indices = @transform_1, window_bounds = array<i64: 32, 128>}, {pipeline_mode = #tpu.pipeline_mode<synchronous>, transform_indices = @transform_2, window_bounds = array<i64: 64, 32>}, {pipeline_mode = #tpu.pipeline_mode<synchronous>, transform_indices = @transform_3, window_bounds = array<i64: 32, 32>}, {transform_indices = @transform_4, window_bounds = array<i64: 8, 32, 128>}]} {
    %c0_i32 = arith.constant 0 : i32
    %0 = arith.cmpi eq, %arg1, %c0_i32 : i32
    %1 = arith.extui %0 : i1 to i32
    %c0_i32_0 = arith.constant 0 : i32
    %2 = arith.cmpi ne, %1, %c0_i32_0 : i32
    scf.if %2 {
      %c0_80 = arith.constant 0 : index
      %c0_81 = arith.constant 0 : index
      %295 = vector.load %arg3[%c0_80, %c0_81] : memref<32x128xf32, #tpu.memory_space<vmem>>, vector<32x128xf32>
      %c0_82 = arith.constant 0 : index
      %c0_83 = arith.constant 0 : index
      %296 = vector.load %arg7[%c0_82, %c0_83] : memref<32x128xf32, #tpu.memory_space<vmem>>, vector<32x128xf32>
      tpu.vector_store %arg7[%c0_82, %c0_83], %295 {strides = array<i32>} : memref<32x128xf32, #tpu.memory_space<vmem>>, vector<32x128xf32>,
    } else {
    }
    %c0 = arith.constant 0 : index
    %c0_1 = arith.constant 0 : index
    %3 = vector.load %arg4[%c0, %c0_1] : memref<64x32xf32, #tpu.memory_space<vmem>>, vector<64x32xf32>
    %c0_2 = arith.constant 0 : index
    %c0_3 = arith.constant 0 : index
    %4 = vector.load %arg5[%c0_2, %c0_3] : memref<32x32xf32, #tpu.memory_space<vmem>>, vector<32x32xf32>
    %c0_4 = arith.constant 0 : index
    %c0_5 = arith.constant 0 : index
    %5 = vector.load %arg7[%c0_4, %c0_5] : memref<32x128xf32, #tpu.memory_space<vmem>>, vector<32x128xf32>
    %c0_i32_6 = arith.constant 0 : i32
    %6 = arith.index_cast %c0_i32_6 : i32 to index
    %c0_7 = arith.constant 0 : index
    %c0_8 = arith.constant 0 : index
    %7 = vector.load %arg2[%6, %c0_7, %c0_8] : memref<8x128x128xf32, #tpu.memory_space<vmem>>, vector<1x128x128xf32>
    %8 = vector.shape_cast %7 : vector<1x128x128xf32> to vector<128x128xf32>
    %cst = arith.constant dense<0.000000e+00> : vector<64x128xf32>
    %9 = tpu.matmul %3, %5, %cst {dimension_numbers = #tpu.dot_dimension_numbers<[1], [0], [0], [1], [0, 0, 1, 1], [], []>, precision = #tpu.contract_precision<fp32>} : vector<64x32xf32>, vector<32x128xf32>, vector<64x128xf32> -> vector<64x128xf32>
    %10 = vector.extract_strided_slice %8 {offsets = [0, 0], sizes = [32, 128], strides = [1, 1]} : vector<128x128xf32> to vector<32x128xf32>
    %11 = vector.extract_strided_slice %9 {offsets = [0, 0], sizes = [32, 128], strides = [1, 1]} : vector<64x128xf32> to vector<32x128xf32>
    %12 = arith.addf %10, %11 : vector<32x128xf32>
    %13 = arith.negf %12 : vector<32x128xf32>
    %14 = math.exp %13 : vector<32x128xf32>
    %cst_9 = arith.constant 1.000000e+00 : f32
    %15 = vector.broadcast %cst_9 : f32 to vector<32x128xf32>
    %16 = arith.addf %15, %14 : vector<32x128xf32>
    %17 = arith.divf %15, %16 : vector<32x128xf32>
    %18 = vector.extract_strided_slice %8 {offsets = [32, 0], sizes = [32, 128], strides = [1, 1]} : vector<128x128xf32> to vector<32x128xf32>
    %19 = vector.extract_strided_slice %9 {offsets = [32, 0], sizes = [32, 128], strides = [1, 1]} : vector<64x128xf32> to vector<32x128xf32>
    %20 = arith.addf %18, %19 : vector<32x128xf32>
    %21 = arith.negf %20 : vector<32x128xf32>
    %22 = math.exp %21 : vector<32x128xf32>
    %cst_10 = arith.constant 1.000000e+00 : f32
    %23 = vector.broadcast %cst_10 : f32 to vector<32x128xf32>
    %24 = arith.addf %23, %22 : vector<32x128xf32>
    %25 = arith.divf %23, %24 : vector<32x128xf32>
    %26 = vector.extract_strided_slice %8 {offsets = [64, 0], sizes = [32, 128], strides = [1, 1]} : vector<128x128xf32> to vector<32x128xf32>
    %27 = arith.mulf %17, %5 : vector<32x128xf32>
    %cst_11 = arith.constant dense<0.000000e+00> : vector<32x128xf32>
    %28 = tpu.matmul %4, %27, %cst_11 {dimension_numbers = #tpu.dot_dimension_numbers<[1], [0], [0], [1], [0, 0, 1, 1], [], []>, precision = #tpu.contract_precision<fp32>} : vector<32x32xf32>, vector<32x128xf32>, vector<32x128xf32> -> vector<32x128xf32>
    %29 = arith.addf %26, %28 : vector<32x128xf32>
    %30 = math.tanh %29 : vector<32x128xf32>
    %31 = vector.extract_strided_slice %8 {offsets = [96, 0], sizes = [32, 128], strides = [1, 1]} : vector<128x128xf32> to vector<32x128xf32>
    %32 = arith.mulf %25, %5 : vector<32x128xf32>
    %cst_12 = arith.constant 1.000000e+00 : f32
    %33 = vector.broadcast %cst_12 : f32 to vector<32x128xf32>
    %34 = arith.subf %33, %25 : vector<32x128xf32>
    %35 = arith.mulf %34, %30 : vector<32x128xf32>
    %36 = arith.mulf %35, %31 : vector<32x128xf32>
    %37 = arith.addf %32, %36 : vector<32x128xf32>
    %38 = arith.index_cast %c0_i32_6 : i32 to index
    %c0_13 = arith.constant 0 : index
    %c0_14 = arith.constant 0 : index
    %39 = vector.load %arg6[%38, %c0_13, %c0_14] : memref<8x32x128xf32, #tpu.memory_space<vmem>>, vector<1x32x128xf32>
    %40 = vector.shape_cast %39 : vector<1x32x128xf32> to vector<32x128xf32>
    %41 = vector.shape_cast %37 : vector<32x128xf32> to vector<1x32x128xf32>
    tpu.vector_store %arg6[%38, %c0_13, %c0_14], %41 {strides = array<i32>} : memref<8x32x128xf32, #tpu.memory_space<vmem>>, vector<1x32x128xf32>,
    %c1_i32 = arith.constant 1 : i32
    %42 = arith.index_cast %c1_i32 : i32 to index
    %c0_15 = arith.constant 0 : index
    %c0_16 = arith.constant 0 : index
    %43 = vector.load %arg2[%42, %c0_15, %c0_16] : memref<8x128x128xf32, #tpu.memory_space<vmem>>, vector<1x128x128xf32>
    %44 = vector.shape_cast %43 : vector<1x128x128xf32> to vector<128x128xf32>
    %cst_17 = arith.constant dense<0.000000e+00> : vector<64x128xf32>
    %45 = tpu.matmul %3, %37, %cst_17 {dimension_numbers = #tpu.dot_dimension_numbers<[1], [0], [0], [1], [0, 0, 1, 1], [], []>, precision = #tpu.contract_precision<fp32>} : vector<64x32xf32>, vector<32x128xf32>, vector<64x128xf32> -> vector<64x128xf32>
    %46 = vector.extract_strided_slice %44 {offsets = [0, 0], sizes = [32, 128], strides = [1, 1]} : vector<128x128xf32> to vector<32x128xf32>
    %47 = vector.extract_strided_slice %45 {offsets = [0, 0], sizes = [32, 128], strides = [1, 1]} : vector<64x128xf32> to vector<32x128xf32>
    %48 = arith.addf %46, %47 : vector<32x128xf32>
    %49 = arith.negf %48 : vector<32x128xf32>
    %50 = math.exp %49 : vector<32x128xf32>
    %cst_18 = arith.constant 1.000000e+00 : f32
    %51 = vector.broadcast %cst_18 : f32 to vector<32x128xf32>
    %52 = arith.addf %51, %50 : vector<32x128xf32>
    %53 = arith.divf %51, %52 : vector<32x128xf32>
    %54 = vector.extract_strided_slice %44 {offsets = [32, 0], sizes = [32, 128], strides = [1, 1]} : vector<128x128xf32> to vector<32x128xf32>
    %55 = vector.extract_strided_slice %45 {offsets = [32, 0], sizes = [32, 128], strides = [1, 1]} : vector<64x128xf32> to vector<32x128xf32>
    %56 = arith.addf %54, %55 : vector<32x128xf32>
    %57 = arith.negf %56 : vector<32x128xf32>
    %58 = math.exp %57 : vector<32x128xf32>
    %cst_19 = arith.constant 1.000000e+00 : f32
    %59 = vector.broadcast %cst_19 : f32 to vector<32x128xf32>
    %60 = arith.addf %59, %58 : vector<32x128xf32>
    %61 = arith.divf %59, %60 : vector<32x128xf32>
    %62 = vector.extract_strided_slice %44 {offsets = [64, 0], sizes = [32, 128], strides = [1, 1]} : vector<128x128xf32> to vector<32x128xf32>
    %63 = arith.mulf %53, %37 : vector<32x128xf32>
    %cst_20 = arith.constant dense<0.000000e+00> : vector<32x128xf32>
    %64 = tpu.matmul %4, %63, %cst_20 {dimension_numbers = #tpu.dot_dimension_numbers<[1], [0], [0], [1], [0, 0, 1, 1], [], []>, precision = #tpu.contract_precision<fp32>} : vector<32x32xf32>, vector<32x128xf32>, vector<32x128xf32> -> vector<32x128xf32>
    %65 = arith.addf %62, %64 : vector<32x128xf32>
    %66 = math.tanh %65 : vector<32x128xf32>
    %67 = vector.extract_strided_slice %44 {offsets = [96, 0], sizes = [32, 128], strides = [1, 1]} : vector<128x128xf32> to vector<32x128xf32>
    %68 = arith.mulf %61, %37 : vector<32x128xf32>
    %cst_21 = arith.constant 1.000000e+00 : f32
    %69 = vector.broadcast %cst_21 : f32 to vector<32x128xf32>
    %70 = arith.subf %69, %61 : vector<32x128xf32>
    %71 = arith.mulf %70, %66 : vector<32x128xf32>
    %72 = arith.mulf %71, %67 : vector<32x128xf32>
    %73 = arith.addf %68, %72 : vector<32x128xf32>
    %74 = arith.index_cast %c1_i32 : i32 to index
    %c0_22 = arith.constant 0 : index
    %c0_23 = arith.constant 0 : index
    %75 = vector.load %arg6[%74, %c0_22, %c0_23] : memref<8x32x128xf32, #tpu.memory_space<vmem>>, vector<1x32x128xf32>
    %76 = vector.shape_cast %75 : vector<1x32x128xf32> to vector<32x128xf32>
    %77 = vector.shape_cast %73 : vector<32x128xf32> to vector<1x32x128xf32>
    tpu.vector_store %arg6[%74, %c0_22, %c0_23], %77 {strides = array<i32>} : memref<8x32x128xf32, #tpu.memory_space<vmem>>, vector<1x32x128xf32>,
    %c2_i32 = arith.constant 2 : i32
    %78 = arith.index_cast %c2_i32 : i32 to index
    %c0_24 = arith.constant 0 : index
    %c0_25 = arith.constant 0 : index
    %79 = vector.load %arg2[%78, %c0_24, %c0_25] : memref<8x128x128xf32, #tpu.memory_space<vmem>>, vector<1x128x128xf32>
    %80 = vector.shape_cast %79 : vector<1x128x128xf32> to vector<128x128xf32>
    %cst_26 = arith.constant dense<0.000000e+00> : vector<64x128xf32>
    %81 = tpu.matmul %3, %73, %cst_26 {dimension_numbers = #tpu.dot_dimension_numbers<[1], [0], [0], [1], [0, 0, 1, 1], [], []>, precision = #tpu.contract_precision<fp32>} : vector<64x32xf32>, vector<32x128xf32>, vector<64x128xf32> -> vector<64x128xf32>
    %82 = vector.extract_strided_slice %80 {offsets = [0, 0], sizes = [32, 128], strides = [1, 1]} : vector<128x128xf32> to vector<32x128xf32>
    %83 = vector.extract_strided_slice %81 {offsets = [0, 0], sizes = [32, 128], strides = [1, 1]} : vector<64x128xf32> to vector<32x128xf32>
    %84 = arith.addf %82, %83 : vector<32x128xf32>
    %85 = arith.negf %84 : vector<32x128xf32>
    %86 = math.exp %85 : vector<32x128xf32>
    %cst_27 = arith.constant 1.000000e+00 : f32
    %87 = vector.broadcast %cst_27 : f32 to vector<32x128xf32>
    %88 = arith.addf %87, %86 : vector<32x128xf32>
    %89 = arith.divf %87, %88 : vector<32x128xf32>
    %90 = vector.extract_strided_slice %80 {offsets = [32, 0], sizes = [32, 128], strides = [1, 1]} : vector<128x128xf32> to vector<32x128xf32>
    %91 = vector.extract_strided_slice %81 {offsets = [32, 0], sizes = [32, 128], strides = [1, 1]} : vector<64x128xf32> to vector<32x128xf32>
    %92 = arith.addf %90, %91 : vector<32x128xf32>
    %93 = arith.negf %92 : vector<32x128xf32>
    %94 = math.exp %93 : vector<32x128xf32>
    %cst_28 = arith.constant 1.000000e+00 : f32
    %95 = vector.broadcast %cst_28 : f32 to vector<32x128xf32>
    %96 = arith.addf %95, %94 : vector<32x128xf32>
    %97 = arith.divf %95, %96 : vector<32x128xf32>
    %98 = vector.extract_strided_slice %80 {offsets = [64, 0], sizes = [32, 128], strides = [1, 1]} : vector<128x128xf32> to vector<32x128xf32>
    %99 = arith.mulf %89, %73 : vector<32x128xf32>
    %cst_29 = arith.constant dense<0.000000e+00> : vector<32x128xf32>
    %100 = tpu.matmul %4, %99, %cst_29 {dimension_numbers = #tpu.dot_dimension_numbers<[1], [0], [0], [1], [0, 0, 1, 1], [], []>, precision = #tpu.contract_precision<fp32>} : vector<32x32xf32>, vector<32x128xf32>, vector<32x128xf32> -> vector<32x128xf32>
    %101 = arith.addf %98, %100 : vector<32x128xf32>
    %102 = math.tanh %101 : vector<32x128xf32>
    %103 = vector.extract_strided_slice %80 {offsets = [96, 0], sizes = [32, 128], strides = [1, 1]} : vector<128x128xf32> to vector<32x128xf32>
    %104 = arith.mulf %97, %73 : vector<32x128xf32>
    %cst_30 = arith.constant 1.000000e+00 : f32
    %105 = vector.broadcast %cst_30 : f32 to vector<32x128xf32>
    %106 = arith.subf %105, %97 : vector<32x128xf32>
    %107 = arith.mulf %106, %102 : vector<32x128xf32>
    %108 = arith.mulf %107, %103 : vector<32x128xf32>
    %109 = arith.addf %104, %108 : vector<32x128xf32>
    %110 = arith.index_cast %c2_i32 : i32 to index
    %c0_31 = arith.constant 0 : index
    %c0_32 = arith.constant 0 : index
    %111 = vector.load %arg6[%110, %c0_31, %c0_32] : memref<8x32x128xf32, #tpu.memory_space<vmem>>, vector<1x32x128xf32>
    %112 = vector.shape_cast %111 : vector<1x32x128xf32> to vector<32x128xf32>
    %113 = vector.shape_cast %109 : vector<32x128xf32> to vector<1x32x128xf32>
    tpu.vector_store %arg6[%110, %c0_31, %c0_32], %113 {strides = array<i32>} : memref<8x32x128xf32, #tpu.memory_space<vmem>>, vector<1x32x128xf32>,
    %c3_i32 = arith.constant 3 : i32
    %114 = arith.index_cast %c3_i32 : i32 to index
    %c0_33 = arith.constant 0 : index
    %c0_34 = arith.constant 0 : index
    %115 = vector.load %arg2[%114, %c0_33, %c0_34] : memref<8x128x128xf32, #tpu.memory_space<vmem>>, vector<1x128x128xf32>
    %116 = vector.shape_cast %115 : vector<1x128x128xf32> to vector<128x128xf32>
    %cst_35 = arith.constant dense<0.000000e+00> : vector<64x128xf32>
    %117 = tpu.matmul %3, %109, %cst_35 {dimension_numbers = #tpu.dot_dimension_numbers<[1], [0], [0], [1], [0, 0, 1, 1], [], []>, precision = #tpu.contract_precision<fp32>} : vector<64x32xf32>, vector<32x128xf32>, vector<64x128xf32> -> vector<64x128xf32>
    %118 = vector.extract_strided_slice %116 {offsets = [0, 0], sizes = [32, 128], strides = [1, 1]} : vector<128x128xf32> to vector<32x128xf32>
    %119 = vector.extract_strided_slice %117 {offsets = [0, 0], sizes = [32, 128], strides = [1, 1]} : vector<64x128xf32> to vector<32x128xf32>
    %120 = arith.addf %118, %119 : vector<32x128xf32>
    %121 = arith.negf %120 : vector<32x128xf32>
    %122 = math.exp %121 : vector<32x128xf32>
    %cst_36 = arith.constant 1.000000e+00 : f32
    %123 = vector.broadcast %cst_36 : f32 to vector<32x128xf32>
    %124 = arith.addf %123, %122 : vector<32x128xf32>
    %125 = arith.divf %123, %124 : vector<32x128xf32>
    %126 = vector.extract_strided_slice %116 {offsets = [32, 0], sizes = [32, 128], strides = [1, 1]} : vector<128x128xf32> to vector<32x128xf32>
    %127 = vector.extract_strided_slice %117 {offsets = [32, 0], sizes = [32, 128], strides = [1, 1]} : vector<64x128xf32> to vector<32x128xf32>
    %128 = arith.addf %126, %127 : vector<32x128xf32>
    %129 = arith.negf %128 : vector<32x128xf32>
    %130 = math.exp %129 : vector<32x128xf32>
    %cst_37 = arith.constant 1.000000e+00 : f32
    %131 = vector.broadcast %cst_37 : f32 to vector<32x128xf32>
    %132 = arith.addf %131, %130 : vector<32x128xf32>
    %133 = arith.divf %131, %132 : vector<32x128xf32>
    %134 = vector.extract_strided_slice %116 {offsets = [64, 0], sizes = [32, 128], strides = [1, 1]} : vector<128x128xf32> to vector<32x128xf32>
    %135 = arith.mulf %125, %109 : vector<32x128xf32>
    %cst_38 = arith.constant dense<0.000000e+00> : vector<32x128xf32>
    %136 = tpu.matmul %4, %135, %cst_38 {dimension_numbers = #tpu.dot_dimension_numbers<[1], [0], [0], [1], [0, 0, 1, 1], [], []>, precision = #tpu.contract_precision<fp32>} : vector<32x32xf32>, vector<32x128xf32>, vector<32x128xf32> -> vector<32x128xf32>
    %137 = arith.addf %134, %136 : vector<32x128xf32>
    %138 = math.tanh %137 : vector<32x128xf32>
    %139 = vector.extract_strided_slice %116 {offsets = [96, 0], sizes = [32, 128], strides = [1, 1]} : vector<128x128xf32> to vector<32x128xf32>
    %140 = arith.mulf %133, %109 : vector<32x128xf32>
    %cst_39 = arith.constant 1.000000e+00 : f32
    %141 = vector.broadcast %cst_39 : f32 to vector<32x128xf32>
    %142 = arith.subf %141, %133 : vector<32x128xf32>
    %143 = arith.mulf %142, %138 : vector<32x128xf32>
    %144 = arith.mulf %143, %139 : vector<32x128xf32>
    %145 = arith.addf %140, %144 : vector<32x128xf32>
    %146 = arith.index_cast %c3_i32 : i32 to index
    %c0_40 = arith.constant 0 : index
    %c0_41 = arith.constant 0 : index
    %147 = vector.load %arg6[%146, %c0_40, %c0_41] : memref<8x32x128xf32, #tpu.memory_space<vmem>>, vector<1x32x128xf32>
    %148 = vector.shape_cast %147 : vector<1x32x128xf32> to vector<32x128xf32>
    %149 = vector.shape_cast %145 : vector<32x128xf32> to vector<1x32x128xf32>
    tpu.vector_store %arg6[%146, %c0_40, %c0_41], %149 {strides = array<i32>} : memref<8x32x128xf32, #tpu.memory_space<vmem>>, vector<1x32x128xf32>,
    %c4_i32 = arith.constant 4 : i32
    %150 = arith.index_cast %c4_i32 : i32 to index
    %c0_42 = arith.constant 0 : index
    %c0_43 = arith.constant 0 : index
    %151 = vector.load %arg2[%150, %c0_42, %c0_43] : memref<8x128x128xf32, #tpu.memory_space<vmem>>, vector<1x128x128xf32>
    %152 = vector.shape_cast %151 : vector<1x128x128xf32> to vector<128x128xf32>
    %cst_44 = arith.constant dense<0.000000e+00> : vector<64x128xf32>
    %153 = tpu.matmul %3, %145, %cst_44 {dimension_numbers = #tpu.dot_dimension_numbers<[1], [0], [0], [1], [0, 0, 1, 1], [], []>, precision = #tpu.contract_precision<fp32>} : vector<64x32xf32>, vector<32x128xf32>, vector<64x128xf32> -> vector<64x128xf32>
    %154 = vector.extract_strided_slice %152 {offsets = [0, 0], sizes = [32, 128], strides = [1, 1]} : vector<128x128xf32> to vector<32x128xf32>
    %155 = vector.extract_strided_slice %153 {offsets = [0, 0], sizes = [32, 128], strides = [1, 1]} : vector<64x128xf32> to vector<32x128xf32>
    %156 = arith.addf %154, %155 : vector<32x128xf32>
    %157 = arith.negf %156 : vector<32x128xf32>
    %158 = math.exp %157 : vector<32x128xf32>
    %cst_45 = arith.constant 1.000000e+00 : f32
    %159 = vector.broadcast %cst_45 : f32 to vector<32x128xf32>
    %160 = arith.addf %159, %158 : vector<32x128xf32>
    %161 = arith.divf %159, %160 : vector<32x128xf32>
    %162 = vector.extract_strided_slice %152 {offsets = [32, 0], sizes = [32, 128], strides = [1, 1]} : vector<128x128xf32> to vector<32x128xf32>
    %163 = vector.extract_strided_slice %153 {offsets = [32, 0], sizes = [32, 128], strides = [1, 1]} : vector<64x128xf32> to vector<32x128xf32>
    %164 = arith.addf %162, %163 : vector<32x128xf32>
    %165 = arith.negf %164 : vector<32x128xf32>
    %166 = math.exp %165 : vector<32x128xf32>
    %cst_46 = arith.constant 1.000000e+00 : f32
    %167 = vector.broadcast %cst_46 : f32 to vector<32x128xf32>
    %168 = arith.addf %167, %166 : vector<32x128xf32>
    %169 = arith.divf %167, %168 : vector<32x128xf32>
    %170 = vector.extract_strided_slice %152 {offsets = [64, 0], sizes = [32, 128], strides = [1, 1]} : vector<128x128xf32> to vector<32x128xf32>
    %171 = arith.mulf %161, %145 : vector<32x128xf32>
    %cst_47 = arith.constant dense<0.000000e+00> : vector<32x128xf32>
    %172 = tpu.matmul %4, %171, %cst_47 {dimension_numbers = #tpu.dot_dimension_numbers<[1], [0], [0], [1], [0, 0, 1, 1], [], []>, precision = #tpu.contract_precision<fp32>} : vector<32x32xf32>, vector<32x128xf32>, vector<32x128xf32> -> vector<32x128xf32>
    %173 = arith.addf %170, %172 : vector<32x128xf32>
    %174 = math.tanh %173 : vector<32x128xf32>
    %175 = vector.extract_strided_slice %152 {offsets = [96, 0], sizes = [32, 128], strides = [1, 1]} : vector<128x128xf32> to vector<32x128xf32>
    %176 = arith.mulf %169, %145 : vector<32x128xf32>
    %cst_48 = arith.constant 1.000000e+00 : f32
    %177 = vector.broadcast %cst_48 : f32 to vector<32x128xf32>
    %178 = arith.subf %177, %169 : vector<32x128xf32>
    %179 = arith.mulf %178, %174 : vector<32x128xf32>
    %180 = arith.mulf %179, %175 : vector<32x128xf32>
    %181 = arith.addf %176, %180 : vector<32x128xf32>
    %182 = arith.index_cast %c4_i32 : i32 to index
    %c0_49 = arith.constant 0 : index
    %c0_50 = arith.constant 0 : index
    %183 = vector.load %arg6[%182, %c0_49, %c0_50] : memref<8x32x128xf32, #tpu.memory_space<vmem>>, vector<1x32x128xf32>
    %184 = vector.shape_cast %183 : vector<1x32x128xf32> to vector<32x128xf32>
    %185 = vector.shape_cast %181 : vector<32x128xf32> to vector<1x32x128xf32>
    tpu.vector_store %arg6[%182, %c0_49, %c0_50], %185 {strides = array<i32>} : memref<8x32x128xf32, #tpu.memory_space<vmem>>, vector<1x32x128xf32>,
    %c5_i32 = arith.constant 5 : i32
    %186 = arith.index_cast %c5_i32 : i32 to index
    %c0_51 = arith.constant 0 : index
    %c0_52 = arith.constant 0 : index
    %187 = vector.load %arg2[%186, %c0_51, %c0_52] : memref<8x128x128xf32, #tpu.memory_space<vmem>>, vector<1x128x128xf32>
    %188 = vector.shape_cast %187 : vector<1x128x128xf32> to vector<128x128xf32>
    %cst_53 = arith.constant dense<0.000000e+00> : vector<64x128xf32>
    %189 = tpu.matmul %3, %181, %cst_53 {dimension_numbers = #tpu.dot_dimension_numbers<[1], [0], [0], [1], [0, 0, 1, 1], [], []>, precision = #tpu.contract_precision<fp32>} : vector<64x32xf32>, vector<32x128xf32>, vector<64x128xf32> -> vector<64x128xf32>
    %190 = vector.extract_strided_slice %188 {offsets = [0, 0], sizes = [32, 128], strides = [1, 1]} : vector<128x128xf32> to vector<32x128xf32>
    %191 = vector.extract_strided_slice %189 {offsets = [0, 0], sizes = [32, 128], strides = [1, 1]} : vector<64x128xf32> to vector<32x128xf32>
    %192 = arith.addf %190, %191 : vector<32x128xf32>
    %193 = arith.negf %192 : vector<32x128xf32>
    %194 = math.exp %193 : vector<32x128xf32>
    %cst_54 = arith.constant 1.000000e+00 : f32
    %195 = vector.broadcast %cst_54 : f32 to vector<32x128xf32>
    %196 = arith.addf %195, %194 : vector<32x128xf32>
    %197 = arith.divf %195, %196 : vector<32x128xf32>
    %198 = vector.extract_strided_slice %188 {offsets = [32, 0], sizes = [32, 128], strides = [1, 1]} : vector<128x128xf32> to vector<32x128xf32>
    %199 = vector.extract_strided_slice %189 {offsets = [32, 0], sizes = [32, 128], strides = [1, 1]} : vector<64x128xf32> to vector<32x128xf32>
    %200 = arith.addf %198, %199 : vector<32x128xf32>
    %201 = arith.negf %200 : vector<32x128xf32>
    %202 = math.exp %201 : vector<32x128xf32>
    %cst_55 = arith.constant 1.000000e+00 : f32
    %203 = vector.broadcast %cst_55 : f32 to vector<32x128xf32>
    %204 = arith.addf %203, %202 : vector<32x128xf32>
    %205 = arith.divf %203, %204 : vector<32x128xf32>
    %206 = vector.extract_strided_slice %188 {offsets = [64, 0], sizes = [32, 128], strides = [1, 1]} : vector<128x128xf32> to vector<32x128xf32>
    %207 = arith.mulf %197, %181 : vector<32x128xf32>
    %cst_56 = arith.constant dense<0.000000e+00> : vector<32x128xf32>
    %208 = tpu.matmul %4, %207, %cst_56 {dimension_numbers = #tpu.dot_dimension_numbers<[1], [0], [0], [1], [0, 0, 1, 1], [], []>, precision = #tpu.contract_precision<fp32>} : vector<32x32xf32>, vector<32x128xf32>, vector<32x128xf32> -> vector<32x128xf32>
    %209 = arith.addf %206, %208 : vector<32x128xf32>
    %210 = math.tanh %209 : vector<32x128xf32>
    %211 = vector.extract_strided_slice %188 {offsets = [96, 0], sizes = [32, 128], strides = [1, 1]} : vector<128x128xf32> to vector<32x128xf32>
    %212 = arith.mulf %205, %181 : vector<32x128xf32>
    %cst_57 = arith.constant 1.000000e+00 : f32
    %213 = vector.broadcast %cst_57 : f32 to vector<32x128xf32>
    %214 = arith.subf %213, %205 : vector<32x128xf32>
    %215 = arith.mulf %214, %210 : vector<32x128xf32>
    %216 = arith.mulf %215, %211 : vector<32x128xf32>
    %217 = arith.addf %212, %216 : vector<32x128xf32>
    %218 = arith.index_cast %c5_i32 : i32 to index
    %c0_58 = arith.constant 0 : index
    %c0_59 = arith.constant 0 : index
    %219 = vector.load %arg6[%218, %c0_58, %c0_59] : memref<8x32x128xf32, #tpu.memory_space<vmem>>, vector<1x32x128xf32>
    %220 = vector.shape_cast %219 : vector<1x32x128xf32> to vector<32x128xf32>
    %221 = vector.shape_cast %217 : vector<32x128xf32> to vector<1x32x128xf32>
    tpu.vector_store %arg6[%218, %c0_58, %c0_59], %221 {strides = array<i32>} : memref<8x32x128xf32, #tpu.memory_space<vmem>>, vector<1x32x128xf32>,
    %c6_i32 = arith.constant 6 : i32
    %222 = arith.index_cast %c6_i32 : i32 to index
    %c0_60 = arith.constant 0 : index
    %c0_61 = arith.constant 0 : index
    %223 = vector.load %arg2[%222, %c0_60, %c0_61] : memref<8x128x128xf32, #tpu.memory_space<vmem>>, vector<1x128x128xf32>
    %224 = vector.shape_cast %223 : vector<1x128x128xf32> to vector<128x128xf32>
    %cst_62 = arith.constant dense<0.000000e+00> : vector<64x128xf32>
    %225 = tpu.matmul %3, %217, %cst_62 {dimension_numbers = #tpu.dot_dimension_numbers<[1], [0], [0], [1], [0, 0, 1, 1], [], []>, precision = #tpu.contract_precision<fp32>} : vector<64x32xf32>, vector<32x128xf32>, vector<64x128xf32> -> vector<64x128xf32>
    %226 = vector.extract_strided_slice %224 {offsets = [0, 0], sizes = [32, 128], strides = [1, 1]} : vector<128x128xf32> to vector<32x128xf32>
    %227 = vector.extract_strided_slice %225 {offsets = [0, 0], sizes = [32, 128], strides = [1, 1]} : vector<64x128xf32> to vector<32x128xf32>
    %228 = arith.addf %226, %227 : vector<32x128xf32>
    %229 = arith.negf %228 : vector<32x128xf32>
    %230 = math.exp %229 : vector<32x128xf32>
    %cst_63 = arith.constant 1.000000e+00 : f32
    %231 = vector.broadcast %cst_63 : f32 to vector<32x128xf32>
    %232 = arith.addf %231, %230 : vector<32x128xf32>
    %233 = arith.divf %231, %232 : vector<32x128xf32>
    %234 = vector.extract_strided_slice %224 {offsets = [32, 0], sizes = [32, 128], strides = [1, 1]} : vector<128x128xf32> to vector<32x128xf32>
    %235 = vector.extract_strided_slice %225 {offsets = [32, 0], sizes = [32, 128], strides = [1, 1]} : vector<64x128xf32> to vector<32x128xf32>
    %236 = arith.addf %234, %235 : vector<32x128xf32>
    %237 = arith.negf %236 : vector<32x128xf32>
    %238 = math.exp %237 : vector<32x128xf32>
    %cst_64 = arith.constant 1.000000e+00 : f32
    %239 = vector.broadcast %cst_64 : f32 to vector<32x128xf32>
    %240 = arith.addf %239, %238 : vector<32x128xf32>
    %241 = arith.divf %239, %240 : vector<32x128xf32>
    %242 = vector.extract_strided_slice %224 {offsets = [64, 0], sizes = [32, 128], strides = [1, 1]} : vector<128x128xf32> to vector<32x128xf32>
    %243 = arith.mulf %233, %217 : vector<32x128xf32>
    %cst_65 = arith.constant dense<0.000000e+00> : vector<32x128xf32>
    %244 = tpu.matmul %4, %243, %cst_65 {dimension_numbers = #tpu.dot_dimension_numbers<[1], [0], [0], [1], [0, 0, 1, 1], [], []>, precision = #tpu.contract_precision<fp32>} : vector<32x32xf32>, vector<32x128xf32>, vector<32x128xf32> -> vector<32x128xf32>
    %245 = arith.addf %242, %244 : vector<32x128xf32>
    %246 = math.tanh %245 : vector<32x128xf32>
    %247 = vector.extract_strided_slice %224 {offsets = [96, 0], sizes = [32, 128], strides = [1, 1]} : vector<128x128xf32> to vector<32x128xf32>
    %248 = arith.mulf %241, %217 : vector<32x128xf32>
    %cst_66 = arith.constant 1.000000e+00 : f32
    %249 = vector.broadcast %cst_66 : f32 to vector<32x128xf32>
    %250 = arith.subf %249, %241 : vector<32x128xf32>
    %251 = arith.mulf %250, %246 : vector<32x128xf32>
    %252 = arith.mulf %251, %247 : vector<32x128xf32>
    %253 = arith.addf %248, %252 : vector<32x128xf32>
    %254 = arith.index_cast %c6_i32 : i32 to index
    %c0_67 = arith.constant 0 : index
    %c0_68 = arith.constant 0 : index
    %255 = vector.load %arg6[%254, %c0_67, %c0_68] : memref<8x32x128xf32, #tpu.memory_space<vmem>>, vector<1x32x128xf32>
    %256 = vector.shape_cast %255 : vector<1x32x128xf32> to vector<32x128xf32>
    %257 = vector.shape_cast %253 : vector<32x128xf32> to vector<1x32x128xf32>
    tpu.vector_store %arg6[%254, %c0_67, %c0_68], %257 {strides = array<i32>} : memref<8x32x128xf32, #tpu.memory_space<vmem>>, vector<1x32x128xf32>,
    %c7_i32 = arith.constant 7 : i32
    %258 = arith.index_cast %c7_i32 : i32 to index
    %c0_69 = arith.constant 0 : index
    %c0_70 = arith.constant 0 : index
    %259 = vector.load %arg2[%258, %c0_69, %c0_70] : memref<8x128x128xf32, #tpu.memory_space<vmem>>, vector<1x128x128xf32>
    %260 = vector.shape_cast %259 : vector<1x128x128xf32> to vector<128x128xf32>
    %cst_71 = arith.constant dense<0.000000e+00> : vector<64x128xf32>
    %261 = tpu.matmul %3, %253, %cst_71 {dimension_numbers = #tpu.dot_dimension_numbers<[1], [0], [0], [1], [0, 0, 1, 1], [], []>, precision = #tpu.contract_precision<fp32>} : vector<64x32xf32>, vector<32x128xf32>, vector<64x128xf32> -> vector<64x128xf32>
    %262 = vector.extract_strided_slice %260 {offsets = [0, 0], sizes = [32, 128], strides = [1, 1]} : vector<128x128xf32> to vector<32x128xf32>
    %263 = vector.extract_strided_slice %261 {offsets = [0, 0], sizes = [32, 128], strides = [1, 1]} : vector<64x128xf32> to vector<32x128xf32>
    %264 = arith.addf %262, %263 : vector<32x128xf32>
    %265 = arith.negf %264 : vector<32x128xf32>
    %266 = math.exp %265 : vector<32x128xf32>
    %cst_72 = arith.constant 1.000000e+00 : f32
    %267 = vector.broadcast %cst_72 : f32 to vector<32x128xf32>
    %268 = arith.addf %267, %266 : vector<32x128xf32>
    %269 = arith.divf %267, %268 : vector<32x128xf32>
    %270 = vector.extract_strided_slice %260 {offsets = [32, 0], sizes = [32, 128], strides = [1, 1]} : vector<128x128xf32> to vector<32x128xf32>
    %271 = vector.extract_strided_slice %261 {offsets = [32, 0], sizes = [32, 128], strides = [1, 1]} : vector<64x128xf32> to vector<32x128xf32>
    %272 = arith.addf %270, %271 : vector<32x128xf32>
    %273 = arith.negf %272 : vector<32x128xf32>
    %274 = math.exp %273 : vector<32x128xf32>
    %cst_73 = arith.constant 1.000000e+00 : f32
    %275 = vector.broadcast %cst_73 : f32 to vector<32x128xf32>
    %276 = arith.addf %275, %274 : vector<32x128xf32>
    %277 = arith.divf %275, %276 : vector<32x128xf32>
    %278 = vector.extract_strided_slice %260 {offsets = [64, 0], sizes = [32, 128], strides = [1, 1]} : vector<128x128xf32> to vector<32x128xf32>
    %279 = arith.mulf %269, %253 : vector<32x128xf32>
    %cst_74 = arith.constant dense<0.000000e+00> : vector<32x128xf32>
    %280 = tpu.matmul %4, %279, %cst_74 {dimension_numbers = #tpu.dot_dimension_numbers<[1], [0], [0], [1], [0, 0, 1, 1], [], []>, precision = #tpu.contract_precision<fp32>} : vector<32x32xf32>, vector<32x128xf32>, vector<32x128xf32> -> vector<32x128xf32>
    %281 = arith.addf %278, %280 : vector<32x128xf32>
    %282 = math.tanh %281 : vector<32x128xf32>
    %283 = vector.extract_strided_slice %260 {offsets = [96, 0], sizes = [32, 128], strides = [1, 1]} : vector<128x128xf32> to vector<32x128xf32>
    %284 = arith.mulf %277, %253 : vector<32x128xf32>
    %cst_75 = arith.constant 1.000000e+00 : f32
    %285 = vector.broadcast %cst_75 : f32 to vector<32x128xf32>
    %286 = arith.subf %285, %277 : vector<32x128xf32>
    %287 = arith.mulf %286, %282 : vector<32x128xf32>
    %288 = arith.mulf %287, %283 : vector<32x128xf32>
    %289 = arith.addf %284, %288 : vector<32x128xf32>
    %290 = arith.index_cast %c7_i32 : i32 to index
    %c0_76 = arith.constant 0 : index
    %c0_77 = arith.constant 0 : index
    %291 = vector.load %arg6[%290, %c0_76, %c0_77] : memref<8x32x128xf32, #tpu.memory_space<vmem>>, vector<1x32x128xf32>
    %292 = vector.shape_cast %291 : vector<1x32x128xf32> to vector<32x128xf32>
    %293 = vector.shape_cast %289 : vector<32x128xf32> to vector<1x32x128xf32>
    tpu.vector_store %arg6[%290, %c0_76, %c0_77], %293 {strides = array<i32>} : memref<8x32x128xf32, #tpu.memory_space<vmem>>, vector<1x32x128xf32>,
    %c8_i32 = arith.constant 8 : i32
    %c0_78 = arith.constant 0 : index
    %c0_79 = arith.constant 0 : index
    %294 = vector.load %arg7[%c0_78, %c0_79] : memref<32x128xf32, #tpu.memory_space<vmem>>, vector<32x128xf32>
    tpu.vector_store %arg7[%c0_78, %c0_79], %289 {strides = array<i32>} : memref<32x128xf32, #tpu.memory_space<vmem>>, vector<32x128xf32>,
    return
  }
  func.func @transform_0(%arg0: i32, %arg1: i32) -> (i32, i32, i32) {
    %c0_i32 = arith.constant 0 : i32
    %c0_i32_0 = arith.constant 0 : i32
    return %arg1, %c0_i32, %arg0 : i32, i32, i32
  }
  func.func @transform_1(%arg0: i32, %arg1: i32) -> (i32, i32) {
    %c0_i32 = arith.constant 0 : i32
    %c0_i32_0 = arith.constant 0 : i32
    return %c0_i32, %arg0 : i32, i32
  }
  func.func @transform_2(%arg0: i32, %arg1: i32) -> (i32, i32) {
    %c0_i32 = arith.constant 0 : i32
    %c0_i32_0 = arith.constant 0 : i32
    %c0_i32_1 = arith.constant 0 : i32
    return %c0_i32, %c0_i32_0 : i32, i32
  }
  func.func @transform_3(%arg0: i32, %arg1: i32) -> (i32, i32) {
    %c0_i32 = arith.constant 0 : i32
    %c0_i32_0 = arith.constant 0 : i32
    %c0_i32_1 = arith.constant 0 : i32
    return %c0_i32, %c0_i32_0 : i32, i32
  }
  func.func @transform_4(%arg0: i32, %arg1: i32) -> (i32, i32, i32) {
    %c0_i32 = arith.constant 0 : i32
    %c0_i32_0 = arith.constant 0 : i32
    return %arg1, %c0_i32, %arg0 : i32, i32, i32
  }
}

</mosaic_0001>

<bundles_post_ra>
// kernel: modified_gru_forward.1
= control target key start
LH: loop header
LB: loop body
LE: loop exit
PB: predicated region body
PF: predicated region fallthrough
CT: control target
= control target key end

     0   :  { %vm61_vm0 = vcmask 261120   ;;  %s18295_s1 = inlined_call_operand.vmem [shape: f32[32,128], index: 1, kind: input, shape index: {}]   ;;  %s18296_s2 = inlined_call_operand.vmem [shape: f32[64,32], index: 2, kind: input, shape index: {}]   ;;  %s18297_s3 = inlined_call_operand.vmem [shape: f32[32,32], index: 3, kind: input, shape index: {}]   ;;  %s18298_s0 = inlined_call_operand.vmem [shape: f32[8,128,128], index: 0, kind: input, shape index: {}]   ;;  %s18299_s4 = inlined_call_operand.vmem [shape: f32[8,32,128], index: 4, kind: output, shape index: {}]  }
   0x1   :  { %v16560_v0 = vld [vmem:[%s18295_s1] sm:$0xff]  ;;  %v16565_v1 = vld [vmem:[%s18295_s1 + $0x8] sm:$0xff]  ;;  %v16570_v2 = vld [vmem:[%s18295_s1 + $0x10] sm:$0xff] }
   0x2   :  { %v87_v3 = vand.u32 4294901760, %v16560_v0  ;;  %v90_v4 = vand.u32 4294901760, %v16565_v1  ;;  %v16577_v5 = vld [vmem:[%s18295_s1 + $0x18] sm:$0xff]  ;;  %v93_v6 = vand.u32 4294901760, %v16570_v2  ;;  %v29_v7 = vld [vmem:[%s18296_s2] sm:$0xff]  ;;  %v30_v8 = vld [vmem:[%s18296_s2 + $0x8] sm:$0xff] }
   0x3   :  { %v96_v9 = vand.u32 4294901760, %v16577_v5  ;;  %v63_v10 = vsel %vm61_vm0, %v29_v7, 0  ;;  %v66_v11 = vsel %vm61_vm0, %v30_v8, 0  ;;  %v31_v12 = vld [vmem:[%s18296_s2 + $0x10] sm:$0xff]  ;;  %v32_v13 = vld [vmem:[%s18296_s2 + $0x18] sm:$0xff]  ;;  %v33_v14 = vld [vmem:[%s18296_s2 + $0x20] sm:$0xff] }
   0x4   :  { %v16598_v15 = vpack.c.bf16 %v90_v4, %v87_v3  ;;  %v16600_v16 = vand.u32 4294901760, %v63_v10  ;;  %v16602_v17 = vand.u32 4294901760, %v66_v11  ;;  %v69_v18 = vsel %vm61_vm0, %v31_v12, 0  ;;  %v34_v19 = vld [vmem:[%s18296_s2 + $0x28] sm:$0xff]  ;;  %v35_v48 = vld [vmem:[%s18296_s2 + $0x30] sm:$0xff]  ;;  %v36_v49 = vld [vmem:[%s18296_s2 + $0x38] sm:$0xff] }
   0x5   :  { %v16612_v20 = vpack.c.bf16 %v96_v9, %v93_v6  ;;  %v16614_v21 = vand.u32 4294901760, %v69_v18  ;;  %v72_v22 = vsel %vm61_vm0, %v32_v13, 0  ;;  %v75_v23 = vsel %vm61_vm0, %v33_v14, 0 }
   0x6   :  { %14965 = vmatprep.subr.bf16.mxu0 %v16598_v15  ;;  %v16620_v24 = vsub.f32 %v63_v10, %v16600_v16  ;;  %v16623_v25 = vsub.f32 %v66_v11, %v16602_v17  ;;  %v16625_v26 = vand.u32 4294901760, %v72_v22  ;;  %v16627_v27 = vand.u32 4294901760, %v75_v23 }
   0x7   :  { %14967 = vmatpush3.bf16.msra.mxu0 %v16598_v15  ;;  %v16631_v28 = vsub.f32 %v69_v18, %v16614_v21  ;;  %v78_v29 = vsel %vm61_vm0, %v34_v19, 0  ;;  %v16635_v30 = vsub.f32 %v16560_v0, %v87_v3  ;;  %v16638_v31 = vsub.f32 %v16565_v1, %v90_v4 }
   0x8   :  { %18341 = vst [vmem:[#allocation3_spill] sm:$0xff] %v16620_v24  ;;  %18342 = vst [vmem:[#allocation4_spill] sm:$0xff] %v16623_v25  ;;  %14969 = vmatprep.subr.bf16.mxu0 %v16612_v20  ;;  %v16642_v32 = vand.u32 4294901760, %v16620_v24  ;;  %v16645_v33 = vand.u32 4294901760, %v16623_v25  ;;  %v16648_v34 = vsub.f32 %v72_v22, %v16625_v26  ;;  %v16651_v35 = vsub.f32 %v75_v23, %v16627_v27 }
   0x9   :  { %18343 = vst [vmem:[#allocation5_spill] sm:$0xff] %v16631_v28  ;;  %v16654_v36 = vand.u32 4294901760, %v16631_v28  ;;  %v16656_v37 = vand.u32 4294901760, %v78_v29  ;;  %v238_v38 = vand.u32 4294901760, %v16635_v30  ;;  %v245_v39 = vand.u32 4294901760, %v16638_v31 }
   0xa   :  { %18344 = vst [vmem:[#allocation6_spill] sm:$0xff] %v16642_v32  ;;  %18345 = vst [vmem:[#allocation7_spill] sm:$0xff] %v16645_v33  ;;  %v158_v40 = vsub.f32 %v16620_v24, %v16642_v32  ;;  %v168_v41 = vsub.f32 %v16623_v25, %v16645_v33  ;;  %v16665_v42 = vand.u32 4294901760, %v16648_v34  ;;  %v16668_v43 = vand.u32 4294901760, %v16651_v35 }
   0xb   :  { %18346 = vst [vmem:[#allocation8_spill] sm:$0xff] %v16648_v34  ;;  %18347 = vst [vmem:[#allocation9_spill] sm:$0xff] %v16651_v35  ;;  %14971 = vmatpush3.bf16.msra.mxu0 %v16612_v20  ;;  %v178_v44 = vsub.f32 %v16631_v28, %v16654_v36  ;;  %v16674_v45 = vsub.f32 %v78_v29, %v16656_v37  ;;  %v239_v46 = vsub.f32 %v16635_v30, %v238_v38 }
   0xc   :  { %18348 = vst [vmem:[#allocation10_spill] sm:$0xff] %v16654_v36  ;;  %18349 = vst [vmem:[#allocation11_spill] sm:$0xff] %v16665_v42  ;;  %v246_v47 = vsub.f32 %v16638_v31, %v245_v39  ;;  %v16688_v50 = vand.u32 4294901760, %v158_v40  ;;  %v16690_v51 = vand.u32 4294901760, %v168_v41  ;;  %v188_v52 = vsub.f32 %v16648_v34, %v16665_v42 }
   0xd   :  { %18350 = vst [vmem:[#allocation12_spill] sm:$0xff] %v16668_v43  ;;  %18351 = vst [vmem:[#allocation13_spill] sm:$0xff] %v16674_v45  ;;  %v198_v53 = vsub.f32 %v16651_v35, %v16668_v43  ;;  %v16696_v54 = vand.u32 4294901760, %v178_v44  ;;  %v16699_v55 = vand.u32 4294901760, %v16674_v45  ;;  %v240_v56 = vand.u32 4294901760, %v239_v46 }
   0xe   :  { %v247_v57 = vand.u32 4294901760, %v246_v47  ;;  %13340 = vmatprep.mubr.f32.mxu0 %v16688_v50  ;;  %v16702_v58 = vand.u32 4294901760, %v188_v52  ;;  %v81_v59 = vsel %vm61_vm0, %v35_v48, 0  ;;  %v84_v60 = vsel %vm61_vm0, %v36_v49, 0 }
   0xf   :  { %18352 = vst [vmem:[#allocation14_spill] sm:$0xff] %v16699_v55  ;;  %13341 = vmatmul.mubr.f32.vlgmr.msra.gmra.mrb[0].mxu0 %v16690_v51  ;;  %v208_v61 = vsub.f32 %v16674_v45, %v16699_v55  ;;  %v16709_v63 = vand.u32 4294901760, %v81_v59  ;;  %v16711_v3 = vand.u32 4294901760, %v84_v60  ;;  %v16714_v4 = vand.u32 4294901760, %v198_v53 }
  0x10   :  { %v14972_v62 = vpack.c.bf16 %v247_v57, %v240_v56  ;;  %13343 = vmatprep.mubr.f32.mxu0 %v16696_v54  ;;  %v251_v7 = vsub.f32 %v16570_v2, %v93_v6  ;;  %v258_v8 = vsub.f32 %v16577_v5, %v96_v9  ;;  %v14980_v47 = vpack.c.bf16 %v16638_v31, %v16635_v30  ;;  %v46_v56 = vld [vmem:[%s18298_s0 + $0x8] sm:$0xff]  ;;  %v45_v57 = vld [vmem:[%s18298_s0] sm:$0xff] }
  0x11   :  { %18353 = vst [vmem:[#allocation15_spill] sm:$0xff] %v16711_v3  ;;  %v16723_v10 = vsub.f32 %v81_v59, %v16709_v63  ;;  %v16726_v11 = vsub.f32 %v84_v60, %v16711_v3  ;;  %v16729_v14 = vand.u32 4294901760, %v208_v61  ;;  %v14996_v49 = vpack.c.bf16 %v245_v39, %v238_v38 }
  0x12   :  { %14973 = vmatprep.subr.bf16.mxu0 %v14972_v62  ;;  %v252_v12 = vand.u32 4294901760, %v251_v7  ;;  %v259_v13 = vand.u32 4294901760, %v258_v8  ;;  %v14984_v48 = vpack.c.bf16 %v258_v8, %v251_v7 }
  0x13   :  { %18354 = vst [vmem:[#allocation16_spill] sm:$0xff] %v16723_v10  ;;  %18355 = vst [vmem:[#allocation17_spill] sm:$0xff] %v16726_v11  ;;  %14975 = vmatpush3.bf16.msra.mxu0 %v14972_v62  ;;  %v16732_v6 = vand.u32 4294901760, %v16723_v10  ;;  %v16735_v18 = vand.u32 4294901760, %v16726_v11 }
  0x14   :  { %13344 = vmatmul.mubr.f32.gmra.mrb[2].mxu0 %v16702_v58  ;;  %v253_v9 = vsub.f32 %v251_v7, %v252_v12  ;;  %v260_v19 = vsub.f32 %v258_v8, %v259_v13  ;;  %v15000_v52 = vpack.c.bf16 %v259_v13, %v252_v12  ;;  %v48_v7 = vld [vmem:[%s18298_s0 + $0x18] sm:$0xff]  ;;  %v47_v12 = vld [vmem:[%s18298_s0 + $0x10] sm:$0xff] }
  0x15   :  { %18356 = vst [vmem:[#allocation18_spill] sm:$0xff] %v16732_v6  ;;  %18357 = vst [vmem:[#allocation19_spill] sm:$0xff] %v16735_v18  ;;  %13346 = vmatprep.mubr.f32.mxu0 %v16714_v4  ;;  %v218_v22 = vsub.f32 %v16723_v10, %v16732_v6  ;;  %v228_v23 = vsub.f32 %v16726_v11, %v16735_v18 }
  0x16   :  { %v254_v29 = vand.u32 4294901760, %v253_v9  ;;  %v261_v40 = vand.u32 4294901760, %v260_v19 }
  0x17   :  { %v16743_v41 = vand.u32 4294901760, %v218_v22  ;;  %v16745_v44 = vand.u32 4294901760, %v228_v23 }
  0x18   :  { %13347 = vmatmul.mubr.f32.gmra.mrb[4].mxu0 %v16729_v14  ;;  %v14976_v46 = vpack.c.bf16 %v261_v40, %v254_v29 }
  0x19   :  { %13349 = vmatprep.mubr.f32.mxu0 %v16743_v41 }
  0x1a   :  { %14977 = vmatprep.subr.bf16.mxu0 %v14976_v46 }
  0x1b   :  { %14979 = vmatpush3.bf16.msra.mxu0 %v14976_v46 }
  0x1c   :  { %13350 = vmatmul.mubr.f32.gmra.mrb[6].mxu0 %v16745_v44  ;;  %14981 = vmatprep.subr.bf16.mxu0 %v14980_v47 }
  0x1d   :  { %13360 = vmatprep.mubr.f32.mxu0 %v16600_v16 }
  0x20   :  { %13361 = vmatmul.mubr.f32.vlgmr.msra.gmra.mrb[0].mxu0 %v16602_v17 }
  0x21   :  { %13363 = vmatprep.mubr.f32.mxu0 %v16614_v21  ;;  %14983 = vmatpush3.bf16.msra.mxu0 %v14980_v47 }
  0x22   :  { %14985 = vmatprep.subr.bf16.mxu0 %v14984_v48 }
  0x24   :  { %13364 = vmatmul.mubr.f32.gmra.mrb[2].mxu0 %v16625_v26 }
  0x25   :  { %13366 = vmatprep.mubr.f32.mxu0 %v16627_v27  ;;  %14987 = vmatpush3.bf16.msra.mxu0 %v14984_v48 }
  0x26   :  { %14989 = vmatprep.subr.bf16.mxu0 %v16598_v15 }
  0x28   :  { %13367 = vmatmul.mubr.f32.gmra.mrb[4].mxu0 %v16656_v37 }
  0x29   :  { %13369 = vmatprep.mubr.f32.mxu0 %v16709_v63 }
  0x2c   :  { %13370 = vmatmul.mubr.f32.gmra.mrb[6].mxu0 %v16711_v3 }
  0x2d   :  { %13380 = vmatprep.mubr.f32.mxu0 %v16620_v24 }
  0x30   :  { %13381 = vmatmul.mubr.f32.vlgmr.msra.gmra.mrb[0].mxu0 %v16623_v25 }
  0x31   :  { %13383 = vmatprep.mubr.f32.mxu0 %v16631_v28  ;;  %14991 = vmatpush3.bf16.msra.mxu0 %v16598_v15 }
  0x32   :  { %14993 = vmatprep.subr.bf16.mxu0 %v16612_v20 }
  0x34   :  { %13384 = vmatmul.mubr.f32.gmra.mrb[2].mxu0 %v16648_v34 }
  0x35   :  { %13386 = vmatprep.mubr.f32.mxu0 %v16651_v35  ;;  %14995 = vmatpush3.bf16.msra.mxu0 %v16612_v20 }
  0x36   :  { %14997 = vmatprep.subr.bf16.mxu0 %v14996_v49 }
  0x38   :  { %13387 = vmatmul.mubr.f32.gmra.mrb[4].mxu0 %v16674_v45 }
  0x39   :  { %13389 = vmatprep.mubr.f32.mxu0 %v16723_v10 }
  0x3c   :  { %13390 = vmatmul.mubr.f32.gmra.mrb[6].mxu0 %v16726_v11 }
  0x3d   :  { %13400 = vmatprep.mubr.f32.mxu0 %v16642_v32 }
  0x40   :  { %13401 = vmatmul.mubr.f32.vlgmr.msra.gmra.mrb[0].mxu0 %v16645_v33 }
  0x41   :  { %13403 = vmatprep.mubr.f32.mxu0 %v16654_v36  ;;  %14999 = vmatpush3.bf16.msra.mxu0 %v14996_v49 }
  0x42   :  { %15001 = vmatprep.subr.bf16.mxu0 %v15000_v52 }
  0x44   :  { %13404 = vmatmul.mubr.f32.gmra.mrb[2].mxu0 %v16665_v42 }
  0x45   :  { %13406 = vmatprep.mubr.f32.mxu0 %v16668_v43  ;;  %15003 = vmatpush3.bf16.msra.mxu0 %v15000_v52 }
  0x46   :  { %15005 = vmatprep.subr.bf16.mxu0 %v16598_v15 }
  0x48   :  { %13407 = vmatmul.mubr.f32.gmra.mrb[4].mxu0 %v16699_v55 }
  0x49   :  { %13409 = vmatprep.mubr.f32.mxu0 %v16732_v6 }
  0x4c   :  { %13410 = vmatmul.mubr.f32.gmra.mrb[6].mxu0 %v16735_v18 }
  0x4d   :  { %13420 = vmatprep.mubr.f32.mxu0 %v16600_v16 }
  0x50   :  { %13421 = vmatmul.mubr.f32.vlgmr.msra.gmra.mrb[0].mxu0 %v16602_v17 }
  0x51   :  { %13423 = vmatprep.mubr.f32.mxu0 %v16614_v21  ;;  %15007 = vmatpush3.bf16.msra.mxu0 %v16598_v15  ;;  %v37_v15 = vld [vmem:[%s18297_s3] sm:$0xff] }
  0x52   :  { %15009 = vmatprep.subr.bf16.mxu0 %v16612_v20 }
  0x54   :  { %13424 = vmatmul.mubr.f32.gmra.mrb[2].mxu0 %v16625_v26 }
  0x55   :  { %13426 = vmatprep.mubr.f32.mxu0 %v16627_v27  ;;  %15011 = vmatpush3.bf16.msra.mxu0 %v16612_v20  ;;  %v933_v20 = vsel %vm61_vm0, %v37_v15, 0 }
  0x56   :  { %v16807_v30 = vand.u32 4294901760, %v933_v20 }
  0x58   :  { %13427 = vmatmul.mubr.f32.gmra.mrb[4].mxu0 %v16656_v37  ;;  %v16810_v31 = vsub.f32 %v933_v20, %v16807_v30 }
  0x59   :  { %13429 = vmatprep.mubr.f32.mxu0 %v16709_v63 }
  0x5a   :  { %v16813_v38 = vand.u32 4294901760, %v16810_v31 }
  0x5c   :  { %13430 = vmatmul.mubr.f32.gmra.mrb[6].mxu0 %v16711_v3  ;;  %v1016_v39 = vsub.f32 %v16810_v31, %v16813_v38 }
  0x5d   :  { %13440 = vmatprep.mubr.f32.mxu0 %v16600_v16 }
  0x5e   :  { %v16817_v53 = vand.u32 4294901760, %v1016_v39 }
  0x60   :  { %13441 = vmatmul.mubr.f32.vlgmr.msra.gmra.mrb[0].mxu0 %v16602_v17  ;;  %18358 = vst [vmem:[#allocation20_spill] sm:$0xff] %v16817_v53  ;;  %13460 = vmatprep.mubr.f32.mxu1 %v16817_v53 }
  0x61   :  { %13443 = vmatprep.mubr.f32.mxu0 %v16614_v21 }
  0x64   :  { %13444 = vmatmul.mubr.f32.gmra.mrb[2].mxu0 %v16625_v26 }
  0x65   :  { %13446 = vmatprep.mubr.f32.mxu0 %v16627_v27 }
  0x68   :  { %13447 = vmatmul.mubr.f32.gmra.mrb[4].mxu0 %v16656_v37 }
  0x69   :  { %13449 = vmatprep.mubr.f32.mxu0 %v16709_v63 }
  0x6c   :  { %13450 = vmatmul.mubr.f32.gmra.mrb[6].mxu0 %v16711_v3 }
  0x6d   :  { %13664 = vmatprep.mubr.f32.mxu0 %v16817_v53 }
 0x133   :  { %v13442_v59 = vpop.f32.mrb[0].mxu0 }
 0x134   :  { %v873_v60 = vadd.f32 %v13442_v59, %v46_v56  ;;  %v826_v61 = vpop.f32.mrb[1].mxu0  ;;  %v38_v56 = vld [vmem:[%s18297_s3 + $0x8] sm:$0xff]  ;;  %v39_v59 = vld [vmem:[%s18297_s3 + $0x10] sm:$0xff] }
 0x135   :  { %v872_v62 = vadd.f32 %v826_v61, %v45_v57 }
 0x136   :  { %v12169_v8 = vmul.f32 -1.442695, %v873_v60 }
 0x137   :  { %v12168_v13 = vmul.f32 -1.442695, %v872_v62  ;;  %v13445_v9 = vpop.f32.mrb[2].mxu0  ;;  %v936_v62 = vsel %vm61_vm0, %v38_v56, 0 }
 0x138   :  { %16212 = vpow2.f32 %v12169_v8  ;;  %v875_v19 = vadd.f32 %v13445_v9, %v48_v7  ;;  %v838_v22 = vpop.f32.mrb[3].mxu0  ;;  %v939_v8 = vsel %vm61_vm0, %v39_v59, 0 }
 0x139   :  { %16214 = vpow2.f32 %v12168_v13  ;;  %v874_v23 = vadd.f32 %v838_v22, %v47_v12  ;;  %v40_v12 = vld [vmem:[%s18297_s3 + $0x18] sm:$0xff]  ;;  %v16852_v13 = vand.u32 4294901760, %v936_v62  ;;  %v16854_v9 = vand.u32 4294901760, %v939_v8 }
 0x13a   :  { %v12171_v29 = vmul.f32 -1.442695, %v875_v19  ;;  %v942_v19 = vsel %vm61_vm0, %v40_v12, 0 }
 0x13b   :  { %v12170_v40 = vmul.f32 -1.442695, %v874_v23  ;;  %v16833_v46 = vpop.f32.mrb[4].mxu0  ;;  %v16858_v22 = vsub.f32 %v936_v62, %v16852_v13 }
 0x13c   :  { %16216 = vpow2.f32 %v12171_v29  ;;  %v16835_v47 = vpop.f32.mrb[5].mxu0  ;;  %v16860_v29 = vand.u32 4294901760, %v942_v19 }
 0x13d   :  { %16218 = vpow2.f32 %v12170_v40  ;;  %v16868_v56 = vand.u32 4294901760, %v16858_v22 }
 0x13f   :  { %v16837_v48 = vpop.f32.mrb[6].mxu0  ;;  %v1026_v18 = vsub.f32 %v16858_v22, %v16868_v56 }
 0x140   :  { %v16839_v49 = vpop.f32.mrb[7].mxu0 }
 0x141   :  { %v16889_v36 = vand.u32 4294901760, %v1026_v18 }
 0x142   :  { %v16213_v52 = vpop.eup %16212 }
 0x143   :  { %v16215_v15 = vpop.eup %16214  ;;  %v889_v20 = vadd.f32 1.0, %v16213_v52 }
 0x144   :  { %v888_v39 = vadd.f32 1.0, %v16215_v15  ;;  %v16864_v15 = vsub.f32 %v939_v8, %v16854_v9 }
 0x145   :  { %16220 = vrcp.f32 %v889_v20 }
 0x146   :  { %v16217_v57 = vpop.eup %16216  ;;  %16222 = vrcp.f32 %v888_v39  ;;  %v16875_v12 = vand.u32 4294901760, %v16864_v15 }
 0x147   :  { %v16219_v60 = vpop.eup %16218  ;;  %v891_v61 = vadd.f32 1.0, %v16217_v57 }
 0x148   :  { %v890_v7 = vadd.f32 1.0, %v16219_v60  ;;  %v16871_v60 = vsub.f32 %v942_v19, %v16860_v29 }
 0x149   :  { %16224 = vrcp.f32 %v891_v61 }
 0x14a   :  { %16226 = vrcp.f32 %v890_v7 }
 0x14f   :  { %v16221_v23 = vpop.eup %16220 }
 0x150   :  { %v16223_v40 = vpop.eup %16222  ;;  %v929_v52 = vmul.f32 %v16221_v23, %v16565_v1 }
 0x151   :  { %v928_v20 = vmul.f32 %v16223_v40, %v16560_v0 }
 0x152   :  { %v948_v39 = vand.u32 4294901760, %v929_v52 }
 0x153   :  { %v16225_v57 = vpop.eup %16224  ;;  %v945_v59 = vand.u32 4294901760, %v928_v20 }
 0x154   :  { %v16227_v61 = vpop.eup %16226  ;;  %v931_v62 = vmul.f32 %v16225_v57, %v16577_v5  ;;  %v1062_v7 = vsub.f32 %v929_v52, %v948_v39  ;;  %v16884_v57 = vand.u32 4294901760, %v16871_v60 }
 0x155   :  { %v930_v8 = vmul.f32 %v16227_v61, %v16570_v2  ;;  %v16878_v23 = vpack.c.bf16 %v948_v39, %v945_v59  ;;  %v1055_v40 = vsub.f32 %v928_v20, %v945_v59  ;;  %v1036_v39 = vsub.f32 %v16864_v15, %v16875_v12 }
 0x156   :  { %v954_v53 = vand.u32 4294901760, %v931_v62  ;;  %v1063_v6 = vand.u32 4294901760, %v1062_v7  ;;  %v1046_v45 = vsub.f32 %v16871_v60, %v16884_v57 }
 0x157   :  { %v951_v55 = vand.u32 4294901760, %v930_v8  ;;  %15013 = vmatprep.subr.bf16.mxu1 %v16878_v23  ;;  %v1056_v19 = vand.u32 4294901760, %v1055_v40  ;;  %v15028_v52 = vpack.c.bf16 %v1062_v7, %v1055_v40 }
 0x158   :  { %15015 = vmatpush3.bf16.msra.mxu1 %v16878_v23  ;;  %v1064_v43 = vsub.f32 %v1062_v7, %v1063_v6  ;;  %v1076_v20 = vsub.f32 %v931_v62, %v954_v53  ;;  %v16893_v7 = vand.u32 4294901760, %v1036_v39 }
 0x159   :  { %v15016_v59 = vpack.c.bf16 %v954_v53, %v951_v55  ;;  %v1057_v61 = vsub.f32 %v1055_v40, %v1056_v19  ;;  %v1069_v42 = vsub.f32 %v930_v8, %v951_v55  ;;  %v15044_v11 = vpack.c.bf16 %v1063_v6, %v1056_v19 }
 0x15a   :  { %v1065_v33 = vand.u32 4294901760, %v1064_v43  ;;  %v1077_v32 = vand.u32 4294901760, %v1076_v20  ;;  %v16896_v43 = vand.u32 4294901760, %v1046_v45 }
 0x15b   :  { %15017 = vmatprep.subr.bf16.mxu1 %v15016_v59  ;;  %v1058_v10 = vand.u32 4294901760, %v1057_v61  ;;  %v1070_v35 = vand.u32 4294901760, %v1069_v42  ;;  %v15032_v34 = vpack.c.bf16 %v1076_v20, %v1069_v42 }
 0x15c   :  { %15019 = vmatpush3.bf16.msra.mxu1 %v15016_v59  ;;  %v1078_v28 = vsub.f32 %v1076_v20, %v1077_v32 }
 0x15d   :  { %v15020_v62 = vpack.c.bf16 %v1065_v33, %v1058_v10  ;;  %v1071_v53 = vsub.f32 %v1069_v42, %v1070_v35  ;;  %v15048_v40 = vpack.c.bf16 %v1077_v32, %v1070_v35  ;;  %v49_v32 = vld [vmem:[%s18298_s0 + $0x20] sm:$0xff]  ;;  %v52_v33 = vld [vmem:[%s18298_s0 + $0x38] sm:$0xff]  ;;  %v51_v35 = vld [vmem:[%s18298_s0 + $0x30] sm:$0xff] }
 0x15e   :  { %v1079_v55 = vand.u32 4294901760, %v1078_v28  ;;  %v50_v28 = vld [vmem:[%s18298_s0 + $0x28] sm:$0xff]  ;;  %v900_v42 = vadd.f32 %v16835_v47, %v49_v32  ;;  %v903_v45 = vadd.f32 %v16837_v48, %v52_v33  ;;  %v902_v10 = vadd.f32 %v16839_v49, %v51_v35  ;;  %v53_v49 = vld [vmem:[%s18298_s0 + $0x40] sm:$0xff] }
 0x15f   :  { %13461 = vmatmul.mubr.f32.vlgmr.msra.gmra.mrb[0].mxu1 %v16889_v36  ;;  %15021 = vmatprep.subr.bf16.mxu1 %v15020_v62  ;;  %v1072_v6 = vand.u32 4294901760, %v1071_v53  ;;  %v54_v48 = vld [vmem:[%s18298_s0 + $0x48] sm:$0xff] }
 0x160   :  { %15023 = vmatpush3.bf16.msra.mxu1 %v15020_v62  ;;  %13463 = vmatprep.mubr.f32.mxu1 %v16893_v7  ;;  %v12172_v8 = vmul.f32 -1.442695, %v900_v42  ;;  %v12174_v19 = vmul.f32 -1.442695, %v902_v10 }
 0x161   :  { %v15024_v18 = vpack.c.bf16 %v1079_v55, %v1072_v6 }
 0x163   :  { %13464 = vmatmul.mubr.f32.gmra.mrb[2].mxu1 %v16896_v43  ;;  %15025 = vmatprep.subr.bf16.mxu1 %v15024_v18 }
 0x164   :  { %15027 = vmatpush3.bf16.msra.mxu1 %v15024_v18  ;;  %13474 = vmatprep.mubr.f32.mxu1 %v16807_v30  ;;  %v56_v18 = vld [vmem:[%s18298_s0 + $0x58] sm:$0xff] }
 0x165   :  { %15029 = vmatprep.subr.bf16.mxu1 %v15028_v52 }
 0x167   :  { %13475 = vmatmul.mubr.f32.vlgmr.msra.gmra.mrb[0].mxu1 %v16852_v13 }
 0x168   :  { %15031 = vmatpush3.bf16.msra.mxu1 %v15028_v52  ;;  %13477 = vmatprep.mubr.f32.mxu1 %v16854_v9 }
 0x169   :  { %15033 = vmatprep.subr.bf16.mxu1 %v15032_v34 }
 0x16b   :  { %13478 = vmatmul.mubr.f32.gmra.mrb[2].mxu1 %v16860_v29 }
 0x16c   :  { %15035 = vmatpush3.bf16.msra.mxu1 %v15032_v34  ;;  %13488 = vmatprep.mubr.f32.mxu1 %v16810_v31  ;;  %v901_v34 = vadd.f32 %v16833_v46, %v50_v28  ;;  %v55_v28 = vld [vmem:[%s18298_s0 + $0x50] sm:$0xff] }
 0x16d   :  { %15037 = vmatprep.subr.bf16.mxu1 %v16878_v23 }
 0x16f   :  { %13489 = vmatmul.mubr.f32.vlgmr.msra.gmra.mrb[0].mxu1 %v16858_v22 }
 0x170   :  { %15039 = vmatpush3.bf16.msra.mxu1 %v16878_v23  ;;  %13491 = vmatprep.mubr.f32.mxu1 %v16864_v15 }
 0x171   :  { %15041 = vmatprep.subr.bf16.mxu1 %v15016_v59 }
 0x173   :  { %13492 = vmatmul.mubr.f32.gmra.mrb[2].mxu1 %v16871_v60 }
 0x174   :  { %15043 = vmatpush3.bf16.msra.mxu1 %v15016_v59  ;;  %13502 = vmatprep.mubr.f32.mxu1 %v16813_v38 }
 0x175   :  { %15045 = vmatprep.subr.bf16.mxu1 %v15044_v11 }
 0x177   :  { %13503 = vmatmul.mubr.f32.vlgmr.msra.gmra.mrb[0].mxu1 %v16868_v56 }
 0x178   :  { %15047 = vmatpush3.bf16.msra.mxu1 %v15044_v11  ;;  %13505 = vmatprep.mubr.f32.mxu1 %v16875_v12  ;;  %v12173_v11 = vmul.f32 -1.442695, %v901_v34 }
 0x179   :  { %15049 = vmatprep.subr.bf16.mxu1 %v15048_v40 }
 0x17a   :  { %16228 = vpow2.f32 %v12173_v11 }
 0x17b   :  { %13506 = vmatmul.mubr.f32.gmra.mrb[2].mxu1 %v16884_v57  ;;  %16230 = vpow2.f32 %v12172_v8 }
 0x17c   :  { %15051 = vmatpush3.bf16.msra.mxu1 %v15048_v40  ;;  %13516 = vmatprep.mubr.f32.mxu1 %v16807_v30 }
 0x17d   :  { %15053 = vmatprep.subr.bf16.mxu1 %v16878_v23 }
 0x17f   :  { %13517 = vmatmul.mubr.f32.vlgmr.msra.gmra.mrb[0].mxu1 %v16852_v13 }
 0x180   :  { %15055 = vmatpush3.bf16.msra.mxu1 %v16878_v23  ;;  %13519 = vmatprep.mubr.f32.mxu1 %v16854_v9  ;;  %v12175_v23 = vmul.f32 -1.442695, %v903_v45 }
 0x181   :  { %15057 = vmatprep.subr.bf16.mxu1 %v15016_v59 }
 0x182   :  { %16232 = vpow2.f32 %v12175_v23 }
 0x183   :  { %13520 = vmatmul.mubr.f32.gmra.mrb[2].mxu1 %v16860_v29  ;;  %16234 = vpow2.f32 %v12174_v19  ;;  %v58_v19 = vld [vmem:[%s18298_s0 + $0x68] sm:$0xff] }
 0x184   :  { %15059 = vmatpush3.bf16.msra.mxu1 %v15016_v59  ;;  %13530 = vmatprep.mubr.f32.mxu1 %v16807_v30  ;;  %v16229_v52 = vpop.eup %16228 }
 0x185   :  { %v16231_v46 = vpop.eup %16230  ;;  %v917_v59 = vadd.f32 1.0, %v16229_v52 }
 0x186   :  { %v916_v61 = vadd.f32 1.0, %v16231_v46 }
 0x187   :  { %13531 = vmatmul.mubr.f32.vlgmr.msra.gmra.mrb[0].mxu1 %v16852_v13  ;;  %16236 = vrcp.f32 %v917_v59 }
 0x188   :  { %13533 = vmatprep.mubr.f32.mxu1 %v16854_v9  ;;  %16238 = vrcp.f32 %v916_v61 }
 0x18b   :  { %13534 = vmatmul.mubr.f32.gmra.mrb[2].mxu1 %v16860_v29 }
 0x18c   :  { %13544 = vmatprep.mubr.f32.mxu1 %v16688_v50  ;;  %v16233_v39 = vpop.eup %16232 }
 0x18d   :  { %v16235_v20 = vpop.eup %16234  ;;  %v919_v62 = vadd.f32 1.0, %v16233_v39 }
 0x18e   :  { %v918_v47 = vadd.f32 1.0, %v16235_v20  ;;  %v57_v20 = vld [vmem:[%s18298_s0 + $0x60] sm:$0xff] }
 0x18f   :  { %16240 = vrcp.f32 %v919_v62 }
 0x190   :  { %16242 = vrcp.f32 %v918_v47 }
 0x191   :  { %v16237_v42 = vpop.eup %16236 }
 0x192   :  { %v16239_v45 = vpop.eup %16238  ;;  %v1571_v8 = vsub.f32 1.0, %v16237_v42  ;;  %v1567_v61 = vmul.f32 %v16237_v42, %v16565_v1 }
 0x193   :  { %v1570_v52 = vsub.f32 1.0, %v16239_v45 }
 0x199   :  { %v16241_v10 = vpop.eup %16240 }
 0x19a   :  { %v16243_v11 = vpop.eup %16242  ;;  %v1573_v47 = vsub.f32 1.0, %v16241_v10 }
 0x19b   :  { %v1568_v42 = vmul.f32 %v16243_v11, %v16570_v2 }
 0x25a   :  { %v13532_v53 = vpop.f32.mrb[0].mxu1 }
 0x25b   :  { %v1559_v40 = vadd.f32 %v13532_v53, %v54_v48  ;;  %v1536_v55 = vpop.f32.mrb[1].mxu1 }
 0x25c   :  { %v1558_v6 = vadd.f32 %v1536_v55, %v53_v49  ;;  %v1566_v49 = vmul.f32 %v16239_v45, %v16560_v0  ;;  %v1572_v55 = vsub.f32 1.0, %v16243_v11 }
 0x25d   :  { %16244 = vtanh.f32 %v1559_v40  ;;  %v60_v40 = vld [vmem:[%s18298_s0 + $0x78] sm:$0xff] }
 0x25e   :  { %16246 = vtanh.f32 %v1558_v6  ;;  %v13535_v32 = vpop.f32.mrb[2].mxu1 }
 0x25f   :  { %v1561_v33 = vadd.f32 %v13535_v32, %v56_v18  ;;  %v1548_v34 = vpop.f32.mrb[3].mxu1  ;;  %v59_v32 = vld [vmem:[%s18298_s0 + $0x70] sm:$0xff] }
 0x260   :  { %v1560_v35 = vadd.f32 %v1548_v34, %v55_v28  ;;  %v1569_v34 = vmul.f32 %v16241_v10, %v16577_v5 }
 0x261   :  { %16248 = vtanh.f32 %v1561_v33 }
 0x262   :  { %16250 = vtanh.f32 %v1560_v35 }
 0x267   :  { %v16245_v23 = vpop.eup %16244 }
 0x268   :  { %v16247_v46 = vpop.eup %16246  ;;  %v1575_v39 = vmul.f32 %v16245_v23, %v1571_v8 }
 0x269   :  { %v1574_v59 = vmul.f32 %v16247_v46, %v1570_v52 }
 0x26a   :  { %v1579_v62 = vmul.f32 %v1575_v39, %v58_v19 }
 0x26b   :  { %v16249_v48 = vpop.eup %16248  ;;  %v1578_v53 = vmul.f32 %v1574_v59, %v57_v20 }
 0x26c   :  { %v16251_v6 = vpop.eup %16250  ;;  %v16964_v18 = vadd.f32 %v1579_v62, %v1567_v61  ;;  %v1577_v28 = vmul.f32 %v16249_v48, %v1573_v47 }
 0x26d   :  { %v16969_v1 = vadd.f32 %v1578_v53, %v1566_v49  ;;  %v1576_v33 = vmul.f32 %v16251_v6, %v1572_v55 }
 0x26e   :  { %1587 = vst [vmem:[%s18299_s4 + $0x8] sm:$0xff] %v16964_v18  ;;  %v1581_v0 = vmul.f32 %v1577_v28, %v60_v40  ;;  %v1611_v35 = vand.u32 4294901760, %v16964_v18 }
 0x26f   :  { %1586 = vst [vmem:[%s18299_s4] sm:$0xff] %v16969_v1  ;;  %v1580_v45 = vmul.f32 %v1576_v33, %v59_v32  ;;  %v1608_v8 = vand.u32 4294901760, %v16969_v1 }
 0x270   :  { %v16983_v23 = vadd.f32 %v1581_v0, %v1569_v34  ;;  %v1765_v5 = vsub.f32 %v16964_v18, %v1611_v35 }
 0x271   :  { %v16986_v10 = vadd.f32 %v1580_v45, %v1568_v42  ;;  %v16988_v19 = vpack.c.bf16 %v1611_v35, %v1608_v8  ;;  %v1758_v52 = vsub.f32 %v16969_v1, %v1608_v8  ;;  %v18359_v42 = vld [vmem:[#allocation5_spill] sm:$0xff]  ;;  %v18360_v45 = vld [vmem:[#allocation8_spill] sm:$0xff] }
 0x272   :  { %1589 = vst [vmem:[%s18299_s4 + $0x18] sm:$0xff] %v16983_v23  ;;  %v1617_v2 = vand.u32 4294901760, %v16983_v23  ;;  %v1766_v11 = vand.u32 4294901760, %v1765_v5 }
 0x273   :  { %1588 = vst [vmem:[%s18299_s4 + $0x10] sm:$0xff] %v16986_v10  ;;  %15061 = vmatprep.subr.bf16.mxu1 %v16988_v19  ;;  %v1614_v46 = vand.u32 4294901760, %v16986_v10  ;;  %v1759_v39 = vand.u32 4294901760, %v1758_v52  ;;  %v15076_v0 = vpack.c.bf16 %v1765_v5, %v1758_v52 }
 0x274   :  { %15063 = vmatpush3.bf16.msra.mxu1 %v16988_v19  ;;  %v1767_v20 = vsub.f32 %v1765_v5, %v1766_v11  ;;  %v1779_v59 = vsub.f32 %v16983_v23, %v1617_v2  ;;  %v18361_v5 = vld [vmem:[#allocation9_spill] sm:$0xff] }
 0x275   :  { %v17004_v61 = vpack.c.bf16 %v1617_v2, %v1614_v46  ;;  %v1760_v62 = vsub.f32 %v1758_v52, %v1759_v39  ;;  %v1772_v47 = vsub.f32 %v16986_v10, %v1614_v46  ;;  %v15092_v8 = vpack.c.bf16 %v1766_v11, %v1759_v39  ;;  %v18362_v52 = vld [vmem:[#allocation13_spill] sm:$0xff]  ;;  %v18363_v2 = vld [vmem:[#allocation16_spill] sm:$0xff]  ;;  %v18368_v11 = vld [vmem:[#allocation11_spill] sm:$0xff] }
 0x276   :  { %v1768_v48 = vand.u32 4294901760, %v1767_v20  ;;  %v1780_v49 = vand.u32 4294901760, %v1779_v59  ;;  %v18364_v46 = vld [vmem:[#allocation17_spill] sm:$0xff]  ;;  %v18365_v20 = vld [vmem:[#allocation6_spill] sm:$0xff]  ;;  %v18369_v39 = vld [vmem:[#allocation12_spill] sm:$0xff] }
 0x277   :  { %15065 = vmatprep.subr.bf16.mxu1 %v17004_v61  ;;  %v1761_v53 = vand.u32 4294901760, %v1760_v62  ;;  %v1773_v40 = vand.u32 4294901760, %v1772_v47  ;;  %v15080_v35 = vpack.c.bf16 %v1779_v59, %v1772_v47 }
 0x278   :  { %15067 = vmatpush3.bf16.msra.mxu1 %v17004_v61  ;;  %v1781_v55 = vsub.f32 %v1779_v59, %v1780_v49  ;;  %v18366_v59 = vld [vmem:[#allocation7_spill] sm:$0xff] }
 0x279   :  { %v15068_v6 = vpack.c.bf16 %v1768_v48, %v1761_v53  ;;  %v1774_v28 = vsub.f32 %v1772_v47, %v1773_v40  ;;  %v15096_v62 = vpack.c.bf16 %v1780_v49, %v1773_v40  ;;  %v18367_v47 = vld [vmem:[#allocation10_spill] sm:$0xff]  ;;  %v12176_v49 = vld [vmem:[%s18298_s0 + $0x80] sm:$0xff] }
 0x27a   :  { %v1782_v32 = vand.u32 4294901760, %v1781_v55  ;;  %v18370_v48 = vld [vmem:[#allocation14_spill] sm:$0xff]  ;;  %v18372_v55 = vld [vmem:[#allocation19_spill] sm:$0xff] }
 0x27b   :  { %13545 = vmatmul.mubr.f32.vlgmr.msra.gmra.mrb[4].mxu1 %v16690_v51  ;;  %15069 = vmatprep.subr.bf16.mxu1 %v15068_v6  ;;  %v1775_v33 = vand.u32 4294901760, %v1774_v28  ;;  %v18371_v53 = vld [vmem:[#allocation18_spill] sm:$0xff] }
 0x27c   :  { %15071 = vmatpush3.bf16.msra.mxu1 %v15068_v6  ;;  %13547 = vmatprep.mubr.f32.mxu1 %v16696_v54 }
 0x27d   :  { %v15072_v34 = vpack.c.bf16 %v1782_v32, %v1775_v33  ;;  %v12179_v33 = vld [vmem:[%s18298_s0 + $0x98] sm:$0xff] }
 0x27f   :  { %13548 = vmatmul.mubr.f32.gmra.mrb[6].mxu1 %v16702_v58  ;;  %15073 = vmatprep.subr.bf16.mxu1 %v15072_v34 }
 0x280   :  { %15075 = vmatpush3.bf16.msra.mxu1 %v15072_v34  ;;  %13550 = vmatprep.mubr.f32.mxu1 %v16714_v4 }
 0x281   :  { %15077 = vmatprep.subr.bf16.mxu1 %v15076_v0 }
 0x283   :  { %13551 = vmatmul.mubr.f32.gmra.mrb[8].mxu1 %v16729_v14 }
 0x284   :  { %13553 = vmatprep.mubr.f32.mxu1 %v16743_v41 }
 0x287   :  { %13554 = vmatmul.mubr.f32.gmra.mrb[10].mxu1 %v16745_v44 }
 0x288   :  { %13564 = vmatprep.mubr.f32.mxu1 %v16600_v16 }
 0x28b   :  { %13565 = vmatmul.mubr.f32.vlgmr.msra.gmra.mrb[4].mxu1 %v16602_v17 }
 0x28c   :  { %15079 = vmatpush3.bf16.msra.mxu1 %v15076_v0  ;;  %13567 = vmatprep.mubr.f32.mxu1 %v16614_v21  ;;  %v12178_v0 = vld [vmem:[%s18298_s0 + $0x90] sm:$0xff] }
 0x28d   :  { %15081 = vmatprep.subr.bf16.mxu1 %v15080_v35 }
 0x28f   :  { %13568 = vmatmul.mubr.f32.gmra.mrb[6].mxu1 %v16625_v26 }
 0x290   :  { %15083 = vmatpush3.bf16.msra.mxu1 %v15080_v35  ;;  %13570 = vmatprep.mubr.f32.mxu1 %v16627_v27 }
 0x291   :  { %15085 = vmatprep.subr.bf16.mxu1 %v16988_v19 }
 0x293   :  { %13571 = vmatmul.mubr.f32.gmra.mrb[8].mxu1 %v16656_v37 }
 0x294   :  { %13573 = vmatprep.mubr.f32.mxu1 %v16709_v63 }
 0x297   :  { %13574 = vmatmul.mubr.f32.gmra.mrb[10].mxu1 %v16711_v3 }
 0x298   :  { %13584 = vmatprep.mubr.f32.mxu1 %v16620_v24 }
 0x29b   :  { %13585 = vmatmul.mubr.f32.vlgmr.msra.gmra.mrb[4].mxu1 %v16623_v25 }
 0x29c   :  { %15087 = vmatpush3.bf16.msra.mxu1 %v16988_v19  ;;  %13587 = vmatprep.mubr.f32.mxu1 %v18359_v42 }
 0x29d   :  { %15089 = vmatprep.subr.bf16.mxu1 %v17004_v61 }
 0x29f   :  { %13588 = vmatmul.mubr.f32.gmra.mrb[6].mxu1 %v18360_v45 }
 0x2a0   :  { %15091 = vmatpush3.bf16.msra.mxu1 %v17004_v61  ;;  %13590 = vmatprep.mubr.f32.mxu1 %v18361_v5 }
 0x2a1   :  { %15093 = vmatprep.subr.bf16.mxu1 %v15092_v8 }
 0x2a3   :  { %13591 = vmatmul.mubr.f32.gmra.mrb[8].mxu1 %v18362_v52 }
 0x2a4   :  { %13593 = vmatprep.mubr.f32.mxu1 %v18363_v2 }
 0x2a7   :  { %13594 = vmatmul.mubr.f32.gmra.mrb[10].mxu1 %v18364_v46 }
 0x2a8   :  { %13604 = vmatprep.mubr.f32.mxu1 %v18365_v20 }
 0x2ab   :  { %13605 = vmatmul.mubr.f32.vlgmr.msra.gmra.mrb[4].mxu1 %v18366_v59 }
 0x2ac   :  { %15095 = vmatpush3.bf16.msra.mxu1 %v15092_v8  ;;  %13607 = vmatprep.mubr.f32.mxu1 %v18367_v47 }
 0x2ad   :  { %15097 = vmatprep.subr.bf16.mxu1 %v15096_v62 }
 0x2af   :  { %13608 = vmatmul.mubr.f32.gmra.mrb[6].mxu1 %v18368_v11 }
 0x2b0   :  { %15099 = vmatpush3.bf16.msra.mxu1 %v15096_v62  ;;  %13610 = vmatprep.mubr.f32.mxu1 %v18369_v39 }
 0x2b1   :  { %15101 = vmatprep.subr.bf16.mxu1 %v16988_v19 }
 0x2b3   :  { %13611 = vmatmul.mubr.f32.gmra.mrb[8].mxu1 %v18370_v48 }
 0x2b4   :  { %13613 = vmatprep.mubr.f32.mxu1 %v18371_v53 }
 0x2b7   :  { %13614 = vmatmul.mubr.f32.gmra.mrb[10].mxu1 %v18372_v55 }
 0x2b8   :  { %13624 = vmatprep.mubr.f32.mxu1 %v16600_v16 }
 0x2bb   :  { %13625 = vmatmul.mubr.f32.vlgmr.msra.gmra.mrb[4].mxu1 %v16602_v17 }
 0x2bc   :  { %15103 = vmatpush3.bf16.msra.mxu1 %v16988_v19  ;;  %13627 = vmatprep.mubr.f32.mxu1 %v16614_v21  ;;  %v18373_v19 = vld [vmem:[#allocation20_spill] sm:$0xff] }
 0x2bd   :  { %15105 = vmatprep.subr.bf16.mxu1 %v17004_v61 }
 0x2bf   :  { %13628 = vmatmul.mubr.f32.gmra.mrb[6].mxu1 %v16625_v26 }
 0x2c0   :  { %15107 = vmatpush3.bf16.msra.mxu1 %v17004_v61  ;;  %13630 = vmatprep.mubr.f32.mxu1 %v16627_v27  ;;  %v12177_v61 = vld [vmem:[%s18298_s0 + $0x88] sm:$0xff] }
 0x2c3   :  { %13631 = vmatmul.mubr.f32.gmra.mrb[8].mxu1 %v16656_v37 }
 0x2c4   :  { %13633 = vmatprep.mubr.f32.mxu1 %v16709_v63 }
 0x2c7   :  { %13634 = vmatmul.mubr.f32.gmra.mrb[10].mxu1 %v16711_v3 }
 0x2c8   :  { %13644 = vmatprep.mubr.f32.mxu1 %v16600_v16 }
 0x2cb   :  { %13645 = vmatmul.mubr.f32.vlgmr.msra.gmra.mrb[4].mxu1 %v16602_v17 }
 0x2cc   :  { %13647 = vmatprep.mubr.f32.mxu1 %v16614_v21 }
 0x2cf   :  { %13648 = vmatmul.mubr.f32.gmra.mrb[6].mxu1 %v16625_v26 }
 0x2d0   :  { %13650 = vmatprep.mubr.f32.mxu1 %v16627_v27 }
 0x2d3   :  { %13651 = vmatmul.mubr.f32.gmra.mrb[8].mxu1 %v16656_v37 }
 0x2d4   :  { %13653 = vmatprep.mubr.f32.mxu1 %v16709_v63 }
 0x2d7   :  { %13654 = vmatmul.mubr.f32.gmra.mrb[10].mxu1 %v16711_v3 }
 0x2d8   :  { %13868 = vmatprep.mubr.f32.mxu1 %v18373_v19 }
 0x39e   :  { %v13646_v40 = vpop.f32.mrb[4].mxu1 }
 0x39f   :  { %v2394_v6 = vadd.f32 %v13646_v40, %v12177_v61  ;;  %v2347_v28 = vpop.f32.mrb[5].mxu1 }
 0x3a0   :  { %v2393_v32 = vadd.f32 %v12176_v49, %v2347_v28 }
 0x3a1   :  { %v12193_v34 = vmul.f32 -1.442695, %v2394_v6 }
 0x3a2   :  { %v12192_v35 = vmul.f32 -1.442695, %v2393_v32  ;;  %v13649_v8 = vpop.f32.mrb[6].mxu1 }
 0x3a3   :  { %16252 = vpow2.f32 %v12193_v34  ;;  %v2396_v62 = vadd.f32 %v13649_v8, %v12179_v33  ;;  %v2359_v19 = vpop.f32.mrb[7].mxu1 }
 0x3a4   :  { %16254 = vpow2.f32 %v12192_v35  ;;  %v2395_v55 = vadd.f32 %v12178_v0, %v2359_v19 }
 0x3a5   :  { %v12195_v53 = vmul.f32 -1.442695, %v2396_v62 }
 0x3a6   :  { %v12194_v61 = vmul.f32 -1.442695, %v2395_v55  ;;  %v17077_v40 = vpop.f32.mrb[8].mxu1 }
 0x3a7   :  { %16256 = vpow2.f32 %v12195_v53  ;;  %v17079_v49 = vpop.f32.mrb[9].mxu1 }
 0x3a8   :  { %16258 = vpow2.f32 %v12194_v61 }
 0x3aa   :  { %v17081_v6 = vpop.f32.mrb[10].mxu1 }
 0x3ab   :  { %v17083_v28 = vpop.f32.mrb[11].mxu1 }
 0x3ad   :  { %v16253_v48 = vpop.eup %16252 }
 0x3ae   :  { %v16255_v32 = vpop.eup %16254  ;;  %v2410_v39 = vadd.f32 1.0, %v16253_v48 }
 0x3af   :  { %v2409_v34 = vadd.f32 1.0, %v16255_v32 }
 0x3b0   :  { %16260 = vrcp.f32 %v2410_v39 }
 0x3b1   :  { %v16257_v33 = vpop.eup %16256  ;;  %16262 = vrcp.f32 %v2409_v34 }
 0x3b2   :  { %v16259_v19 = vpop.eup %16258  ;;  %v2412_v0 = vadd.f32 1.0, %v16257_v33 }
 0x3b3   :  { %v2411_v55 = vadd.f32 1.0, %v16259_v19 }
 0x3b4   :  { %16264 = vrcp.f32 %v2412_v0 }
 0x3b5   :  { %16266 = vrcp.f32 %v2411_v55 }
 0x3ba   :  { %v16261_v53 = vpop.eup %16260 }
 0x3bb   :  { %v16263_v35 = vpop.eup %16262  ;;  %v2450_v8 = vmul.f32 %v16261_v53, %v16964_v18 }
 0x3bc   :  { %v2449_v62 = vmul.f32 %v16263_v35, %v16969_v1 }
 0x3bd   :  { %v2457_v61 = vand.u32 4294901760, %v2450_v8 }
 0x3be   :  { %v16265_v11 = vpop.eup %16264  ;;  %v2454_v47 = vand.u32 4294901760, %v2449_v62 }
 0x3bf   :  { %v16267_v59 = vpop.eup %16266  ;;  %v2452_v48 = vmul.f32 %v16265_v11, %v16983_v23  ;;  %v2571_v39 = vsub.f32 %v2450_v8, %v2457_v61 }
 0x3c0   :  { %v2451_v32 = vmul.f32 %v16267_v59, %v16986_v10  ;;  %v15108_v34 = vpack.c.bf16 %v2457_v61, %v2454_v47  ;;  %v2564_v33 = vsub.f32 %v2449_v62, %v2454_v47 }
 0x3c1   :  { %v2463_v19 = vand.u32 4294901760, %v2452_v48  ;;  %v2572_v0 = vand.u32 4294901760, %v2571_v39 }
 0x3c2   :  { %v2460_v55 = vand.u32 4294901760, %v2451_v32  ;;  %15109 = vmatprep.subr.bf16.mxu0 %v15108_v34  ;;  %v2565_v20 = vand.u32 4294901760, %v2564_v33  ;;  %v15124_v46 = vpack.c.bf16 %v2571_v39, %v2564_v33 }
 0x3c3   :  { %15111 = vmatpush3.bf16.msra.mxu0 %v15108_v34  ;;  %v2573_v53 = vsub.f32 %v2571_v39, %v2572_v0  ;;  %v2585_v35 = vsub.f32 %v2452_v48, %v2463_v19 }
 0x3c4   :  { %v15112_v2 = vpack.c.bf16 %v2463_v19, %v2460_v55  ;;  %v2566_v52 = vsub.f32 %v2564_v33, %v2565_v20  ;;  %v2578_v5 = vsub.f32 %v2451_v32, %v2460_v55  ;;  %v15140_v11 = vpack.c.bf16 %v2572_v0, %v2565_v20 }
 0x3c5   :  { %v2574_v45 = vand.u32 4294901760, %v2573_v53  ;;  %v2586_v42 = vand.u32 4294901760, %v2585_v35 }
 0x3c6   :  { %15113 = vmatprep.subr.bf16.mxu0 %v15112_v2  ;;  %v2567_v8 = vand.u32 4294901760, %v2566_v52  ;;  %v2579_v59 = vand.u32 4294901760, %v2578_v5  ;;  %v15128_v61 = vpack.c.bf16 %v2585_v35, %v2578_v5 }
 0x3c7   :  { %15115 = vmatpush3.bf16.msra.mxu0 %v15112_v2  ;;  %v2587_v47 = vsub.f32 %v2585_v35, %v2586_v42 }
 0x3c8   :  { %v15116_v62 = vpack.c.bf16 %v2574_v45, %v2567_v8  ;;  %v2580_v25 = vsub.f32 %v2578_v5, %v2579_v59  ;;  %v15144_v24 = vpack.c.bf16 %v2586_v42, %v2579_v59  ;;  %v12182_v45 = vld [vmem:[%s18298_s0 + $0xb0] sm:$0xff] }
 0x3c9   :  { %v2588_v3 = vand.u32 4294901760, %v2587_v47  ;;  %v12187_v47 = vld [vmem:[%s18298_s0 + $0xd8] sm:$0xff] }
 0x3ca   :  { %13665 = vmatmul.mubr.f32.vlgmr.msra.gmra.mrb[8].mxu0 %v16889_v36  ;;  %15117 = vmatprep.subr.bf16.mxu0 %v15116_v62  ;;  %v2581_v48 = vand.u32 4294901760, %v2580_v25  ;;  %v12180_v25 = vld [vmem:[%s18298_s0 + $0xa0] sm:$0xff] }
 0x3cb   :  { %15119 = vmatpush3.bf16.msra.mxu0 %v15116_v62  ;;  %13667 = vmatprep.mubr.f32.mxu0 %v16893_v7  ;;  %v2421_v5 = vadd.f32 %v12180_v25, %v17079_v49  ;;  %v12186_v62 = vld [vmem:[%s18298_s0 + $0xd0] sm:$0xff] }
 0x3cc   :  { %v15120_v39 = vpack.c.bf16 %v2588_v3, %v2581_v48  ;;  %v12183_v3 = vld [vmem:[%s18298_s0 + $0xb8] sm:$0xff] }
 0x3cd   :  { %v2424_v52 = vadd.f32 %v17081_v6, %v12183_v3  ;;  %v12196_v20 = vmul.f32 -1.442695, %v2421_v5  ;;  %v12185_v6 = vld [vmem:[%s18298_s0 + $0xc8] sm:$0xff] }
 0x3ce   :  { %13668 = vmatmul.mubr.f32.gmra.mrb[10].mxu0 %v16896_v43  ;;  %15121 = vmatprep.subr.bf16.mxu0 %v15120_v39 }
 0x3cf   :  { %15123 = vmatpush3.bf16.msra.mxu0 %v15120_v39  ;;  %13678 = vmatprep.mubr.f32.mxu0 %v16807_v30  ;;  %v12199_v32 = vmul.f32 -1.442695, %v2424_v52 }
 0x3d0   :  { %15125 = vmatprep.subr.bf16.mxu0 %v15124_v46 }
 0x3d2   :  { %13679 = vmatmul.mubr.f32.vlgmr.msra.gmra.mrb[8].mxu0 %v16852_v13 }
 0x3d3   :  { %15127 = vmatpush3.bf16.msra.mxu0 %v15124_v46  ;;  %13681 = vmatprep.mubr.f32.mxu0 %v16854_v9 }
 0x3d4   :  { %15129 = vmatprep.subr.bf16.mxu0 %v15128_v61 }
 0x3d6   :  { %13682 = vmatmul.mubr.f32.gmra.mrb[10].mxu0 %v16860_v29 }
 0x3d7   :  { %15131 = vmatpush3.bf16.msra.mxu0 %v15128_v61  ;;  %13692 = vmatprep.mubr.f32.mxu0 %v16810_v31 }
 0x3d8   :  { %15133 = vmatprep.subr.bf16.mxu0 %v15108_v34 }
 0x3da   :  { %13693 = vmatmul.mubr.f32.vlgmr.msra.gmra.mrb[8].mxu0 %v16858_v22 }
 0x3db   :  { %15135 = vmatpush3.bf16.msra.mxu0 %v15108_v34  ;;  %13695 = vmatprep.mubr.f32.mxu0 %v16864_v15 }
 0x3dc   :  { %15137 = vmatprep.subr.bf16.mxu0 %v15112_v2 }
 0x3de   :  { %13696 = vmatmul.mubr.f32.gmra.mrb[10].mxu0 %v16871_v60 }
 0x3df   :  { %15139 = vmatpush3.bf16.msra.mxu0 %v15112_v2  ;;  %13706 = vmatprep.mubr.f32.mxu0 %v16813_v38 }
 0x3e0   :  { %15141 = vmatprep.subr.bf16.mxu0 %v15140_v11 }
 0x3e2   :  { %13707 = vmatmul.mubr.f32.vlgmr.msra.gmra.mrb[8].mxu0 %v16868_v56 }
 0x3e3   :  { %15143 = vmatpush3.bf16.msra.mxu0 %v15140_v11  ;;  %13709 = vmatprep.mubr.f32.mxu0 %v16875_v12 }
 0x3e4   :  { %15145 = vmatprep.subr.bf16.mxu0 %v15144_v24 }
 0x3e6   :  { %13710 = vmatmul.mubr.f32.gmra.mrb[10].mxu0 %v16884_v57 }
 0x3e7   :  { %15147 = vmatpush3.bf16.msra.mxu0 %v15144_v24  ;;  %13720 = vmatprep.mubr.f32.mxu0 %v16807_v30  ;;  %v12181_v24 = vld [vmem:[%s18298_s0 + $0xa8] sm:$0xff] }
 0x3e8   :  { %15149 = vmatprep.subr.bf16.mxu0 %v15108_v34  ;;  %v2422_v42 = vadd.f32 %v17077_v40, %v12181_v24 }
 0x3ea   :  { %13721 = vmatmul.mubr.f32.vlgmr.msra.gmra.mrb[8].mxu0 %v16852_v13  ;;  %v12197_v46 = vmul.f32 -1.442695, %v2422_v42 }
 0x3eb   :  { %15151 = vmatpush3.bf16.msra.mxu0 %v15108_v34  ;;  %13723 = vmatprep.mubr.f32.mxu0 %v16854_v9 }
 0x3ec   :  { %15153 = vmatprep.subr.bf16.mxu0 %v15112_v2  ;;  %16268 = vpow2.f32 %v12197_v46  ;;  %v12189_v46 = vld [vmem:[%s18298_s0 + $0xe8] sm:$0xff] }
 0x3ed   :  { %16270 = vpow2.f32 %v12196_v20 }
 0x3ee   :  { %13724 = vmatmul.mubr.f32.gmra.mrb[10].mxu0 %v16860_v29  ;;  %16272 = vpow2.f32 %v12199_v32 }
 0x3ef   :  { %15155 = vmatpush3.bf16.msra.mxu0 %v15112_v2  ;;  %13734 = vmatprep.mubr.f32.mxu0 %v16807_v30  ;;  %v2423_v2 = vadd.f32 %v12182_v45, %v17083_v28  ;;  %v12184_v28 = vld [vmem:[%s18298_s0 + $0xc0] sm:$0xff] }
 0x3f1   :  { %v12198_v34 = vmul.f32 -1.442695, %v2423_v2 }
 0x3f2   :  { %13735 = vmatmul.mubr.f32.vlgmr.msra.gmra.mrb[8].mxu0 %v16852_v13 }
 0x3f3   :  { %13737 = vmatprep.mubr.f32.mxu0 %v16854_v9  ;;  %16274 = vpow2.f32 %v12198_v34 }
 0x3f6   :  { %13738 = vmatmul.mubr.f32.gmra.mrb[10].mxu0 %v16860_v29  ;;  %v16269_v33 = vpop.eup %16268 }
 0x3f7   :  { %13748 = vmatprep.mubr.f32.mxu0 %v16688_v50  ;;  %v16271_v40 = vpop.eup %16270  ;;  %v2438_v55 = vadd.f32 1.0, %v16269_v33  ;;  %v12188_v33 = vld [vmem:[%s18298_s0 + $0xe0] sm:$0xff] }
 0x3f8   :  { %v16273_v19 = vpop.eup %16272  ;;  %v2437_v53 = vadd.f32 1.0, %v16271_v40 }
 0x3f9   :  { %v2440_v35 = vadd.f32 1.0, %v16273_v19  ;;  %16276 = vrcp.f32 %v2438_v55 }
 0x3fa   :  { %16278 = vrcp.f32 %v2437_v53 }
 0x3fb   :  { %16280 = vrcp.f32 %v2440_v35 }
 0x3fd   :  { %v16275_v0 = vpop.eup %16274 }
 0x3fe   :  { %v2439_v49 = vadd.f32 1.0, %v16275_v0 }
 0x400   :  { %16282 = vrcp.f32 %v2439_v49 }
 0x403   :  { %v16277_v3 = vpop.eup %16276 }
 0x404   :  { %v16279_v42 = vpop.eup %16278  ;;  %v3080_v52 = vsub.f32 1.0, %v16277_v3  ;;  %v3076_v19 = vmul.f32 %v16277_v3, %v16964_v18 }
 0x405   :  { %v16281_v45 = vpop.eup %16280  ;;  %v3079_v20 = vsub.f32 1.0, %v16279_v42  ;;  %v3075_v35 = vmul.f32 %v16279_v42, %v16969_v1 }
 0x406   :  { %v3082_v55 = vsub.f32 1.0, %v16281_v45 }
 0x40a   :  { %v16283_v5 = vpop.eup %16282 }
 0x4c5   :  { %v13736_v11 = vpop.f32.mrb[8].mxu0 }
 0x4c6   :  { %v3068_v8 = vadd.f32 %v13736_v11, %v12185_v6  ;;  %v3045_v59 = vpop.f32.mrb[9].mxu0  ;;  %v12191_v6 = vld [vmem:[%s18298_s0 + $0xf8] sm:$0xff] }
 0x4c7   :  { %v3067_v61 = vadd.f32 %v12184_v28, %v3045_v59  ;;  %v3081_v28 = vsub.f32 1.0, %v16283_v5 }
 0x4c8   :  { %16284 = vtanh.f32 %v3068_v8 }
 0x4c9   :  { %16286 = vtanh.f32 %v3067_v61  ;;  %v13739_v48 = vpop.f32.mrb[10].mxu0  ;;  %v12190_v61 = vld [vmem:[%s18298_s0 + $0xf0] sm:$0xff] }
 0x4ca   :  { %v3070_v39 = vadd.f32 %v13739_v48, %v12187_v47  ;;  %v3057_v24 = vpop.f32.mrb[11].mxu0 }
 0x4cb   :  { %v3069_v25 = vadd.f32 %v12186_v62, %v3057_v24  ;;  %v3078_v62 = vmul.f32 %v16281_v45, %v16983_v23 }
 0x4cc   :  { %16288 = vtanh.f32 %v3070_v39  ;;  %v3077_v39 = vmul.f32 %v16283_v5, %v16986_v10 }
 0x4cd   :  { %16290 = vtanh.f32 %v3069_v25 }
 0x4d2   :  { %v16285_v2 = vpop.eup %16284 }
 0x4d3   :  { %v16287_v32 = vpop.eup %16286  ;;  %v3084_v34 = vmul.f32 %v16285_v2, %v3080_v52 }
 0x4d4   :  { %v3083_v40 = vmul.f32 %v16287_v32, %v3079_v20 }
 0x4d5   :  { %v3088_v0 = vmul.f32 %v12189_v46, %v3084_v34 }
 0x4d6   :  { %v16289_v53 = vpop.eup %16288  ;;  %v3087_v49 = vmul.f32 %v12188_v33, %v3083_v40 }
 0x4d7   :  { %v16291_v11 = vpop.eup %16290  ;;  %v17152_v8 = vadd.f32 %v3088_v0, %v3076_v19  ;;  %v3086_v59 = vmul.f32 %v16289_v53, %v3082_v55 }
 0x4d8   :  { %v17157_v18 = vadd.f32 %v3087_v49, %v3075_v35  ;;  %v3085_v47 = vmul.f32 %v16291_v11, %v3081_v28 }
 0x4d9   :  { %12201 = vst [vmem:[%s18299_s4 + $0x28] sm:$0xff] %v17152_v8  ;;  %v3090_v1 = vmul.f32 %v12191_v6, %v3086_v59  ;;  %v3121_v48 = vand.u32 4294901760, %v17152_v8 }
 0x4da   :  { %12200 = vst [vmem:[%s18299_s4 + $0x20] sm:$0xff] %v17157_v18  ;;  %v3089_v24 = vmul.f32 %v12190_v61, %v3085_v47  ;;  %v3118_v25 = vand.u32 4294901760, %v17157_v18 }
 0x4db   :  { %v17171_v3 = vadd.f32 %v3090_v1, %v3078_v62  ;;  %v3275_v23 = vsub.f32 %v17152_v8, %v3121_v48  ;;  %v18374_v62 = vld [vmem:[#allocation15_spill] sm:$0xff] }
 0x4dc   :  { %v17174_v42 = vadd.f32 %v3089_v24, %v3077_v39  ;;  %v17176_v45 = vpack.c.bf16 %v3121_v48, %v3118_v25  ;;  %v3268_v52 = vsub.f32 %v17157_v18, %v3118_v25  ;;  %v18375_v1 = vld [vmem:[#allocation3_spill] sm:$0xff]  ;;  %v18376_v48 = vld [vmem:[#allocation4_spill] sm:$0xff]  ;;  %v18377_v39 = vld [vmem:[#allocation5_spill] sm:$0xff] }
 0x4dd   :  { %12203 = vst [vmem:[%s18299_s4 + $0x38] sm:$0xff] %v17171_v3  ;;  %v3127_v10 = vand.u32 4294901760, %v17171_v3  ;;  %v3276_v5 = vand.u32 4294901760, %v3275_v23  ;;  %v18378_v24 = vld [vmem:[#allocation8_spill] sm:$0xff] }
 0x4de   :  { %12202 = vst [vmem:[%s18299_s4 + $0x30] sm:$0xff] %v17174_v42  ;;  %15157 = vmatprep.subr.bf16.mxu0 %v17176_v45  ;;  %v3124_v2 = vand.u32 4294901760, %v17174_v42  ;;  %v3269_v46 = vand.u32 4294901760, %v3268_v52  ;;  %v15172_v61 = vpack.c.bf16 %v3275_v23, %v3268_v52 }
 0x4df   :  { %15159 = vmatpush3.bf16.msra.mxu0 %v17176_v45  ;;  %v3277_v20 = vsub.f32 %v3275_v23, %v3276_v5  ;;  %v3289_v32 = vsub.f32 %v17171_v3, %v3127_v10  ;;  %v18379_v23 = vld [vmem:[#allocation9_spill] sm:$0xff] }
 0x4e0   :  { %v17192_v34 = vpack.c.bf16 %v3127_v10, %v3124_v2  ;;  %v3270_v33 = vsub.f32 %v3268_v52, %v3269_v46  ;;  %v3282_v40 = vsub.f32 %v17174_v42, %v3124_v2  ;;  %v15188_v25 = vpack.c.bf16 %v3276_v5, %v3269_v46  ;;  %v18380_v52 = vld [vmem:[#allocation13_spill] sm:$0xff]  ;;  %v18381_v10 = vld [vmem:[#allocation16_spill] sm:$0xff]  ;;  %v18386_v5 = vld [vmem:[#allocation11_spill] sm:$0xff] }
 0x4e1   :  { %v3278_v19 = vand.u32 4294901760, %v3277_v20  ;;  %v3290_v0 = vand.u32 4294901760, %v3289_v32  ;;  %v18382_v2 = vld [vmem:[#allocation17_spill] sm:$0xff]  ;;  %v18383_v20 = vld [vmem:[#allocation6_spill] sm:$0xff]  ;;  %v18387_v46 = vld [vmem:[#allocation12_spill] sm:$0xff] }
 0x4e2   :  { %15161 = vmatprep.subr.bf16.mxu0 %v17192_v34  ;;  %v3271_v55 = vand.u32 4294901760, %v3270_v33  ;;  %v3283_v53 = vand.u32 4294901760, %v3282_v40  ;;  %v15176_v47 = vpack.c.bf16 %v3289_v32, %v3282_v40 }
 0x4e3   :  { %15163 = vmatpush3.bf16.msra.mxu0 %v17192_v34  ;;  %v3291_v35 = vsub.f32 %v3289_v32, %v3290_v0  ;;  %v18384_v32 = vld [vmem:[#allocation7_spill] sm:$0xff] }
 0x4e4   :  { %v15164_v49 = vpack.c.bf16 %v3278_v19, %v3271_v55  ;;  %v3284_v6 = vsub.f32 %v3282_v40, %v3283_v53  ;;  %v15192_v33 = vpack.c.bf16 %v3290_v0, %v3283_v53  ;;  %v18385_v40 = vld [vmem:[#allocation10_spill] sm:$0xff]  ;;  %v12204_v0 = vld [vmem:[%s18298_s0 + $0x100] sm:$0xff] }
 0x4e5   :  { %v3292_v28 = vand.u32 4294901760, %v3291_v35  ;;  %v18388_v19 = vld [vmem:[#allocation14_spill] sm:$0xff]  ;;  %v18390_v35 = vld [vmem:[#allocation19_spill] sm:$0xff] }
 0x4e6   :  { %13749 = vmatmul.mubr.f32.vlgmr.msra.gmra.mrb[12].mxu0 %v16690_v51  ;;  %15165 = vmatprep.subr.bf16.mxu0 %v15164_v49  ;;  %v3285_v11 = vand.u32 4294901760, %v3284_v6  ;;  %v18389_v55 = vld [vmem:[#allocation18_spill] sm:$0xff] }
 0x4e7   :  { %15167 = vmatpush3.bf16.msra.mxu0 %v15164_v49  ;;  %13751 = vmatprep.mubr.f32.mxu0 %v16696_v54 }
 0x4e8   :  { %v15168_v59 = vpack.c.bf16 %v3292_v28, %v3285_v11  ;;  %v12207_v11 = vld [vmem:[%s18298_s0 + $0x118] sm:$0xff] }
 0x4ea   :  { %13752 = vmatmul.mubr.f32.gmra.mrb[14].mxu0 %v16702_v58  ;;  %15169 = vmatprep.subr.bf16.mxu0 %v15168_v59 }
 0x4eb   :  { %15171 = vmatpush3.bf16.msra.mxu0 %v15168_v59  ;;  %13754 = vmatprep.mubr.f32.mxu0 %v16714_v4 }
 0x4ec   :  { %15173 = vmatprep.subr.bf16.mxu0 %v15172_v61 }
 0x4ee   :  { %13755 = vmatmul.mubr.f32.gmra.mrb[16].mxu0 %v16729_v14 }
 0x4ef   :  { %13757 = vmatprep.mubr.f32.mxu0 %v16743_v41 }
 0x4f2   :  { %13758 = vmatmul.mubr.f32.gmra.mrb[18].mxu0 %v16745_v44 }
 0x4f3   :  { %13768 = vmatprep.mubr.f32.mxu0 %v16600_v16 }
 0x4f6   :  { %13769 = vmatmul.mubr.f32.vlgmr.msra.gmra.mrb[12].mxu0 %v16602_v17 }
 0x4f7   :  { %15175 = vmatpush3.bf16.msra.mxu0 %v15172_v61  ;;  %13771 = vmatprep.mubr.f32.mxu0 %v16614_v21  ;;  %v12206_v61 = vld [vmem:[%s18298_s0 + $0x110] sm:$0xff] }
 0x4f8   :  { %15177 = vmatprep.subr.bf16.mxu0 %v15176_v47 }
 0x4fa   :  { %13772 = vmatmul.mubr.f32.gmra.mrb[14].mxu0 %v16625_v26 }
 0x4fb   :  { %15179 = vmatpush3.bf16.msra.mxu0 %v15176_v47  ;;  %13774 = vmatprep.mubr.f32.mxu0 %v16627_v27 }
 0x4fc   :  { %15181 = vmatprep.subr.bf16.mxu0 %v17176_v45 }
 0x4fe   :  { %13775 = vmatmul.mubr.f32.gmra.mrb[16].mxu0 %v16656_v37 }
 0x4ff   :  { %13777 = vmatprep.mubr.f32.mxu0 %v16709_v63 }
 0x502   :  { %13778 = vmatmul.mubr.f32.gmra.mrb[18].mxu0 %v18374_v62 }
 0x503   :  { %13788 = vmatprep.mubr.f32.mxu0 %v18375_v1 }
 0x506   :  { %13789 = vmatmul.mubr.f32.vlgmr.msra.gmra.mrb[12].mxu0 %v18376_v48 }
 0x507   :  { %15183 = vmatpush3.bf16.msra.mxu0 %v17176_v45  ;;  %13791 = vmatprep.mubr.f32.mxu0 %v18377_v39 }
 0x508   :  { %15185 = vmatprep.subr.bf16.mxu0 %v17192_v34 }
 0x50a   :  { %13792 = vmatmul.mubr.f32.gmra.mrb[14].mxu0 %v18378_v24 }
 0x50b   :  { %15187 = vmatpush3.bf16.msra.mxu0 %v17192_v34  ;;  %13794 = vmatprep.mubr.f32.mxu0 %v18379_v23 }
 0x50c   :  { %15189 = vmatprep.subr.bf16.mxu0 %v15188_v25 }
 0x50e   :  { %13795 = vmatmul.mubr.f32.gmra.mrb[16].mxu0 %v18380_v52 }
 0x50f   :  { %13797 = vmatprep.mubr.f32.mxu0 %v18381_v10 }
 0x512   :  { %13798 = vmatmul.mubr.f32.gmra.mrb[18].mxu0 %v18382_v2 }
 0x513   :  { %13808 = vmatprep.mubr.f32.mxu0 %v18383_v20 }
 0x516   :  { %13809 = vmatmul.mubr.f32.vlgmr.msra.gmra.mrb[12].mxu0 %v18384_v32 }
 0x517   :  { %15191 = vmatpush3.bf16.msra.mxu0 %v15188_v25  ;;  %13811 = vmatprep.mubr.f32.mxu0 %v18385_v40 }
 0x518   :  { %15193 = vmatprep.subr.bf16.mxu0 %v15192_v33 }
 0x51a   :  { %13812 = vmatmul.mubr.f32.gmra.mrb[14].mxu0 %v18386_v5 }
 0x51b   :  { %15195 = vmatpush3.bf16.msra.mxu0 %v15192_v33  ;;  %13814 = vmatprep.mubr.f32.mxu0 %v18387_v46 }
 0x51c   :  { %15197 = vmatprep.subr.bf16.mxu0 %v17176_v45 }
 0x51e   :  { %13815 = vmatmul.mubr.f32.gmra.mrb[16].mxu0 %v18388_v19 }
 0x51f   :  { %13817 = vmatprep.mubr.f32.mxu0 %v18389_v55 }
 0x522   :  { %13818 = vmatmul.mubr.f32.gmra.mrb[18].mxu0 %v18390_v35 }
 0x523   :  { %13828 = vmatprep.mubr.f32.mxu0 %v16600_v16 }
 0x526   :  { %13829 = vmatmul.mubr.f32.vlgmr.msra.gmra.mrb[12].mxu0 %v16602_v17 }
 0x527   :  { %15199 = vmatpush3.bf16.msra.mxu0 %v17176_v45  ;;  %13831 = vmatprep.mubr.f32.mxu0 %v16614_v21  ;;  %v18391_v45 = vld [vmem:[#allocation20_spill] sm:$0xff] }
 0x528   :  { %15201 = vmatprep.subr.bf16.mxu0 %v17192_v34 }
 0x52a   :  { %13832 = vmatmul.mubr.f32.gmra.mrb[14].mxu0 %v16625_v26 }
 0x52b   :  { %15203 = vmatpush3.bf16.msra.mxu0 %v17192_v34  ;;  %13834 = vmatprep.mubr.f32.mxu0 %v16627_v27  ;;  %v12205_v34 = vld [vmem:[%s18298_s0 + $0x108] sm:$0xff] }
 0x52e   :  { %13835 = vmatmul.mubr.f32.gmra.mrb[16].mxu0 %v16656_v37 }
 0x52f   :  { %13837 = vmatprep.mubr.f32.mxu0 %v16709_v63 }
 0x532   :  { %13838 = vmatmul.mubr.f32.gmra.mrb[18].mxu0 %v18374_v62 }
 0x533   :  { %13848 = vmatprep.mubr.f32.mxu0 %v16600_v16 }
 0x536   :  { %13849 = vmatmul.mubr.f32.vlgmr.msra.gmra.mrb[12].mxu0 %v16602_v17 }
 0x537   :  { %13851 = vmatprep.mubr.f32.mxu0 %v16614_v21 }
 0x53a   :  { %13852 = vmatmul.mubr.f32.gmra.mrb[14].mxu0 %v16625_v26 }
 0x53b   :  { %13854 = vmatprep.mubr.f32.mxu0 %v16627_v27 }
 0x53e   :  { %13855 = vmatmul.mubr.f32.gmra.mrb[16].mxu0 %v16656_v37 }
 0x53f   :  { %13857 = vmatprep.mubr.f32.mxu0 %v16709_v63 }
 0x542   :  { %13858 = vmatmul.mubr.f32.gmra.mrb[18].mxu0 %v18374_v62 }
 0x543   :  { %14072 = vmatprep.mubr.f32.mxu0 %v18391_v45 }
 0x609   :  { %v13850_v53 = vpop.f32.mrb[12].mxu0 }
 0x60a   :  { %v3904_v49 = vadd.f32 %v13850_v53, %v12205_v34  ;;  %v3857_v6 = vpop.f32.mrb[13].mxu0 }
 0x60b   :  { %v3903_v28 = vadd.f32 %v12204_v0, %v3857_v6 }
 0x60c   :  { %v12221_v59 = vmul.f32 -1.442695, %v3904_v49 }
 0x60d   :  { %v12220_v47 = vmul.f32 -1.442695, %v3903_v28  ;;  %v13853_v25 = vpop.f32.mrb[14].mxu0 }
 0x60e   :  { %16292 = vpow2.f32 %v12221_v59  ;;  %v3906_v33 = vadd.f32 %v13853_v25, %v12207_v11  ;;  %v3869_v45 = vpop.f32.mrb[15].mxu0 }
 0x60f   :  { %16294 = vpow2.f32 %v12220_v47  ;;  %v3905_v35 = vadd.f32 %v12206_v61, %v3869_v45 }
 0x610   :  { %v12223_v55 = vmul.f32 -1.442695, %v3906_v33 }
 0x611   :  { %v12222_v34 = vmul.f32 -1.442695, %v3905_v35  ;;  %v17265_v53 = vpop.f32.mrb[16].mxu0 }
 0x612   :  { %16296 = vpow2.f32 %v12223_v55  ;;  %v17267_v0 = vpop.f32.mrb[17].mxu0 }
 0x613   :  { %16298 = vpow2.f32 %v12222_v34 }
 0x615   :  { %v17269_v49 = vpop.f32.mrb[18].mxu0 }
 0x616   :  { %v17271_v6 = vpop.f32.mrb[19].mxu0 }
 0x618   :  { %v16293_v19 = vpop.eup %16292 }
 0x619   :  { %v16295_v28 = vpop.eup %16294  ;;  %v3920_v46 = vadd.f32 1.0, %v16293_v19 }
 0x61a   :  { %v3919_v59 = vadd.f32 1.0, %v16295_v28 }
 0x61b   :  { %16300 = vrcp.f32 %v3920_v46 }
 0x61c   :  { %v16297_v11 = vpop.eup %16296  ;;  %16302 = vrcp.f32 %v3919_v59 }
 0x61d   :  { %v16299_v45 = vpop.eup %16298  ;;  %v3922_v61 = vadd.f32 1.0, %v16297_v11 }
 0x61e   :  { %v3921_v35 = vadd.f32 1.0, %v16299_v45 }
 0x61f   :  { %16304 = vrcp.f32 %v3922_v61 }
 0x620   :  { %16306 = vrcp.f32 %v3921_v35 }
 0x625   :  { %v16301_v55 = vpop.eup %16300 }
 0x626   :  { %v16303_v47 = vpop.eup %16302  ;;  %v3960_v25 = vmul.f32 %v16301_v55, %v17152_v8 }
 0x627   :  { %v3959_v33 = vmul.f32 %v16303_v47, %v17157_v18 }
 0x628   :  { %v3967_v34 = vand.u32 4294901760, %v3960_v25 }
 0x629   :  { %v16305_v5 = vpop.eup %16304  ;;  %v3964_v40 = vand.u32 4294901760, %v3959_v33 }
 0x62a   :  { %v16307_v32 = vpop.eup %16306  ;;  %v3962_v19 = vmul.f32 %v16305_v5, %v17171_v3  ;;  %v4081_v46 = vsub.f32 %v3960_v25, %v3967_v34 }
 0x62b   :  { %v3961_v28 = vmul.f32 %v16307_v32, %v17174_v42  ;;  %v15204_v59 = vpack.c.bf16 %v3967_v34, %v3964_v40  ;;  %v4074_v11 = vsub.f32 %v3959_v33, %v3964_v40 }
 0x62c   :  { %v3973_v45 = vand.u32 4294901760, %v3962_v19  ;;  %v4082_v61 = vand.u32 4294901760, %v4081_v46 }
 0x62d   :  { %v3970_v35 = vand.u32 4294901760, %v3961_v28  ;;  %15205 = vmatprep.subr.bf16.mxu1 %v15204_v59  ;;  %v4075_v20 = vand.u32 4294901760, %v4074_v11  ;;  %v15220_v2 = vpack.c.bf16 %v4081_v46, %v4074_v11 }
 0x62e   :  { %15207 = vmatpush3.bf16.msra.mxu1 %v15204_v59  ;;  %v4083_v55 = vsub.f32 %v4081_v46, %v4082_v61  ;;  %v4095_v47 = vsub.f32 %v3962_v19, %v3973_v45 }
 0x62f   :  { %v15208_v10 = vpack.c.bf16 %v3973_v45, %v3970_v35  ;;  %v4076_v52 = vsub.f32 %v4074_v11, %v4075_v20  ;;  %v4088_v23 = vsub.f32 %v3961_v28, %v3970_v35  ;;  %v15236_v5 = vpack.c.bf16 %v4082_v61, %v4075_v20 }
 0x630   :  { %v4084_v24 = vand.u32 4294901760, %v4083_v55  ;;  %v4096_v39 = vand.u32 4294901760, %v4095_v47 }
 0x631   :  { %15209 = vmatprep.subr.bf16.mxu1 %v15208_v10  ;;  %v4077_v25 = vand.u32 4294901760, %v4076_v52  ;;  %v4089_v32 = vand.u32 4294901760, %v4088_v23  ;;  %v15224_v34 = vpack.c.bf16 %v4095_v47, %v4088_v23 }
 0x632   :  { %15211 = vmatpush3.bf16.msra.mxu1 %v15208_v10  ;;  %v4097_v40 = vsub.f32 %v4095_v47, %v4096_v39 }
 0x633   :  { %v15212_v33 = vpack.c.bf16 %v4084_v24, %v4077_v25  ;;  %v4090_v48 = vsub.f32 %v4088_v23, %v4089_v32  ;;  %v15240_v1 = vpack.c.bf16 %v4096_v39, %v4089_v32  ;;  %v12210_v24 = vld [vmem:[%s18298_s0 + $0x130] sm:$0xff] }
 0x634   :  { %v4098_v62 = vand.u32 4294901760, %v4097_v40  ;;  %v12215_v40 = vld [vmem:[%s18298_s0 + $0x158] sm:$0xff] }
 0x635   :  { %13869 = vmatmul.mubr.f32.vlgmr.msra.gmra.mrb[12].mxu1 %v16889_v36  ;;  %15213 = vmatprep.subr.bf16.mxu1 %v15212_v33  ;;  %v4091_v19 = vand.u32 4294901760, %v4090_v48  ;;  %v12211_v48 = vld [vmem:[%s18298_s0 + $0x138] sm:$0xff] }
 0x636   :  { %15215 = vmatpush3.bf16.msra.mxu1 %v15212_v33  ;;  %13871 = vmatprep.mubr.f32.mxu1 %v16893_v7  ;;  %v3934_v52 = vadd.f32 %v17269_v49, %v12211_v48  ;;  %v12213_v49 = vld [vmem:[%s18298_s0 + $0x148] sm:$0xff]  ;;  %v12214_v33 = vld [vmem:[%s18298_s0 + $0x150] sm:$0xff] }
 0x637   :  { %v15216_v46 = vpack.c.bf16 %v4098_v62, %v4091_v19  ;;  %v12209_v62 = vld [vmem:[%s18298_s0 + $0x128] sm:$0xff] }
 0x638   :  { %v3932_v39 = vadd.f32 %v17265_v53, %v12209_v62  ;;  %v12227_v28 = vmul.f32 -1.442695, %v3934_v52 }
 0x639   :  { %13872 = vmatmul.mubr.f32.gmra.mrb[14].mxu1 %v16896_v43  ;;  %15217 = vmatprep.subr.bf16.mxu1 %v15216_v46 }
 0x63a   :  { %15219 = vmatpush3.bf16.msra.mxu1 %v15216_v46  ;;  %13882 = vmatprep.mubr.f32.mxu1 %v16807_v30 }
 0x63b   :  { %15221 = vmatprep.subr.bf16.mxu1 %v15220_v2 }
 0x63d   :  { %13883 = vmatmul.mubr.f32.vlgmr.msra.gmra.mrb[12].mxu1 %v16852_v13 }
 0x63e   :  { %15223 = vmatpush3.bf16.msra.mxu1 %v15220_v2  ;;  %13885 = vmatprep.mubr.f32.mxu1 %v16854_v9  ;;  %v12225_v2 = vmul.f32 -1.442695, %v3932_v39 }
 0x63f   :  { %15225 = vmatprep.subr.bf16.mxu1 %v15224_v34 }
 0x640   :  { %16308 = vpow2.f32 %v12225_v2  ;;  %v12217_v2 = vld [vmem:[%s18298_s0 + $0x168] sm:$0xff] }
 0x641   :  { %13886 = vmatmul.mubr.f32.gmra.mrb[14].mxu1 %v16860_v29 }
 0x642   :  { %15227 = vmatpush3.bf16.msra.mxu1 %v15224_v34  ;;  %13896 = vmatprep.mubr.f32.mxu1 %v16810_v31 }
 0x643   :  { %15229 = vmatprep.subr.bf16.mxu1 %v15204_v59 }
 0x645   :  { %13897 = vmatmul.mubr.f32.vlgmr.msra.gmra.mrb[12].mxu1 %v16858_v22 }
 0x646   :  { %15231 = vmatpush3.bf16.msra.mxu1 %v15204_v59  ;;  %13899 = vmatprep.mubr.f32.mxu1 %v16864_v15 }
 0x647   :  { %15233 = vmatprep.subr.bf16.mxu1 %v15208_v10 }
 0x649   :  { %13900 = vmatmul.mubr.f32.gmra.mrb[14].mxu1 %v16871_v60 }
 0x64a   :  { %15235 = vmatpush3.bf16.msra.mxu1 %v15208_v10  ;;  %13910 = vmatprep.mubr.f32.mxu1 %v16813_v38  ;;  %v16309_v11 = vpop.eup %16308 }
 0x64b   :  { %15237 = vmatprep.subr.bf16.mxu1 %v15236_v5  ;;  %v3948_v35 = vadd.f32 1.0, %v16309_v11  ;;  %v12216_v11 = vld [vmem:[%s18298_s0 + $0x160] sm:$0xff] }
 0x64d   :  { %13911 = vmatmul.mubr.f32.vlgmr.msra.gmra.mrb[12].mxu1 %v16868_v56 }
 0x64e   :  { %15239 = vmatpush3.bf16.msra.mxu1 %v15236_v5  ;;  %13913 = vmatprep.mubr.f32.mxu1 %v16875_v12 }
 0x64f   :  { %15241 = vmatprep.subr.bf16.mxu1 %v15240_v1 }
 0x651   :  { %13914 = vmatmul.mubr.f32.gmra.mrb[14].mxu1 %v16884_v57 }
 0x652   :  { %15243 = vmatpush3.bf16.msra.mxu1 %v15240_v1  ;;  %13924 = vmatprep.mubr.f32.mxu1 %v16807_v30  ;;  %v12208_v1 = vld [vmem:[%s18298_s0 + $0x120] sm:$0xff] }
 0x653   :  { %15245 = vmatprep.subr.bf16.mxu1 %v15204_v59  ;;  %v3931_v23 = vadd.f32 %v12208_v1, %v17267_v0 }
 0x655   :  { %13925 = vmatmul.mubr.f32.vlgmr.msra.gmra.mrb[12].mxu1 %v16852_v13  ;;  %v12224_v20 = vmul.f32 -1.442695, %v3931_v23 }
 0x656   :  { %15247 = vmatpush3.bf16.msra.mxu1 %v15204_v59  ;;  %13927 = vmatprep.mubr.f32.mxu1 %v16854_v9 }
 0x657   :  { %15249 = vmatprep.subr.bf16.mxu1 %v15208_v10  ;;  %16310 = vpow2.f32 %v12224_v20 }
 0x658   :  { %16312 = vpow2.f32 %v12227_v28 }
 0x659   :  { %13928 = vmatmul.mubr.f32.gmra.mrb[14].mxu1 %v16860_v29 }
 0x65a   :  { %15251 = vmatpush3.bf16.msra.mxu1 %v15208_v10  ;;  %13938 = vmatprep.mubr.f32.mxu1 %v16807_v30  ;;  %v3933_v10 = vadd.f32 %v12210_v24, %v17271_v6  ;;  %v12212_v6 = vld [vmem:[%s18298_s0 + $0x140] sm:$0xff] }
 0x65c   :  { %v12226_v59 = vmul.f32 -1.442695, %v3933_v10 }
 0x65d   :  { %13939 = vmatmul.mubr.f32.vlgmr.msra.gmra.mrb[12].mxu1 %v16852_v13 }
 0x65e   :  { %13941 = vmatprep.mubr.f32.mxu1 %v16854_v9  ;;  %16314 = vpow2.f32 %v12226_v59 }
 0x65f   :  { %16316 = vrcp.f32 %v3948_v35 }
 0x661   :  { %13942 = vmatmul.mubr.f32.gmra.mrb[14].mxu1 %v16860_v29  ;;  %v16311_v53 = vpop.eup %16310 }
 0x662   :  { %13952 = vmatprep.mubr.f32.mxu1 %v16688_v50  ;;  %v16313_v45 = vpop.eup %16312  ;;  %v3947_v55 = vadd.f32 1.0, %v16311_v53 }
 0x663   :  { %v3950_v47 = vadd.f32 1.0, %v16313_v45 }
 0x664   :  { %16318 = vrcp.f32 %v3947_v55 }
 0x665   :  { %16320 = vrcp.f32 %v3950_v47 }
 0x668   :  { %v16315_v61 = vpop.eup %16314 }
 0x669   :  { %v3949_v0 = vadd.f32 1.0, %v16315_v61  ;;  %v16317_v48 = vpop.eup %16316 }
 0x66a   :  { %v4590_v52 = vsub.f32 1.0, %v16317_v48  ;;  %v4586_v45 = vmul.f32 %v16317_v48, %v17152_v8 }
 0x66b   :  { %16322 = vrcp.f32 %v3949_v0 }
 0x66e   :  { %v16319_v39 = vpop.eup %16318 }
 0x66f   :  { %v16321_v24 = vpop.eup %16320  ;;  %v4589_v20 = vsub.f32 1.0, %v16319_v39  ;;  %v4585_v47 = vmul.f32 %v16319_v39, %v17157_v18 }
 0x670   :  { %v4592_v35 = vsub.f32 1.0, %v16321_v24 }
 0x675   :  { %v16323_v23 = vpop.eup %16322 }
 0x730   :  { %v13940_v5 = vpop.f32.mrb[12].mxu1 }
 0x731   :  { %v4578_v25 = vadd.f32 %v13940_v5, %v12213_v49  ;;  %v4555_v32 = vpop.f32.mrb[13].mxu1  ;;  %v12219_v49 = vld [vmem:[%s18298_s0 + $0x178] sm:$0xff] }
 0x732   :  { %v4577_v34 = vadd.f32 %v12212_v6, %v4555_v32  ;;  %v4591_v6 = vsub.f32 1.0, %v16323_v23 }
 0x733   :  { %16324 = vtanh.f32 %v4578_v25 }
 0x734   :  { %16326 = vtanh.f32 %v4577_v34  ;;  %v13943_v19 = vpop.f32.mrb[14].mxu1  ;;  %v12218_v34 = vld [vmem:[%s18298_s0 + $0x170] sm:$0xff] }
 0x735   :  { %v4580_v46 = vadd.f32 %v13943_v19, %v12215_v40  ;;  %v4567_v62 = vpop.f32.mrb[15].mxu1 }
 0x736   :  { %v4579_v1 = vadd.f32 %v12214_v33, %v4567_v62  ;;  %v4588_v33 = vmul.f32 %v16321_v24, %v17171_v3 }
 0x737   :  { %16328 = vtanh.f32 %v4580_v46  ;;  %v4587_v46 = vmul.f32 %v16323_v23, %v17174_v42 }
 0x738   :  { %16330 = vtanh.f32 %v4579_v1 }
 0x73d   :  { %v16325_v10 = vpop.eup %16324 }
 0x73e   :  { %v16327_v28 = vpop.eup %16326  ;;  %v4594_v59 = vmul.f32 %v16325_v10, %v4590_v52 }
 0x73f   :  { %v4593_v53 = vmul.f32 %v16327_v28, %v4589_v20 }
 0x740   :  { %v4598_v61 = vmul.f32 %v12217_v2, %v4594_v59 }
 0x741   :  { %v16329_v55 = vpop.eup %16328  ;;  %v4597_v0 = vmul.f32 %v12216_v11, %v4593_v53 }
 0x742   :  { %v16331_v5 = vpop.eup %16330  ;;  %v17340_v25 = vadd.f32 %v4598_v61, %v4586_v45  ;;  %v4596_v32 = vmul.f32 %v16329_v55, %v4592_v35 }
 0x743   :  { %v17345_v8 = vadd.f32 %v4597_v0, %v4585_v47  ;;  %v4595_v40 = vmul.f32 %v16331_v5, %v4591_v6 }
 0x744   :  { %12229 = vst [vmem:[%s18299_s4 + $0x48] sm:$0xff] %v17340_v25  ;;  %v4600_v18 = vmul.f32 %v12219_v49, %v4596_v32  ;;  %v4631_v19 = vand.u32 4294901760, %v17340_v25 }
 0x745   :  { %12228 = vst [vmem:[%s18299_s4 + $0x40] sm:$0xff] %v17345_v8  ;;  %v4599_v62 = vmul.f32 %v12218_v34, %v4595_v40  ;;  %v4628_v1 = vand.u32 4294901760, %v17345_v8 }
 0x746   :  { %v17359_v48 = vadd.f32 %v4600_v18, %v4588_v33  ;;  %v4785_v3 = vsub.f32 %v17340_v25, %v4631_v19  ;;  %v18392_v33 = vld [vmem:[#allocation15_spill] sm:$0xff] }
 0x747   :  { %v17362_v39 = vadd.f32 %v4599_v62, %v4587_v46  ;;  %v17364_v24 = vpack.c.bf16 %v4631_v19, %v4628_v1  ;;  %v4778_v52 = vsub.f32 %v17345_v8, %v4628_v1  ;;  %v18393_v18 = vld [vmem:[#allocation3_spill] sm:$0xff]  ;;  %v18394_v19 = vld [vmem:[#allocation4_spill] sm:$0xff]  ;;  %v18395_v46 = vld [vmem:[#allocation5_spill] sm:$0xff] }
 0x748   :  { %12231 = vst [vmem:[%s18299_s4 + $0x58] sm:$0xff] %v17359_v48  ;;  %v4637_v42 = vand.u32 4294901760, %v17359_v48  ;;  %v4786_v23 = vand.u32 4294901760, %v4785_v3  ;;  %v18396_v62 = vld [vmem:[#allocation8_spill] sm:$0xff] }
 0x749   :  { %12230 = vst [vmem:[%s18299_s4 + $0x50] sm:$0xff] %v17362_v39  ;;  %15253 = vmatprep.subr.bf16.mxu1 %v17364_v24  ;;  %v4634_v10 = vand.u32 4294901760, %v17362_v39  ;;  %v4779_v2 = vand.u32 4294901760, %v4778_v52  ;;  %v15268_v34 = vpack.c.bf16 %v4785_v3, %v4778_v52 }
 0x74a   :  { %15255 = vmatpush3.bf16.msra.mxu1 %v17364_v24  ;;  %v4787_v20 = vsub.f32 %v4785_v3, %v4786_v23  ;;  %v4799_v28 = vsub.f32 %v17359_v48, %v4637_v42  ;;  %v18397_v3 = vld [vmem:[#allocation9_spill] sm:$0xff] }
 0x74b   :  { %v17380_v59 = vpack.c.bf16 %v4637_v42, %v4634_v10  ;;  %v4780_v11 = vsub.f32 %v4778_v52, %v4779_v2  ;;  %v4792_v53 = vsub.f32 %v17362_v39, %v4634_v10  ;;  %v15284_v1 = vpack.c.bf16 %v4786_v23, %v4779_v2  ;;  %v18398_v52 = vld [vmem:[#allocation13_spill] sm:$0xff]  ;;  %v18399_v42 = vld [vmem:[#allocation16_spill] sm:$0xff]  ;;  %v18404_v23 = vld [vmem:[#allocation11_spill] sm:$0xff] }
 0x74c   :  { %v4788_v45 = vand.u32 4294901760, %v4787_v20  ;;  %v4800_v61 = vand.u32 4294901760, %v4799_v28  ;;  %v18400_v10 = vld [vmem:[#allocation17_spill] sm:$0xff]  ;;  %v18401_v20 = vld [vmem:[#allocation6_spill] sm:$0xff]  ;;  %v18405_v2 = vld [vmem:[#allocation12_spill] sm:$0xff] }
 0x74d   :  { %15257 = vmatprep.subr.bf16.mxu1 %v17380_v59  ;;  %v4781_v35 = vand.u32 4294901760, %v4780_v11  ;;  %v4793_v55 = vand.u32 4294901760, %v4792_v53  ;;  %v15272_v40 = vpack.c.bf16 %v4799_v28, %v4792_v53 }
 0x74e   :  { %15259 = vmatpush3.bf16.msra.mxu1 %v17380_v59  ;;  %v4801_v47 = vsub.f32 %v4799_v28, %v4800_v61  ;;  %v18402_v28 = vld [vmem:[#allocation7_spill] sm:$0xff] }
 0x74f   :  { %v15260_v0 = vpack.c.bf16 %v4788_v45, %v4781_v35  ;;  %v4794_v49 = vsub.f32 %v4792_v53, %v4793_v55  ;;  %v15288_v11 = vpack.c.bf16 %v4800_v61, %v4793_v55  ;;  %v18403_v53 = vld [vmem:[#allocation10_spill] sm:$0xff]  ;;  %v12232_v61 = vld [vmem:[%s18298_s0 + $0x180] sm:$0xff] }
 0x750   :  { %v4802_v6 = vand.u32 4294901760, %v4801_v47  ;;  %v18406_v45 = vld [vmem:[#allocation14_spill] sm:$0xff]  ;;  %v18408_v47 = vld [vmem:[#allocation19_spill] sm:$0xff] }
 0x751   :  { %13953 = vmatmul.mubr.f32.vlgmr.msra.gmra.mrb[16].mxu1 %v16690_v51  ;;  %15261 = vmatprep.subr.bf16.mxu1 %v15260_v0  ;;  %v4795_v5 = vand.u32 4294901760, %v4794_v49  ;;  %v18407_v35 = vld [vmem:[#allocation18_spill] sm:$0xff] }
 0x752   :  { %15263 = vmatpush3.bf16.msra.mxu1 %v15260_v0  ;;  %13955 = vmatprep.mubr.f32.mxu1 %v16696_v54 }
 0x753   :  { %v15264_v32 = vpack.c.bf16 %v4802_v6, %v4795_v5  ;;  %v12235_v5 = vld [vmem:[%s18298_s0 + $0x198] sm:$0xff] }
 0x755   :  { %13956 = vmatmul.mubr.f32.gmra.mrb[18].mxu1 %v16702_v58  ;;  %15265 = vmatprep.subr.bf16.mxu1 %v15264_v32 }
 0x756   :  { %15267 = vmatpush3.bf16.msra.mxu1 %v15264_v32  ;;  %13958 = vmatprep.mubr.f32.mxu1 %v16714_v4 }
 0x757   :  { %15269 = vmatprep.subr.bf16.mxu1 %v15268_v34 }
 0x759   :  { %13959 = vmatmul.mubr.f32.gmra.mrb[20].mxu1 %v16729_v14 }
 0x75a   :  { %13961 = vmatprep.mubr.f32.mxu1 %v16743_v41 }
 0x75d   :  { %13962 = vmatmul.mubr.f32.gmra.mrb[22].mxu1 %v16745_v44 }
 0x75e   :  { %13972 = vmatprep.mubr.f32.mxu1 %v16600_v16 }
 0x761   :  { %13973 = vmatmul.mubr.f32.vlgmr.msra.gmra.mrb[16].mxu1 %v16602_v17 }
 0x762   :  { %15271 = vmatpush3.bf16.msra.mxu1 %v15268_v34  ;;  %13975 = vmatprep.mubr.f32.mxu1 %v16614_v21  ;;  %v12234_v34 = vld [vmem:[%s18298_s0 + $0x190] sm:$0xff] }
 0x763   :  { %15273 = vmatprep.subr.bf16.mxu1 %v15272_v40 }
 0x765   :  { %13976 = vmatmul.mubr.f32.gmra.mrb[18].mxu1 %v16625_v26 }
 0x766   :  { %15275 = vmatpush3.bf16.msra.mxu1 %v15272_v40  ;;  %13978 = vmatprep.mubr.f32.mxu1 %v16627_v27 }
 0x767   :  { %15277 = vmatprep.subr.bf16.mxu1 %v17364_v24 }
 0x769   :  { %13979 = vmatmul.mubr.f32.gmra.mrb[20].mxu1 %v16656_v37 }
 0x76a   :  { %13981 = vmatprep.mubr.f32.mxu1 %v16709_v63 }
 0x76d   :  { %13982 = vmatmul.mubr.f32.gmra.mrb[22].mxu1 %v18392_v33 }
 0x76e   :  { %13992 = vmatprep.mubr.f32.mxu1 %v18393_v18 }
 0x771   :  { %13993 = vmatmul.mubr.f32.vlgmr.msra.gmra.mrb[16].mxu1 %v18394_v19 }
 0x772   :  { %15279 = vmatpush3.bf16.msra.mxu1 %v17364_v24  ;;  %13995 = vmatprep.mubr.f32.mxu1 %v18395_v46 }
 0x773   :  { %15281 = vmatprep.subr.bf16.mxu1 %v17380_v59 }
 0x775   :  { %13996 = vmatmul.mubr.f32.gmra.mrb[18].mxu1 %v18396_v62 }
 0x776   :  { %15283 = vmatpush3.bf16.msra.mxu1 %v17380_v59  ;;  %13998 = vmatprep.mubr.f32.mxu1 %v18397_v3 }
 0x777   :  { %15285 = vmatprep.subr.bf16.mxu1 %v15284_v1 }
 0x779   :  { %13999 = vmatmul.mubr.f32.gmra.mrb[20].mxu1 %v18398_v52 }
 0x77a   :  { %14001 = vmatprep.mubr.f32.mxu1 %v18399_v42 }
 0x77d   :  { %14002 = vmatmul.mubr.f32.gmra.mrb[22].mxu1 %v18400_v10 }
 0x77e   :  { %14012 = vmatprep.mubr.f32.mxu1 %v18401_v20 }
 0x781   :  { %14013 = vmatmul.mubr.f32.vlgmr.msra.gmra.mrb[16].mxu1 %v18402_v28 }
 0x782   :  { %15287 = vmatpush3.bf16.msra.mxu1 %v15284_v1  ;;  %14015 = vmatprep.mubr.f32.mxu1 %v18403_v53 }
 0x783   :  { %15289 = vmatprep.subr.bf16.mxu1 %v15288_v11 }
 0x785   :  { %14016 = vmatmul.mubr.f32.gmra.mrb[18].mxu1 %v18404_v23 }
 0x786   :  { %15291 = vmatpush3.bf16.msra.mxu1 %v15288_v11  ;;  %14018 = vmatprep.mubr.f32.mxu1 %v18405_v2 }
 0x787   :  { %15293 = vmatprep.subr.bf16.mxu1 %v17364_v24 }
 0x789   :  { %14019 = vmatmul.mubr.f32.gmra.mrb[20].mxu1 %v18406_v45 }
 0x78a   :  { %14021 = vmatprep.mubr.f32.mxu1 %v18407_v35 }
 0x78d   :  { %14022 = vmatmul.mubr.f32.gmra.mrb[22].mxu1 %v18408_v47 }
 0x78e   :  { %14032 = vmatprep.mubr.f32.mxu1 %v16600_v16 }
 0x791   :  { %14033 = vmatmul.mubr.f32.vlgmr.msra.gmra.mrb[16].mxu1 %v16602_v17 }
 0x792   :  { %15295 = vmatpush3.bf16.msra.mxu1 %v17364_v24  ;;  %14035 = vmatprep.mubr.f32.mxu1 %v16614_v21  ;;  %v18409_v24 = vld [vmem:[#allocation20_spill] sm:$0xff] }
 0x793   :  { %15297 = vmatprep.subr.bf16.mxu1 %v17380_v59 }
 0x795   :  { %14036 = vmatmul.mubr.f32.gmra.mrb[18].mxu1 %v16625_v26 }
 0x796   :  { %15299 = vmatpush3.bf16.msra.mxu1 %v17380_v59  ;;  %14038 = vmatprep.mubr.f32.mxu1 %v16627_v27  ;;  %v12233_v59 = vld [vmem:[%s18298_s0 + $0x188] sm:$0xff] }
 0x799   :  { %14039 = vmatmul.mubr.f32.gmra.mrb[20].mxu1 %v16656_v37 }
 0x79a   :  { %14041 = vmatprep.mubr.f32.mxu1 %v16709_v63 }
 0x79d   :  { %14042 = vmatmul.mubr.f32.gmra.mrb[22].mxu1 %v18392_v33 }
 0x79e   :  { %14052 = vmatprep.mubr.f32.mxu1 %v16600_v16 }
 0x7a1   :  { %14053 = vmatmul.mubr.f32.vlgmr.msra.gmra.mrb[16].mxu1 %v16602_v17 }
 0x7a2   :  { %14055 = vmatprep.mubr.f32.mxu1 %v16614_v21 }
 0x7a5   :  { %14056 = vmatmul.mubr.f32.gmra.mrb[18].mxu1 %v16625_v26 }
 0x7a6   :  { %14058 = vmatprep.mubr.f32.mxu1 %v16627_v27 }
 0x7a9   :  { %14059 = vmatmul.mubr.f32.gmra.mrb[20].mxu1 %v16656_v37 }
 0x7aa   :  { %14061 = vmatprep.mubr.f32.mxu1 %v16709_v63 }
 0x7ad   :  { %14062 = vmatmul.mubr.f32.gmra.mrb[22].mxu1 %v18392_v33 }
 0x7ae   :  { %14276 = vmatprep.mubr.f32.mxu1 %v18409_v24 }
 0x874   :  { %v14054_v55 = vpop.f32.mrb[16].mxu1 }
 0x875   :  { %v5414_v0 = vadd.f32 %v14054_v55, %v12233_v59  ;;  %v5367_v49 = vpop.f32.mrb[17].mxu1 }
 0x876   :  { %v5413_v6 = vadd.f32 %v12232_v61, %v5367_v49 }
 0x877   :  { %v12249_v32 = vmul.f32 -1.442695, %v5414_v0 }
 0x878   :  { %v12248_v40 = vmul.f32 -1.442695, %v5413_v6  ;;  %v14057_v1 = vpop.f32.mrb[18].mxu1 }
 0x879   :  { %16332 = vpow2.f32 %v12249_v32  ;;  %v5416_v11 = vadd.f32 %v14057_v1, %v12235_v5  ;;  %v5379_v24 = vpop.f32.mrb[19].mxu1 }
 0x87a   :  { %16334 = vpow2.f32 %v12248_v40  ;;  %v5415_v47 = vadd.f32 %v12234_v34, %v5379_v24 }
 0x87b   :  { %v12251_v35 = vmul.f32 -1.442695, %v5416_v11 }
 0x87c   :  { %v12250_v59 = vmul.f32 -1.442695, %v5415_v47  ;;  %v17453_v55 = vpop.f32.mrb[20].mxu1 }
 0x87d   :  { %16336 = vpow2.f32 %v12251_v35  ;;  %v17455_v61 = vpop.f32.mrb[21].mxu1 }
 0x87e   :  { %16338 = vpow2.f32 %v12250_v59 }
 0x880   :  { %v17457_v0 = vpop.f32.mrb[22].mxu1 }
 0x881   :  { %v17459_v49 = vpop.f32.mrb[23].mxu1 }
 0x883   :  { %v16333_v45 = vpop.eup %16332 }
 0x884   :  { %v16335_v6 = vpop.eup %16334  ;;  %v5430_v2 = vadd.f32 1.0, %v16333_v45 }
 0x885   :  { %v5429_v32 = vadd.f32 1.0, %v16335_v6 }
 0x886   :  { %16340 = vrcp.f32 %v5430_v2 }
 0x887   :  { %v16337_v5 = vpop.eup %16336  ;;  %16342 = vrcp.f32 %v5429_v32 }
 0x888   :  { %v16339_v24 = vpop.eup %16338  ;;  %v5432_v34 = vadd.f32 1.0, %v16337_v5 }
 0x889   :  { %v5431_v47 = vadd.f32 1.0, %v16339_v24 }
 0x88a   :  { %16344 = vrcp.f32 %v5432_v34 }
 0x88b   :  { %16346 = vrcp.f32 %v5431_v47 }
 0x890   :  { %v16341_v35 = vpop.eup %16340 }
 0x891   :  { %v16343_v40 = vpop.eup %16342  ;;  %v5470_v1 = vmul.f32 %v16341_v35, %v17340_v25 }
 0x892   :  { %v5469_v11 = vmul.f32 %v16343_v40, %v17345_v8 }
 0x893   :  { %v5477_v59 = vand.u32 4294901760, %v5470_v1 }
 0x894   :  { %v16345_v23 = vpop.eup %16344  ;;  %v5474_v53 = vand.u32 4294901760, %v5469_v11 }
 0x895   :  { %v16347_v28 = vpop.eup %16346  ;;  %v5472_v45 = vmul.f32 %v16345_v23, %v17359_v48  ;;  %v5591_v2 = vsub.f32 %v5470_v1, %v5477_v59 }
 0x896   :  { %v5471_v6 = vmul.f32 %v16347_v28, %v17362_v39  ;;  %v15300_v32 = vpack.c.bf16 %v5477_v59, %v5474_v53  ;;  %v5584_v5 = vsub.f32 %v5469_v11, %v5474_v53 }
 0x897   :  { %v5483_v24 = vand.u32 4294901760, %v5472_v45  ;;  %v5592_v34 = vand.u32 4294901760, %v5591_v2 }
 0x898   :  { %v5480_v47 = vand.u32 4294901760, %v5471_v6  ;;  %15301 = vmatprep.subr.bf16.mxu0 %v15300_v32  ;;  %v5585_v20 = vand.u32 4294901760, %v5584_v5  ;;  %v15316_v10 = vpack.c.bf16 %v5591_v2, %v5584_v5 }
 0x899   :  { %15303 = vmatpush3.bf16.msra.mxu0 %v15300_v32  ;;  %v5593_v35 = vsub.f32 %v5591_v2, %v5592_v34  ;;  %v5605_v40 = vsub.f32 %v5472_v45, %v5483_v24 }
 0x89a   :  { %v15304_v42 = vpack.c.bf16 %v5483_v24, %v5480_v47  ;;  %v5586_v52 = vsub.f32 %v5584_v5, %v5585_v20  ;;  %v5598_v3 = vsub.f32 %v5471_v6, %v5480_v47  ;;  %v15332_v23 = vpack.c.bf16 %v5592_v34, %v5585_v20 }
 0x89b   :  { %v5594_v62 = vand.u32 4294901760, %v5593_v35  ;;  %v5606_v46 = vand.u32 4294901760, %v5605_v40 }
 0x89c   :  { %15305 = vmatprep.subr.bf16.mxu0 %v15304_v42  ;;  %v5587_v1 = vand.u32 4294901760, %v5586_v52  ;;  %v5599_v28 = vand.u32 4294901760, %v5598_v3  ;;  %v15320_v59 = vpack.c.bf16 %v5605_v40, %v5598_v3 }
 0x89d   :  { %15307 = vmatpush3.bf16.msra.mxu0 %v15304_v42  ;;  %v5607_v53 = vsub.f32 %v5605_v40, %v5606_v46 }
 0x89e   :  { %v15308_v11 = vpack.c.bf16 %v5594_v62, %v5587_v1  ;;  %v5600_v19 = vsub.f32 %v5598_v3, %v5599_v28  ;;  %v15336_v18 = vpack.c.bf16 %v5606_v46, %v5599_v28  ;;  %v12238_v62 = vld [vmem:[%s18298_s0 + $0x1b0] sm:$0xff] }
 0x89f   :  { %v5608_v33 = vand.u32 4294901760, %v5607_v53  ;;  %v12243_v53 = vld [vmem:[%s18298_s0 + $0x1d8] sm:$0xff] }
 0x8a0   :  { %14073 = vmatmul.mubr.f32.vlgmr.msra.gmra.mrb[20].mxu0 %v16889_v36  ;;  %15309 = vmatprep.subr.bf16.mxu0 %v15308_v11  ;;  %v5601_v45 = vand.u32 4294901760, %v5600_v19  ;;  %v12239_v19 = vld [vmem:[%s18298_s0 + $0x1b8] sm:$0xff] }
 0x8a1   :  { %15311 = vmatpush3.bf16.msra.mxu0 %v15308_v11  ;;  %14075 = vmatprep.mubr.f32.mxu0 %v16893_v7  ;;  %v5444_v52 = vadd.f32 %v17457_v0, %v12239_v19  ;;  %v12241_v0 = vld [vmem:[%s18298_s0 + $0x1c8] sm:$0xff]  ;;  %v12242_v11 = vld [vmem:[%s18298_s0 + $0x1d0] sm:$0xff] }
 0x8a2   :  { %v15312_v2 = vpack.c.bf16 %v5608_v33, %v5601_v45  ;;  %v12237_v33 = vld [vmem:[%s18298_s0 + $0x1a8] sm:$0xff] }
 0x8a3   :  { %v5442_v46 = vadd.f32 %v17453_v55, %v12237_v33  ;;  %v12255_v6 = vmul.f32 -1.442695, %v5444_v52 }
 0x8a4   :  { %14076 = vmatmul.mubr.f32.gmra.mrb[22].mxu0 %v16896_v43  ;;  %15313 = vmatprep.subr.bf16.mxu0 %v15312_v2 }
 0x8a5   :  { %15315 = vmatpush3.bf16.msra.mxu0 %v15312_v2  ;;  %14086 = vmatprep.mubr.f32.mxu0 %v16807_v30 }
 0x8a6   :  { %15317 = vmatprep.subr.bf16.mxu0 %v15316_v10 }
 0x8a8   :  { %14087 = vmatmul.mubr.f32.vlgmr.msra.gmra.mrb[20].mxu0 %v16852_v13 }
 0x8a9   :  { %15319 = vmatpush3.bf16.msra.mxu0 %v15316_v10  ;;  %14089 = vmatprep.mubr.f32.mxu0 %v16854_v9  ;;  %v12253_v10 = vmul.f32 -1.442695, %v5442_v46 }
 0x8aa   :  { %15321 = vmatprep.subr.bf16.mxu0 %v15320_v59 }
 0x8ab   :  { %16348 = vpow2.f32 %v12253_v10  ;;  %v12245_v10 = vld [vmem:[%s18298_s0 + $0x1e8] sm:$0xff] }
 0x8ac   :  { %14090 = vmatmul.mubr.f32.gmra.mrb[22].mxu0 %v16860_v29 }
 0x8ad   :  { %15323 = vmatpush3.bf16.msra.mxu0 %v15320_v59  ;;  %14100 = vmatprep.mubr.f32.mxu0 %v16810_v31 }
 0x8ae   :  { %15325 = vmatprep.subr.bf16.mxu0 %v15300_v32 }
 0x8b0   :  { %14101 = vmatmul.mubr.f32.vlgmr.msra.gmra.mrb[20].mxu0 %v16858_v22 }
 0x8b1   :  { %15327 = vmatpush3.bf16.msra.mxu0 %v15300_v32  ;;  %14103 = vmatprep.mubr.f32.mxu0 %v16864_v15 }
 0x8b2   :  { %15329 = vmatprep.subr.bf16.mxu0 %v15304_v42 }
 0x8b4   :  { %14104 = vmatmul.mubr.f32.gmra.mrb[22].mxu0 %v16871_v60 }
 0x8b5   :  { %15331 = vmatpush3.bf16.msra.mxu0 %v15304_v42  ;;  %14114 = vmatprep.mubr.f32.mxu0 %v16813_v38  ;;  %v16349_v5 = vpop.eup %16348 }
 0x8b6   :  { %15333 = vmatprep.subr.bf16.mxu0 %v15332_v23  ;;  %v5458_v47 = vadd.f32 1.0, %v16349_v5  ;;  %v12244_v5 = vld [vmem:[%s18298_s0 + $0x1e0] sm:$0xff] }
 0x8b8   :  { %14115 = vmatmul.mubr.f32.vlgmr.msra.gmra.mrb[20].mxu0 %v16868_v56 }
 0x8b9   :  { %15335 = vmatpush3.bf16.msra.mxu0 %v15332_v23  ;;  %14117 = vmatprep.mubr.f32.mxu0 %v16875_v12 }
 0x8ba   :  { %15337 = vmatprep.subr.bf16.mxu0 %v15336_v18 }
 0x8bc   :  { %14118 = vmatmul.mubr.f32.gmra.mrb[22].mxu0 %v16884_v57 }
 0x8bd   :  { %15339 = vmatpush3.bf16.msra.mxu0 %v15336_v18  ;;  %14128 = vmatprep.mubr.f32.mxu0 %v16807_v30  ;;  %v12236_v18 = vld [vmem:[%s18298_s0 + $0x1a0] sm:$0xff] }
 0x8be   :  { %15341 = vmatprep.subr.bf16.mxu0 %v15300_v32  ;;  %v5441_v3 = vadd.f32 %v12236_v18, %v17455_v61 }
 0x8c0   :  { %14129 = vmatmul.mubr.f32.vlgmr.msra.gmra.mrb[20].mxu0 %v16852_v13  ;;  %v12252_v20 = vmul.f32 -1.442695, %v5441_v3 }
 0x8c1   :  { %15343 = vmatpush3.bf16.msra.mxu0 %v15300_v32  ;;  %14131 = vmatprep.mubr.f32.mxu0 %v16854_v9 }
 0x8c2   :  { %15345 = vmatprep.subr.bf16.mxu0 %v15304_v42  ;;  %16350 = vpow2.f32 %v12252_v20 }
 0x8c3   :  { %16352 = vpow2.f32 %v12255_v6 }
 0x8c4   :  { %14132 = vmatmul.mubr.f32.gmra.mrb[22].mxu0 %v16860_v29 }
 0x8c5   :  { %15347 = vmatpush3.bf16.msra.mxu0 %v15304_v42  ;;  %14142 = vmatprep.mubr.f32.mxu0 %v16807_v30  ;;  %v5443_v42 = vadd.f32 %v12238_v62, %v17459_v49  ;;  %v12240_v49 = vld [vmem:[%s18298_s0 + $0x1c0] sm:$0xff] }
 0x8c7   :  { %v12254_v32 = vmul.f32 -1.442695, %v5443_v42 }
 0x8c8   :  { %14143 = vmatmul.mubr.f32.vlgmr.msra.gmra.mrb[20].mxu0 %v16852_v13 }
 0x8c9   :  { %14145 = vmatprep.mubr.f32.mxu0 %v16854_v9  ;;  %16354 = vpow2.f32 %v12254_v32 }
 0x8ca   :  { %16356 = vrcp.f32 %v5458_v47 }
 0x8cc   :  { %14146 = vmatmul.mubr.f32.gmra.mrb[22].mxu0 %v16860_v29  ;;  %v16351_v55 = vpop.eup %16350 }
 0x8cd   :  { %14156 = vmatprep.mubr.f32.mxu0 %v16688_v50  ;;  %v16353_v24 = vpop.eup %16352  ;;  %v5457_v35 = vadd.f32 1.0, %v16351_v55 }
 0x8ce   :  { %v5460_v40 = vadd.f32 1.0, %v16353_v24 }
 0x8cf   :  { %16358 = vrcp.f32 %v5457_v35 }
 0x8d0   :  { %16360 = vrcp.f32 %v5460_v40 }
 0x8d3   :  { %v16355_v34 = vpop.eup %16354 }
 0x8d4   :  { %v5459_v61 = vadd.f32 1.0, %v16355_v34  ;;  %v16357_v19 = vpop.eup %16356 }
 0x8d5   :  { %v6100_v52 = vsub.f32 1.0, %v16357_v19  ;;  %v6096_v24 = vmul.f32 %v16357_v19, %v17340_v25 }
 0x8d6   :  { %16362 = vrcp.f32 %v5459_v61 }
 0x8d9   :  { %v16359_v46 = vpop.eup %16358 }
 0x8da   :  { %v16361_v62 = vpop.eup %16360  ;;  %v6099_v20 = vsub.f32 1.0, %v16359_v46  ;;  %v6095_v40 = vmul.f32 %v16359_v46, %v17345_v8 }
 0x8db   :  { %v6102_v47 = vsub.f32 1.0, %v16361_v62 }
 0x8e0   :  { %v16363_v3 = vpop.eup %16362 }
 0x99b   :  { %v14144_v23 = vpop.f32.mrb[20].mxu0 }
 0x99c   :  { %v6088_v1 = vadd.f32 %v14144_v23, %v12241_v0  ;;  %v6065_v28 = vpop.f32.mrb[21].mxu0  ;;  %v12247_v0 = vld [vmem:[%s18298_s0 + $0x1f8] sm:$0xff] }
 0x99d   :  { %v6087_v59 = vadd.f32 %v12240_v49, %v6065_v28  ;;  %v6101_v49 = vsub.f32 1.0, %v16363_v3 }
 0x99e   :  { %16364 = vtanh.f32 %v6088_v1 }
 0x99f   :  { %16366 = vtanh.f32 %v6087_v59  ;;  %v14147_v45 = vpop.f32.mrb[22].mxu0  ;;  %v12246_v59 = vld [vmem:[%s18298_s0 + $0x1f0] sm:$0xff] }
 0x9a0   :  { %v6090_v2 = vadd.f32 %v14147_v45, %v12243_v53  ;;  %v6077_v33 = vpop.f32.mrb[23].mxu0 }
 0x9a1   :  { %v6089_v18 = vadd.f32 %v12242_v11, %v6077_v33  ;;  %v6098_v11 = vmul.f32 %v16361_v62, %v17359_v48 }
 0x9a2   :  { %16368 = vtanh.f32 %v6090_v2  ;;  %v6097_v2 = vmul.f32 %v16363_v3, %v17362_v39 }
 0x9a3   :  { %16370 = vtanh.f32 %v6089_v18 }
 0x9a8   :  { %v16365_v42 = vpop.eup %16364 }
 0x9a9   :  { %v16367_v6 = vpop.eup %16366  ;;  %v6104_v32 = vmul.f32 %v16365_v42, %v6100_v52 }
 0x9aa   :  { %v6103_v55 = vmul.f32 %v16367_v6, %v6099_v20 }
 0x9ab   :  { %v6108_v34 = vmul.f32 %v12245_v10, %v6104_v32 }
 0x9ac   :  { %v16369_v35 = vpop.eup %16368  ;;  %v6107_v61 = vmul.f32 %v12244_v5, %v6103_v55 }
 0x9ad   :  { %v16371_v23 = vpop.eup %16370  ;;  %v17528_v1 = vadd.f32 %v6108_v34, %v6096_v24  ;;  %v6106_v28 = vmul.f32 %v16369_v35, %v6102_v47 }
 0x9ae   :  { %v17533_v25 = vadd.f32 %v6107_v61, %v6095_v40  ;;  %v6105_v53 = vmul.f32 %v16371_v23, %v6101_v49 }
 0x9af   :  { %12257 = vst [vmem:[%s18299_s4 + $0x68] sm:$0xff] %v17528_v1  ;;  %v6110_v8 = vmul.f32 %v12247_v0, %v6106_v28  ;;  %v6141_v45 = vand.u32 4294901760, %v17528_v1 }
 0x9b0   :  { %12256 = vst [vmem:[%s18299_s4 + $0x60] sm:$0xff] %v17533_v25  ;;  %v6109_v33 = vmul.f32 %v12246_v59, %v6105_v53  ;;  %v6138_v18 = vand.u32 4294901760, %v17533_v25 }
 0x9b1   :  { %v17547_v19 = vadd.f32 %v6110_v8, %v6098_v11  ;;  %v6295_v48 = vsub.f32 %v17528_v1, %v6141_v45  ;;  %v18410_v11 = vld [vmem:[#allocation15_spill] sm:$0xff] }
 0x9b2   :  { %v17550_v46 = vadd.f32 %v6109_v33, %v6097_v2  ;;  %v17552_v62 = vpack.c.bf16 %v6141_v45, %v6138_v18  ;;  %v6288_v52 = vsub.f32 %v17533_v25, %v6138_v18  ;;  %v18411_v8 = vld [vmem:[#allocation3_spill] sm:$0xff]  ;;  %v18412_v45 = vld [vmem:[#allocation4_spill] sm:$0xff]  ;;  %v18413_v2 = vld [vmem:[#allocation5_spill] sm:$0xff] }
 0x9b3   :  { %12259 = vst [vmem:[%s18299_s4 + $0x78] sm:$0xff] %v17547_v19  ;;  %v6147_v39 = vand.u32 4294901760, %v17547_v19  ;;  %v6296_v3 = vand.u32 4294901760, %v6295_v48  ;;  %v18414_v33 = vld [vmem:[#allocation8_spill] sm:$0xff] }
 0x9b4   :  { %12258 = vst [vmem:[%s18299_s4 + $0x70] sm:$0xff] %v17550_v46  ;;  %15349 = vmatprep.subr.bf16.mxu0 %v17552_v62  ;;  %v6144_v42 = vand.u32 4294901760, %v17550_v46  ;;  %v6289_v10 = vand.u32 4294901760, %v6288_v52  ;;  %v15364_v59 = vpack.c.bf16 %v6295_v48, %v6288_v52 }
 0x9b5   :  { %15351 = vmatpush3.bf16.msra.mxu0 %v17552_v62  ;;  %v6297_v20 = vsub.f32 %v6295_v48, %v6296_v3  ;;  %v6309_v6 = vsub.f32 %v17547_v19, %v6147_v39  ;;  %v18415_v48 = vld [vmem:[#allocation9_spill] sm:$0xff] }
 0x9b6   :  { %v17568_v32 = vpack.c.bf16 %v6147_v39, %v6144_v42  ;;  %v6290_v5 = vsub.f32 %v6288_v52, %v6289_v10  ;;  %v6302_v55 = vsub.f32 %v17550_v46, %v6144_v42  ;;  %v15380_v18 = vpack.c.bf16 %v6296_v3, %v6289_v10  ;;  %v18416_v52 = vld [vmem:[#allocation13_spill] sm:$0xff]  ;;  %v18417_v39 = vld [vmem:[#allocation16_spill] sm:$0xff]  ;;  %v18422_v3 = vld [vmem:[#allocation11_spill] sm:$0xff] }
 0x9b7   :  { %v6298_v24 = vand.u32 4294901760, %v6297_v20  ;;  %v6310_v34 = vand.u32 4294901760, %v6309_v6  ;;  %v18418_v42 = vld [vmem:[#allocation17_spill] sm:$0xff]  ;;  %v18419_v20 = vld [vmem:[#allocation6_spill] sm:$0xff]  ;;  %v18423_v10 = vld [vmem:[#allocation12_spill] sm:$0xff] }
 0x9b8   :  { %15353 = vmatprep.subr.bf16.mxu0 %v17568_v32  ;;  %v6291_v47 = vand.u32 4294901760, %v6290_v5  ;;  %v6303_v35 = vand.u32 4294901760, %v6302_v55  ;;  %v15368_v53 = vpack.c.bf16 %v6309_v6, %v6302_v55 }
 0x9b9   :  { %15355 = vmatpush3.bf16.msra.mxu0 %v17568_v32  ;;  %v6311_v40 = vsub.f32 %v6309_v6, %v6310_v34  ;;  %v18420_v6 = vld [vmem:[#allocation7_spill] sm:$0xff] }
 0x9ba   :  { %v15356_v61 = vpack.c.bf16 %v6298_v24, %v6291_v47  ;;  %v6304_v0 = vsub.f32 %v6302_v55, %v6303_v35  ;;  %v15384_v5 = vpack.c.bf16 %v6310_v34, %v6303_v35  ;;  %v18421_v55 = vld [vmem:[#allocation10_spill] sm:$0xff]  ;;  %v12260_v34 = vld [vmem:[%s18298_s0 + $0x200] sm:$0xff] }
 0x9bb   :  { %v6312_v49 = vand.u32 4294901760, %v6311_v40  ;;  %v18424_v24 = vld [vmem:[#allocation14_spill] sm:$0xff]  ;;  %v18426_v40 = vld [vmem:[#allocation19_spill] sm:$0xff] }
 0x9bc   :  { %14157 = vmatmul.mubr.f32.vlgmr.msra.gmra.mrb[24].mxu0 %v16690_v51  ;;  %15357 = vmatprep.subr.bf16.mxu0 %v15356_v61  ;;  %v6305_v23 = vand.u32 4294901760, %v6304_v0  ;;  %v18425_v47 = vld [vmem:[#allocation18_spill] sm:$0xff] }
 0x9bd   :  { %15359 = vmatpush3.bf16.msra.mxu0 %v15356_v61  ;;  %14159 = vmatprep.mubr.f32.mxu0 %v16696_v54 }
 0x9be   :  { %v15360_v28 = vpack.c.bf16 %v6312_v49, %v6305_v23  ;;  %v12263_v23 = vld [vmem:[%s18298_s0 + $0x218] sm:$0xff] }
 0x9c0   :  { %14160 = vmatmul.mubr.f32.gmra.mrb[26].mxu0 %v16702_v58  ;;  %15361 = vmatprep.subr.bf16.mxu0 %v15360_v28 }
 0x9c1   :  { %15363 = vmatpush3.bf16.msra.mxu0 %v15360_v28  ;;  %14162 = vmatprep.mubr.f32.mxu0 %v16714_v4 }
 0x9c2   :  { %15365 = vmatprep.subr.bf16.mxu0 %v15364_v59 }
 0x9c4   :  { %14163 = vmatmul.mubr.f32.gmra.mrb[28].mxu0 %v16729_v14 }
 0x9c5   :  { %14165 = vmatprep.mubr.f32.mxu0 %v16743_v41 }
 0x9c8   :  { %14166 = vmatmul.mubr.f32.gmra.mrb[30].mxu0 %v16745_v44 }
 0x9c9   :  { %14176 = vmatprep.mubr.f32.mxu0 %v16600_v16 }
 0x9cc   :  { %14177 = vmatmul.mubr.f32.vlgmr.msra.gmra.mrb[24].mxu0 %v16602_v17 }
 0x9cd   :  { %15367 = vmatpush3.bf16.msra.mxu0 %v15364_v59  ;;  %14179 = vmatprep.mubr.f32.mxu0 %v16614_v21  ;;  %v12262_v59 = vld [vmem:[%s18298_s0 + $0x210] sm:$0xff] }
 0x9ce   :  { %15369 = vmatprep.subr.bf16.mxu0 %v15368_v53 }
 0x9d0   :  { %14180 = vmatmul.mubr.f32.gmra.mrb[26].mxu0 %v16625_v26 }
 0x9d1   :  { %15371 = vmatpush3.bf16.msra.mxu0 %v15368_v53  ;;  %14182 = vmatprep.mubr.f32.mxu0 %v16627_v27 }
 0x9d2   :  { %15373 = vmatprep.subr.bf16.mxu0 %v17552_v62 }
 0x9d4   :  { %14183 = vmatmul.mubr.f32.gmra.mrb[28].mxu0 %v16656_v37 }
 0x9d5   :  { %14185 = vmatprep.mubr.f32.mxu0 %v16709_v63 }
 0x9d8   :  { %14186 = vmatmul.mubr.f32.gmra.mrb[30].mxu0 %v18410_v11 }
 0x9d9   :  { %14196 = vmatprep.mubr.f32.mxu0 %v18411_v8 }
 0x9dc   :  { %14197 = vmatmul.mubr.f32.vlgmr.msra.gmra.mrb[24].mxu0 %v18412_v45 }
 0x9dd   :  { %15375 = vmatpush3.bf16.msra.mxu0 %v17552_v62  ;;  %14199 = vmatprep.mubr.f32.mxu0 %v18413_v2 }
 0x9de   :  { %15377 = vmatprep.subr.bf16.mxu0 %v17568_v32 }
 0x9e0   :  { %14200 = vmatmul.mubr.f32.gmra.mrb[26].mxu0 %v18414_v33 }
 0x9e1   :  { %15379 = vmatpush3.bf16.msra.mxu0 %v17568_v32  ;;  %14202 = vmatprep.mubr.f32.mxu0 %v18415_v48 }
 0x9e2   :  { %15381 = vmatprep.subr.bf16.mxu0 %v15380_v18 }
 0x9e4   :  { %14203 = vmatmul.mubr.f32.gmra.mrb[28].mxu0 %v18416_v52 }
 0x9e5   :  { %14205 = vmatprep.mubr.f32.mxu0 %v18417_v39 }
 0x9e8   :  { %14206 = vmatmul.mubr.f32.gmra.mrb[30].mxu0 %v18418_v42 }
 0x9e9   :  { %14216 = vmatprep.mubr.f32.mxu0 %v18419_v20 }
 0x9ec   :  { %14217 = vmatmul.mubr.f32.vlgmr.msra.gmra.mrb[24].mxu0 %v18420_v6 }
 0x9ed   :  { %15383 = vmatpush3.bf16.msra.mxu0 %v15380_v18  ;;  %14219 = vmatprep.mubr.f32.mxu0 %v18421_v55 }
 0x9ee   :  { %15385 = vmatprep.subr.bf16.mxu0 %v15384_v5 }
 0x9f0   :  { %14220 = vmatmul.mubr.f32.gmra.mrb[26].mxu0 %v18422_v3 }
 0x9f1   :  { %15387 = vmatpush3.bf16.msra.mxu0 %v15384_v5  ;;  %14222 = vmatprep.mubr.f32.mxu0 %v18423_v10 }
 0x9f2   :  { %15389 = vmatprep.subr.bf16.mxu0 %v17552_v62 }
 0x9f4   :  { %14223 = vmatmul.mubr.f32.gmra.mrb[28].mxu0 %v18424_v24 }
 0x9f5   :  { %14225 = vmatprep.mubr.f32.mxu0 %v18425_v47 }
 0x9f8   :  { %14226 = vmatmul.mubr.f32.gmra.mrb[30].mxu0 %v18426_v40 }
 0x9f9   :  { %14236 = vmatprep.mubr.f32.mxu0 %v16600_v16 }
 0x9fc   :  { %14237 = vmatmul.mubr.f32.vlgmr.msra.gmra.mrb[24].mxu0 %v16602_v17 }
 0x9fd   :  { %15391 = vmatpush3.bf16.msra.mxu0 %v17552_v62  ;;  %14239 = vmatprep.mubr.f32.mxu0 %v16614_v21  ;;  %v18427_v62 = vld [vmem:[#allocation20_spill] sm:$0xff] }
 0x9fe   :  { %15393 = vmatprep.subr.bf16.mxu0 %v17568_v32 }
 0xa00   :  { %14240 = vmatmul.mubr.f32.gmra.mrb[26].mxu0 %v16625_v26 }
 0xa01   :  { %15395 = vmatpush3.bf16.msra.mxu0 %v17568_v32  ;;  %14242 = vmatprep.mubr.f32.mxu0 %v16627_v27  ;;  %v12261_v32 = vld [vmem:[%s18298_s0 + $0x208] sm:$0xff] }
 0xa04   :  { %14243 = vmatmul.mubr.f32.gmra.mrb[28].mxu0 %v16656_v37 }
 0xa05   :  { %14245 = vmatprep.mubr.f32.mxu0 %v16709_v63 }
 0xa08   :  { %14246 = vmatmul.mubr.f32.gmra.mrb[30].mxu0 %v18410_v11 }
 0xa09   :  { %14256 = vmatprep.mubr.f32.mxu0 %v16600_v16 }
 0xa0c   :  { %14257 = vmatmul.mubr.f32.vlgmr.msra.gmra.mrb[24].mxu0 %v16602_v17 }
 0xa0d   :  { %14259 = vmatprep.mubr.f32.mxu0 %v16614_v21 }
 0xa10   :  { %14260 = vmatmul.mubr.f32.gmra.mrb[26].mxu0 %v16625_v26 }
 0xa11   :  { %14262 = vmatprep.mubr.f32.mxu0 %v16627_v27 }
 0xa14   :  { %14263 = vmatmul.mubr.f32.gmra.mrb[28].mxu0 %v16656_v37 }
 0xa15   :  { %14265 = vmatprep.mubr.f32.mxu0 %v16709_v63 }
 0xa18   :  { %14266 = vmatmul.mubr.f32.gmra.mrb[30].mxu0 %v18410_v11 }
 0xa19   :  { %14480 = vmatprep.mubr.f32.mxu0 %v18427_v62 }
 0xadf   :  { %v14258_v35 = vpop.f32.mrb[24].mxu0 }
 0xae0   :  { %v6924_v61 = vadd.f32 %v14258_v35, %v12261_v32  ;;  %v6877_v0 = vpop.f32.mrb[25].mxu0 }
 0xae1   :  { %v6923_v49 = vadd.f32 %v12260_v34, %v6877_v0 }
 0xae2   :  { %v12277_v28 = vmul.f32 -1.442695, %v6924_v61 }
 0xae3   :  { %v12276_v53 = vmul.f32 -1.442695, %v6923_v49  ;;  %v14261_v18 = vpop.f32.mrb[26].mxu0 }
 0xae4   :  { %16372 = vpow2.f32 %v12277_v28  ;;  %v6926_v5 = vadd.f32 %v14261_v18, %v12263_v23  ;;  %v6889_v62 = vpop.f32.mrb[27].mxu0 }
 0xae5   :  { %16374 = vpow2.f32 %v12276_v53  ;;  %v6925_v40 = vadd.f32 %v12262_v59, %v6889_v62 }
 0xae6   :  { %v12279_v47 = vmul.f32 -1.442695, %v6926_v5 }
 0xae7   :  { %v12278_v32 = vmul.f32 -1.442695, %v6925_v40  ;;  %v17641_v35 = vpop.f32.mrb[28].mxu0 }
 0xae8   :  { %16376 = vpow2.f32 %v12279_v47  ;;  %v17643_v34 = vpop.f32.mrb[29].mxu0 }
 0xae9   :  { %16378 = vpow2.f32 %v12278_v32 }
 0xaeb   :  { %v17645_v61 = vpop.f32.mrb[30].mxu0 }
 0xaec   :  { %v17647_v0 = vpop.f32.mrb[31].mxu0 }
 0xaee   :  { %v16373_v24 = vpop.eup %16372 }
 0xaef   :  { %v16375_v49 = vpop.eup %16374  ;;  %v6940_v10 = vadd.f32 1.0, %v16373_v24 }
 0xaf0   :  { %v6939_v28 = vadd.f32 1.0, %v16375_v49 }
 0xaf1   :  { %16380 = vrcp.f32 %v6940_v10 }
 0xaf2   :  { %v16377_v23 = vpop.eup %16376  ;;  %16382 = vrcp.f32 %v6939_v28 }
 0xaf3   :  { %v16379_v62 = vpop.eup %16378  ;;  %v6942_v59 = vadd.f32 1.0, %v16377_v23 }
 0xaf4   :  { %v6941_v40 = vadd.f32 1.0, %v16379_v62 }
 0xaf5   :  { %16384 = vrcp.f32 %v6942_v59 }
 0xaf6   :  { %16386 = vrcp.f32 %v6941_v40 }
 0xafb   :  { %v16381_v47 = vpop.eup %16380 }
 0xafc   :  { %v16383_v53 = vpop.eup %16382  ;;  %v6980_v18 = vmul.f32 %v16381_v47, %v17528_v1 }
 0xafd   :  { %v6979_v5 = vmul.f32 %v16383_v53, %v17533_v25 }
 0xafe   :  { %v6987_v32 = vand.u32 4294901760, %v6980_v18 }
 0xaff   :  { %v16385_v3 = vpop.eup %16384  ;;  %v6984_v55 = vand.u32 4294901760, %v6979_v5 }
 0xb00   :  { %v16387_v6 = vpop.eup %16386  ;;  %v6982_v24 = vmul.f32 %v16385_v3, %v17547_v19  ;;  %v7101_v10 = vsub.f32 %v6980_v18, %v6987_v32 }
 0xb01   :  { %v6981_v49 = vmul.f32 %v16387_v6, %v17550_v46  ;;  %v15396_v28 = vpack.c.bf16 %v6987_v32, %v6984_v55  ;;  %v7094_v23 = vsub.f32 %v6979_v5, %v6984_v55 }
 0xb02   :  { %v6993_v62 = vand.u32 4294901760, %v6982_v24  ;;  %v7102_v59 = vand.u32 4294901760, %v7101_v10 }
 0xb03   :  { %v6990_v40 = vand.u32 4294901760, %v6981_v49  ;;  %15397 = vmatprep.subr.bf16.mxu1 %v15396_v28  ;;  %v7095_v20 = vand.u32 4294901760, %v7094_v23  ;;  %v15412_v42 = vpack.c.bf16 %v7101_v10, %v7094_v23 }
 0xb04   :  { %15399 = vmatpush3.bf16.msra.mxu1 %v15396_v28  ;;  %v7103_v47 = vsub.f32 %v7101_v10, %v7102_v59  ;;  %v7115_v53 = vsub.f32 %v6982_v24, %v6993_v62 }
 0xb05   :  { %v15400_v39 = vpack.c.bf16 %v6993_v62, %v6990_v40  ;;  %v7096_v52 = vsub.f32 %v7094_v23, %v7095_v20  ;;  %v7108_v48 = vsub.f32 %v6981_v49, %v6990_v40  ;;  %v15428_v3 = vpack.c.bf16 %v7102_v59, %v7095_v20 }
 0xb06   :  { %v7104_v33 = vand.u32 4294901760, %v7103_v47  ;;  %v7116_v2 = vand.u32 4294901760, %v7115_v53 }
 0xb07   :  { %15401 = vmatprep.subr.bf16.mxu1 %v15400_v39  ;;  %v7097_v18 = vand.u32 4294901760, %v7096_v52  ;;  %v7109_v6 = vand.u32 4294901760, %v7108_v48  ;;  %v15416_v32 = vpack.c.bf16 %v7115_v53, %v7108_v48 }
 0xb08   :  { %15403 = vmatpush3.bf16.msra.mxu1 %v15400_v39  ;;  %v7117_v55 = vsub.f32 %v7115_v53, %v7116_v2 }
 0xb09   :  { %v15404_v5 = vpack.c.bf16 %v7104_v33, %v7097_v18  ;;  %v7110_v45 = vsub.f32 %v7108_v48, %v7109_v6  ;;  %v15432_v8 = vpack.c.bf16 %v7116_v2, %v7109_v6  ;;  %v12266_v33 = vld [vmem:[%s18298_s0 + $0x230] sm:$0xff] }
 0xb0a   :  { %v7118_v11 = vand.u32 4294901760, %v7117_v55  ;;  %v12271_v55 = vld [vmem:[%s18298_s0 + $0x258] sm:$0xff] }
 0xb0b   :  { %14277 = vmatmul.mubr.f32.vlgmr.msra.gmra.mrb[24].mxu1 %v16889_v36  ;;  %15405 = vmatprep.subr.bf16.mxu1 %v15404_v5  ;;  %v7111_v24 = vand.u32 4294901760, %v7110_v45  ;;  %v12267_v45 = vld [vmem:[%s18298_s0 + $0x238] sm:$0xff] }
 0xb0c   :  { %15407 = vmatpush3.bf16.msra.mxu1 %v15404_v5  ;;  %14279 = vmatprep.mubr.f32.mxu1 %v16893_v7  ;;  %v6954_v52 = vadd.f32 %v17645_v61, %v12267_v45  ;;  %v12269_v61 = vld [vmem:[%s18298_s0 + $0x248] sm:$0xff]  ;;  %v12270_v5 = vld [vmem:[%s18298_s0 + $0x250] sm:$0xff] }
 0xb0d   :  { %v15408_v10 = vpack.c.bf16 %v7118_v11, %v7111_v24  ;;  %v12265_v11 = vld [vmem:[%s18298_s0 + $0x228] sm:$0xff] }
 0xb0e   :  { %v6952_v2 = vadd.f32 %v17641_v35, %v12265_v11  ;;  %v12283_v49 = vmul.f32 -1.442695, %v6954_v52 }
 0xb0f   :  { %14280 = vmatmul.mubr.f32.gmra.mrb[26].mxu1 %v16896_v43  ;;  %15409 = vmatprep.subr.bf16.mxu1 %v15408_v10 }
 0xb10   :  { %15411 = vmatpush3.bf16.msra.mxu1 %v15408_v10  ;;  %14290 = vmatprep.mubr.f32.mxu1 %v16807_v30 }
 0xb11   :  { %15413 = vmatprep.subr.bf16.mxu1 %v15412_v42 }
 0xb13   :  { %14291 = vmatmul.mubr.f32.vlgmr.msra.gmra.mrb[24].mxu1 %v16852_v13 }
 0xb14   :  { %15415 = vmatpush3.bf16.msra.mxu1 %v15412_v42  ;;  %14293 = vmatprep.mubr.f32.mxu1 %v16854_v9  ;;  %v12281_v42 = vmul.f32 -1.442695, %v6952_v2 }
 0xb15   :  { %15417 = vmatprep.subr.bf16.mxu1 %v15416_v32 }
 0xb16   :  { %16388 = vpow2.f32 %v12281_v42  ;;  %v12273_v42 = vld [vmem:[%s18298_s0 + $0x268] sm:$0xff] }
 0xb17   :  { %14294 = vmatmul.mubr.f32.gmra.mrb[26].mxu1 %v16860_v29 }
 0xb18   :  { %15419 = vmatpush3.bf16.msra.mxu1 %v15416_v32  ;;  %14304 = vmatprep.mubr.f32.mxu1 %v16810_v31 }
 0xb19   :  { %15421 = vmatprep.subr.bf16.mxu1 %v15396_v28 }
 0xb1b   :  { %14305 = vmatmul.mubr.f32.vlgmr.msra.gmra.mrb[24].mxu1 %v16858_v22 }
 0xb1c   :  { %15423 = vmatpush3.bf16.msra.mxu1 %v15396_v28  ;;  %14307 = vmatprep.mubr.f32.mxu1 %v16864_v15 }
 0xb1d   :  { %15425 = vmatprep.subr.bf16.mxu1 %v15400_v39 }
 0xb1f   :  { %14308 = vmatmul.mubr.f32.gmra.mrb[26].mxu1 %v16871_v60 }
 0xb20   :  { %15427 = vmatpush3.bf16.msra.mxu1 %v15400_v39  ;;  %14318 = vmatprep.mubr.f32.mxu1 %v16813_v38  ;;  %v16389_v23 = vpop.eup %16388 }
 0xb21   :  { %15429 = vmatprep.subr.bf16.mxu1 %v15428_v3  ;;  %v6968_v40 = vadd.f32 1.0, %v16389_v23  ;;  %v12272_v23 = vld [vmem:[%s18298_s0 + $0x260] sm:$0xff] }
 0xb23   :  { %14319 = vmatmul.mubr.f32.vlgmr.msra.gmra.mrb[24].mxu1 %v16868_v56 }
 0xb24   :  { %15431 = vmatpush3.bf16.msra.mxu1 %v15428_v3  ;;  %14321 = vmatprep.mubr.f32.mxu1 %v16875_v12 }
 0xb25   :  { %15433 = vmatprep.subr.bf16.mxu1 %v15432_v8 }
 0xb27   :  { %14322 = vmatmul.mubr.f32.gmra.mrb[26].mxu1 %v16884_v57 }
 0xb28   :  { %15435 = vmatpush3.bf16.msra.mxu1 %v15432_v8  ;;  %14332 = vmatprep.mubr.f32.mxu1 %v16807_v30  ;;  %v12264_v8 = vld [vmem:[%s18298_s0 + $0x220] sm:$0xff] }
 0xb29   :  { %15437 = vmatprep.subr.bf16.mxu1 %v15396_v28  ;;  %v6951_v48 = vadd.f32 %v12264_v8, %v17643_v34 }
 0xb2b   :  { %14333 = vmatmul.mubr.f32.vlgmr.msra.gmra.mrb[24].mxu1 %v16852_v13  ;;  %v12280_v20 = vmul.f32 -1.442695, %v6951_v48 }
 0xb2c   :  { %15439 = vmatpush3.bf16.msra.mxu1 %v15396_v28  ;;  %14335 = vmatprep.mubr.f32.mxu1 %v16854_v9 }
 0xb2d   :  { %15441 = vmatprep.subr.bf16.mxu1 %v15400_v39  ;;  %16390 = vpow2.f32 %v12280_v20 }
 0xb2e   :  { %16392 = vpow2.f32 %v12283_v49 }
 0xb2f   :  { %14336 = vmatmul.mubr.f32.gmra.mrb[26].mxu1 %v16860_v29 }
 0xb30   :  { %15443 = vmatpush3.bf16.msra.mxu1 %v15400_v39  ;;  %14346 = vmatprep.mubr.f32.mxu1 %v16807_v30  ;;  %v6953_v39 = vadd.f32 %v12266_v33, %v17647_v0  ;;  %v12268_v0 = vld [vmem:[%s18298_s0 + $0x240] sm:$0xff] }
 0xb32   :  { %v12282_v28 = vmul.f32 -1.442695, %v6953_v39 }
 0xb33   :  { %14347 = vmatmul.mubr.f32.vlgmr.msra.gmra.mrb[24].mxu1 %v16852_v13 }
 0xb34   :  { %14349 = vmatprep.mubr.f32.mxu1 %v16854_v9  ;;  %16394 = vpow2.f32 %v12282_v28 }
 0xb35   :  { %16396 = vrcp.f32 %v6968_v40 }
 0xb37   :  { %14350 = vmatmul.mubr.f32.gmra.mrb[26].mxu1 %v16860_v29  ;;  %v16391_v35 = vpop.eup %16390 }
 0xb38   :  { %14360 = vmatprep.mubr.f32.mxu1 %v16688_v50  ;;  %v16393_v62 = vpop.eup %16392  ;;  %v6967_v47 = vadd.f32 1.0, %v16391_v35 }
 0xb39   :  { %v6970_v53 = vadd.f32 1.0, %v16393_v62 }
 0xb3a   :  { %16398 = vrcp.f32 %v6967_v47 }
 0xb3b   :  { %16400 = vrcp.f32 %v6970_v53 }
 0xb3e   :  { %v16395_v59 = vpop.eup %16394 }
 0xb3f   :  { %v6969_v34 = vadd.f32 1.0, %v16395_v59  ;;  %v16397_v45 = vpop.eup %16396 }
 0xb40   :  { %v7610_v52 = vsub.f32 1.0, %v16397_v45  ;;  %v7606_v62 = vmul.f32 %v16397_v45, %v17528_v1 }
 0xb41   :  { %16402 = vrcp.f32 %v6969_v34 }
 0xb44   :  { %v16399_v2 = vpop.eup %16398 }
 0xb45   :  { %v16401_v33 = vpop.eup %16400  ;;  %v7609_v20 = vsub.f32 1.0, %v16399_v2  ;;  %v7605_v53 = vmul.f32 %v16399_v2, %v17533_v25 }
 0xb46   :  { %v7612_v40 = vsub.f32 1.0, %v16401_v33 }
 0xb4b   :  { %v16403_v48 = vpop.eup %16402 }
 0xc06   :  { %v14348_v3 = vpop.f32.mrb[24].mxu1 }
 0xc07   :  { %v7598_v18 = vadd.f32 %v14348_v3, %v12269_v61  ;;  %v7575_v6 = vpop.f32.mrb[25].mxu1  ;;  %v12275_v61 = vld [vmem:[%s18298_s0 + $0x278] sm:$0xff] }
 0xc08   :  { %v7597_v32 = vadd.f32 %v12268_v0, %v7575_v6  ;;  %v7611_v0 = vsub.f32 1.0, %v16403_v48 }
 0xc09   :  { %16404 = vtanh.f32 %v7598_v18 }
 0xc0a   :  { %16406 = vtanh.f32 %v7597_v32  ;;  %v14351_v24 = vpop.f32.mrb[26].mxu1  ;;  %v12274_v32 = vld [vmem:[%s18298_s0 + $0x270] sm:$0xff] }
 0xc0b   :  { %v7600_v10 = vadd.f32 %v14351_v24, %v12271_v55  ;;  %v7587_v11 = vpop.f32.mrb[27].mxu1 }
 0xc0c   :  { %v7599_v8 = vadd.f32 %v12270_v5, %v7587_v11  ;;  %v7608_v5 = vmul.f32 %v16401_v33, %v17547_v19 }
 0xc0d   :  { %16408 = vtanh.f32 %v7600_v10  ;;  %v7607_v10 = vmul.f32 %v16403_v48, %v17550_v46 }
 0xc0e   :  { %16410 = vtanh.f32 %v7599_v8 }
 0xc13   :  { %v16405_v39 = vpop.eup %16404 }
 0xc14   :  { %v16407_v49 = vpop.eup %16406  ;;  %v7614_v28 = vmul.f32 %v16405_v39, %v7610_v52 }
 0xc15   :  { %v7613_v35 = vmul.f32 %v16407_v49, %v7609_v20 }
 0xc16   :  { %v7618_v59 = vmul.f32 %v12273_v42, %v7614_v28 }
 0xc17   :  { %v16409_v47 = vpop.eup %16408  ;;  %v7617_v34 = vmul.f32 %v12272_v23, %v7613_v35 }
 0xc18   :  { %v16411_v3 = vpop.eup %16410  ;;  %v17716_v18 = vadd.f32 %v7618_v59, %v7606_v62  ;;  %v7616_v6 = vmul.f32 %v16409_v47, %v7612_v40 }
 0xc19   :  { %v17721_v1 = vadd.f32 %v7617_v34, %v7605_v53  ;;  %v7615_v55 = vmul.f32 %v16411_v3, %v7611_v0 }
 0xc1a   :  { %12285 = vst [vmem:[%s18299_s4 + $0x88] sm:$0xff] %v17716_v18  ;;  %v7620_v25 = vmul.f32 %v12275_v61, %v7616_v6  ;;  %v7651_v24 = vand.u32 4294901760, %v17716_v18 }
 0xc1b   :  { %12284 = vst [vmem:[%s18299_s4 + $0x80] sm:$0xff] %v17721_v1  ;;  %v7619_v11 = vmul.f32 %v12274_v32, %v7615_v55  ;;  %v7648_v8 = vand.u32 4294901760, %v17721_v1 }
 0xc1c   :  { %v17735_v45 = vadd.f32 %v7620_v25, %v7608_v5  ;;  %v7805_v19 = vsub.f32 %v17716_v18, %v7651_v24  ;;  %v18428_v5 = vld [vmem:[#allocation15_spill] sm:$0xff] }
 0xc1d   :  { %v17738_v2 = vadd.f32 %v7619_v11, %v7607_v10  ;;  %v17740_v33 = vpack.c.bf16 %v7651_v24, %v7648_v8  ;;  %v7798_v52 = vsub.f32 %v17721_v1, %v7648_v8  ;;  %v18429_v25 = vld [vmem:[#allocation3_spill] sm:$0xff]  ;;  %v18430_v24 = vld [vmem:[#allocation4_spill] sm:$0xff]  ;;  %v18431_v10 = vld [vmem:[#allocation5_spill] sm:$0xff] }
 0xc1e   :  { %12287 = vst [vmem:[%s18299_s4 + $0x98] sm:$0xff] %v17735_v45  ;;  %v7657_v46 = vand.u32 4294901760, %v17735_v45  ;;  %v7806_v48 = vand.u32 4294901760, %v7805_v19  ;;  %v18432_v11 = vld [vmem:[#allocation8_spill] sm:$0xff] }
 0xc1f   :  { %12286 = vst [vmem:[%s18299_s4 + $0x90] sm:$0xff] %v17738_v2  ;;  %15445 = vmatprep.subr.bf16.mxu1 %v17740_v33  ;;  %v7654_v39 = vand.u32 4294901760, %v17738_v2  ;;  %v7799_v42 = vand.u32 4294901760, %v7798_v52  ;;  %v15460_v32 = vpack.c.bf16 %v7805_v19, %v7798_v52 }
 0xc20   :  { %15447 = vmatpush3.bf16.msra.mxu1 %v17740_v33  ;;  %v7807_v20 = vsub.f32 %v7805_v19, %v7806_v48  ;;  %v7819_v49 = vsub.f32 %v17735_v45, %v7657_v46  ;;  %v18433_v19 = vld [vmem:[#allocation9_spill] sm:$0xff] }
 0xc21   :  { %v17756_v28 = vpack.c.bf16 %v7657_v46, %v7654_v39  ;;  %v7800_v23 = vsub.f32 %v7798_v52, %v7799_v42  ;;  %v7812_v35 = vsub.f32 %v17738_v2, %v7654_v39  ;;  %v15476_v8 = vpack.c.bf16 %v7806_v48, %v7799_v42  ;;  %v18434_v52 = vld [vmem:[#allocation13_spill] sm:$0xff]  ;;  %v18435_v46 = vld [vmem:[#allocation16_spill] sm:$0xff]  ;;  %v18440_v48 = vld [vmem:[#allocation11_spill] sm:$0xff] }
 0xc22   :  { %v7808_v62 = vand.u32 4294901760, %v7807_v20  ;;  %v7820_v59 = vand.u32 4294901760, %v7819_v49  ;;  %v18436_v39 = vld [vmem:[#allocation17_spill] sm:$0xff]  ;;  %v18437_v20 = vld [vmem:[#allocation6_spill] sm:$0xff]  ;;  %v18441_v42 = vld [vmem:[#allocation12_spill] sm:$0xff] }
 0xc23   :  { %15449 = vmatprep.subr.bf16.mxu1 %v17756_v28  ;;  %v7801_v40 = vand.u32 4294901760, %v7800_v23  ;;  %v7813_v47 = vand.u32 4294901760, %v7812_v35  ;;  %v15464_v55 = vpack.c.bf16 %v7819_v49, %v7812_v35 }
 0xc24   :  { %15451 = vmatpush3.bf16.msra.mxu1 %v17756_v28  ;;  %v7821_v53 = vsub.f32 %v7819_v49, %v7820_v59  ;;  %v18438_v49 = vld [vmem:[#allocation7_spill] sm:$0xff] }
 0xc25   :  { %v15452_v34 = vpack.c.bf16 %v7808_v62, %v7801_v40  ;;  %v7814_v61 = vsub.f32 %v7812_v35, %v7813_v47  ;;  %v15480_v23 = vpack.c.bf16 %v7820_v59, %v7813_v47  ;;  %v18439_v35 = vld [vmem:[#allocation10_spill] sm:$0xff]  ;;  %v12288_v59 = vld [vmem:[%s18298_s0 + $0x280] sm:$0xff] }
 0xc26   :  { %v7822_v0 = vand.u32 4294901760, %v7821_v53  ;;  %v18442_v62 = vld [vmem:[#allocation14_spill] sm:$0xff]  ;;  %v18444_v53 = vld [vmem:[#allocation19_spill] sm:$0xff] }
 0xc27   :  { %14361 = vmatmul.mubr.f32.vlgmr.msra.gmra.mrb[28].mxu1 %v16690_v51  ;;  %15453 = vmatprep.subr.bf16.mxu1 %v15452_v34  ;;  %v7815_v3 = vand.u32 4294901760, %v7814_v61  ;;  %v18443_v40 = vld [vmem:[#allocation18_spill] sm:$0xff] }
 0xc28   :  { %15455 = vmatpush3.bf16.msra.mxu1 %v15452_v34  ;;  %14363 = vmatprep.mubr.f32.mxu1 %v16696_v54 }
 0xc29   :  { %v15456_v6 = vpack.c.bf16 %v7822_v0, %v7815_v3  ;;  %v12291_v3 = vld [vmem:[%s18298_s0 + $0x298] sm:$0xff] }
 0xc2b   :  { %14364 = vmatmul.mubr.f32.gmra.mrb[30].mxu1 %v16702_v58  ;;  %15457 = vmatprep.subr.bf16.mxu1 %v15456_v6 }
 0xc2c   :  { %15459 = vmatpush3.bf16.msra.mxu1 %v15456_v6  ;;  %14366 = vmatprep.mubr.f32.mxu1 %v16714_v4 }
 0xc2d   :  { %15461 = vmatprep.subr.bf16.mxu1 %v15460_v32 }
 0xc2f   :  { %14367 = vmatmul.mubr.f32.gmra.mrb[32].mxu1 %v16729_v14 }
 0xc30   :  { %14369 = vmatprep.mubr.f32.mxu1 %v16743_v41 }
 0xc33   :  { %14370 = vmatmul.mubr.f32.gmra.mrb[34].mxu1 %v16745_v44 }
 0xc34   :  { %14380 = vmatprep.mubr.f32.mxu1 %v16600_v16 }
 0xc37   :  { %14381 = vmatmul.mubr.f32.vlgmr.msra.gmra.mrb[28].mxu1 %v16602_v17 }
 0xc38   :  { %15463 = vmatpush3.bf16.msra.mxu1 %v15460_v32  ;;  %14383 = vmatprep.mubr.f32.mxu1 %v16614_v21  ;;  %v12290_v32 = vld [vmem:[%s18298_s0 + $0x290] sm:$0xff] }
 0xc39   :  { %15465 = vmatprep.subr.bf16.mxu1 %v15464_v55 }
 0xc3b   :  { %14384 = vmatmul.mubr.f32.gmra.mrb[30].mxu1 %v16625_v26 }
 0xc3c   :  { %15467 = vmatpush3.bf16.msra.mxu1 %v15464_v55  ;;  %14386 = vmatprep.mubr.f32.mxu1 %v16627_v27 }
 0xc3d   :  { %15469 = vmatprep.subr.bf16.mxu1 %v17740_v33 }
 0xc3f   :  { %14387 = vmatmul.mubr.f32.gmra.mrb[32].mxu1 %v16656_v37 }
 0xc40   :  { %14389 = vmatprep.mubr.f32.mxu1 %v16709_v63 }
 0xc43   :  { %14390 = vmatmul.mubr.f32.gmra.mrb[34].mxu1 %v18428_v5 }
 0xc44   :  { %14400 = vmatprep.mubr.f32.mxu1 %v18429_v25 }
 0xc47   :  { %14401 = vmatmul.mubr.f32.vlgmr.msra.gmra.mrb[28].mxu1 %v18430_v24 }
 0xc48   :  { %15471 = vmatpush3.bf16.msra.mxu1 %v17740_v33  ;;  %14403 = vmatprep.mubr.f32.mxu1 %v18431_v10 }
 0xc49   :  { %15473 = vmatprep.subr.bf16.mxu1 %v17756_v28 }
 0xc4b   :  { %14404 = vmatmul.mubr.f32.gmra.mrb[30].mxu1 %v18432_v11 }
 0xc4c   :  { %15475 = vmatpush3.bf16.msra.mxu1 %v17756_v28  ;;  %14406 = vmatprep.mubr.f32.mxu1 %v18433_v19 }
 0xc4d   :  { %15477 = vmatprep.subr.bf16.mxu1 %v15476_v8 }
 0xc4f   :  { %14407 = vmatmul.mubr.f32.gmra.mrb[32].mxu1 %v18434_v52 }
 0xc50   :  { %14409 = vmatprep.mubr.f32.mxu1 %v18435_v46 }
 0xc53   :  { %14410 = vmatmul.mubr.f32.gmra.mrb[34].mxu1 %v18436_v39 }
 0xc54   :  { %14420 = vmatprep.mubr.f32.mxu1 %v18437_v20 }
 0xc57   :  { %14421 = vmatmul.mubr.f32.vlgmr.msra.gmra.mrb[28].mxu1 %v18438_v49 }
 0xc58   :  { %15479 = vmatpush3.bf16.msra.mxu1 %v15476_v8  ;;  %14423 = vmatprep.mubr.f32.mxu1 %v18439_v35 }
 0xc59   :  { %15481 = vmatprep.subr.bf16.mxu1 %v15480_v23 }
 0xc5b   :  { %14424 = vmatmul.mubr.f32.gmra.mrb[30].mxu1 %v18440_v48 }
 0xc5c   :  { %15483 = vmatpush3.bf16.msra.mxu1 %v15480_v23  ;;  %14426 = vmatprep.mubr.f32.mxu1 %v18441_v42 }
 0xc5d   :  { %15485 = vmatprep.subr.bf16.mxu1 %v17740_v33 }
 0xc5f   :  { %14427 = vmatmul.mubr.f32.gmra.mrb[32].mxu1 %v18442_v62 }
 0xc60   :  { %14429 = vmatprep.mubr.f32.mxu1 %v18443_v40 }
 0xc63   :  { %14430 = vmatmul.mubr.f32.gmra.mrb[34].mxu1 %v18444_v53 }
 0xc64   :  { %14440 = vmatprep.mubr.f32.mxu1 %v16600_v16 }
 0xc67   :  { %14441 = vmatmul.mubr.f32.vlgmr.msra.gmra.mrb[28].mxu1 %v16602_v17 }
 0xc68   :  { %15487 = vmatpush3.bf16.msra.mxu1 %v17740_v33  ;;  %14443 = vmatprep.mubr.f32.mxu1 %v16614_v21  ;;  %v18445_v33 = vld [vmem:[#allocation20_spill] sm:$0xff] }
 0xc69   :  { %15489 = vmatprep.subr.bf16.mxu1 %v17756_v28 }
 0xc6b   :  { %14444 = vmatmul.mubr.f32.gmra.mrb[30].mxu1 %v16625_v26 }
 0xc6c   :  { %15491 = vmatpush3.bf16.msra.mxu1 %v17756_v28  ;;  %14446 = vmatprep.mubr.f32.mxu1 %v16627_v27  ;;  %v12289_v28 = vld [vmem:[%s18298_s0 + $0x288] sm:$0xff] }
 0xc6f   :  { %14447 = vmatmul.mubr.f32.gmra.mrb[32].mxu1 %v16656_v37 }
 0xc70   :  { %14449 = vmatprep.mubr.f32.mxu1 %v16709_v63 }
 0xc73   :  { %14450 = vmatmul.mubr.f32.gmra.mrb[34].mxu1 %v18428_v5 }
 0xc74   :  { %14460 = vmatprep.mubr.f32.mxu1 %v16600_v16 }
 0xc77   :  { %14461 = vmatmul.mubr.f32.vlgmr.msra.gmra.mrb[28].mxu1 %v16602_v17 }
 0xc78   :  { %14463 = vmatprep.mubr.f32.mxu1 %v16614_v21 }
 0xc7b   :  { %14464 = vmatmul.mubr.f32.gmra.mrb[30].mxu1 %v16625_v26 }
 0xc7c   :  { %14466 = vmatprep.mubr.f32.mxu1 %v16627_v27 }
 0xc7f   :  { %14467 = vmatmul.mubr.f32.gmra.mrb[32].mxu1 %v16656_v37 }
 0xc80   :  { %14469 = vmatprep.mubr.f32.mxu1 %v16709_v63 }
 0xc83   :  { %14470 = vmatmul.mubr.f32.gmra.mrb[34].mxu1 %v18428_v5 }
 0xc84   :  { %14684 = vmatprep.mubr.f32.mxu1 %v18445_v33 }
 0xd4a   :  { %v14462_v47 = vpop.f32.mrb[28].mxu1 }
 0xd4b   :  { %v8434_v34 = vadd.f32 %v14462_v47, %v12289_v28  ;;  %v8387_v61 = vpop.f32.mrb[29].mxu1 }
 0xd4c   :  { %v8433_v0 = vadd.f32 %v12288_v59, %v8387_v61 }
 0xd4d   :  { %v12305_v6 = vmul.f32 -1.442695, %v8434_v34 }
 0xd4e   :  { %v12304_v55 = vmul.f32 -1.442695, %v8433_v0  ;;  %v14465_v8 = vpop.f32.mrb[30].mxu1 }
 0xd4f   :  { %16412 = vpow2.f32 %v12305_v6  ;;  %v8436_v23 = vadd.f32 %v14465_v8, %v12291_v3  ;;  %v8399_v33 = vpop.f32.mrb[31].mxu1 }
 0xd50   :  { %16414 = vpow2.f32 %v12304_v55  ;;  %v8435_v53 = vadd.f32 %v12290_v32, %v8399_v33 }
 0xd51   :  { %v12307_v40 = vmul.f32 -1.442695, %v8436_v23 }
 0xd52   :  { %v12306_v28 = vmul.f32 -1.442695, %v8435_v53  ;;  %v17829_v47 = vpop.f32.mrb[32].mxu1 }
 0xd53   :  { %16416 = vpow2.f32 %v12307_v40  ;;  %v17831_v59 = vpop.f32.mrb[33].mxu1 }
 0xd54   :  { %16418 = vpow2.f32 %v12306_v28 }
 0xd56   :  { %v17833_v34 = vpop.f32.mrb[34].mxu1 }
 0xd57   :  { %v17835_v61 = vpop.f32.mrb[35].mxu1 }
 0xd59   :  { %v16413_v62 = vpop.eup %16412 }
 0xd5a   :  { %v16415_v0 = vpop.eup %16414  ;;  %v8450_v42 = vadd.f32 1.0, %v16413_v62 }
 0xd5b   :  { %v8449_v6 = vadd.f32 1.0, %v16415_v0 }
 0xd5c   :  { %16420 = vrcp.f32 %v8450_v42 }
 0xd5d   :  { %v16417_v3 = vpop.eup %16416  ;;  %16422 = vrcp.f32 %v8449_v6 }
 0xd5e   :  { %v16419_v33 = vpop.eup %16418  ;;  %v8452_v32 = vadd.f32 1.0, %v16417_v3 }
 0xd5f   :  { %v8451_v53 = vadd.f32 1.0, %v16419_v33 }
 0xd60   :  { %16424 = vrcp.f32 %v8452_v32 }
 0xd61   :  { %16426 = vrcp.f32 %v8451_v53 }
 0xd66   :  { %v16421_v40 = vpop.eup %16420 }
 0xd67   :  { %v16423_v55 = vpop.eup %16422  ;;  %v8490_v8 = vmul.f32 %v16421_v40, %v17716_v18 }
 0xd68   :  { %v8489_v23 = vmul.f32 %v16423_v55, %v17721_v1 }
 0xd69   :  { %v8497_v28 = vand.u32 4294901760, %v8490_v8 }
 0xd6a   :  { %v16425_v48 = vpop.eup %16424  ;;  %v8494_v35 = vand.u32 4294901760, %v8489_v23 }
 0xd6b   :  { %v16427_v49 = vpop.eup %16426  ;;  %v8492_v62 = vmul.f32 %v16425_v48, %v17735_v45  ;;  %v8611_v42 = vsub.f32 %v8490_v8, %v8497_v28 }
 0xd6c   :  { %v8491_v0 = vmul.f32 %v16427_v49, %v17738_v2  ;;  %v15492_v6 = vpack.c.bf16 %v8497_v28, %v8494_v35  ;;  %v8604_v3 = vsub.f32 %v8489_v23, %v8494_v35 }
 0xd6d   :  { %v8503_v33 = vand.u32 4294901760, %v8492_v62  ;;  %v8612_v32 = vand.u32 4294901760, %v8611_v42 }
 0xd6e   :  { %v8500_v53 = vand.u32 4294901760, %v8491_v0  ;;  %15493 = vmatprep.subr.bf16.mxu0 %v15492_v6  ;;  %v8605_v20 = vand.u32 4294901760, %v8604_v3  ;;  %v15508_v39 = vpack.c.bf16 %v8611_v42, %v8604_v3 }
 0xd6f   :  { %15495 = vmatpush3.bf16.msra.mxu0 %v15492_v6  ;;  %v8613_v40 = vsub.f32 %v8611_v42, %v8612_v32  ;;  %v8625_v55 = vsub.f32 %v8492_v62, %v8503_v33 }
 0xd70   :  { %v15496_v46 = vpack.c.bf16 %v8503_v33, %v8500_v53  ;;  %v8606_v52 = vsub.f32 %v8604_v3, %v8605_v20  ;;  %v8618_v19 = vsub.f32 %v8491_v0, %v8500_v53  ;;  %v15524_v48 = vpack.c.bf16 %v8612_v32, %v8605_v20 }
 0xd71   :  { %v8614_v11 = vand.u32 4294901760, %v8613_v40  ;;  %v8626_v10 = vand.u32 4294901760, %v8625_v55 }
 0xd72   :  { %15497 = vmatprep.subr.bf16.mxu0 %v15496_v46  ;;  %v8607_v8 = vand.u32 4294901760, %v8606_v52  ;;  %v8619_v49 = vand.u32 4294901760, %v8618_v19  ;;  %v15512_v28 = vpack.c.bf16 %v8625_v55, %v8618_v19 }
 0xd73   :  { %15499 = vmatpush3.bf16.msra.mxu0 %v15496_v46  ;;  %v8627_v35 = vsub.f32 %v8625_v55, %v8626_v10 }
 0xd74   :  { %v15500_v23 = vpack.c.bf16 %v8614_v11, %v8607_v8  ;;  %v8620_v24 = vsub.f32 %v8618_v19, %v8619_v49  ;;  %v15528_v25 = vpack.c.bf16 %v8626_v10, %v8619_v49  ;;  %v12294_v11 = vld [vmem:[%s18298_s0 + $0x2b0] sm:$0xff] }
 0xd75   :  { %v8628_v5 = vand.u32 4294901760, %v8627_v35  ;;  %v12299_v35 = vld [vmem:[%s18298_s0 + $0x2d8] sm:$0xff] }
 0xd76   :  { %14481 = vmatmul.mubr.f32.vlgmr.msra.gmra.mrb[32].mxu0 %v16889_v36  ;;  %15501 = vmatprep.subr.bf16.mxu0 %v15500_v23  ;;  %v8621_v62 = vand.u32 4294901760, %v8620_v24  ;;  %v12295_v24 = vld [vmem:[%s18298_s0 + $0x2b8] sm:$0xff] }
 0xd77   :  { %15503 = vmatpush3.bf16.msra.mxu0 %v15500_v23  ;;  %14483 = vmatprep.mubr.f32.mxu0 %v16893_v7  ;;  %v8464_v52 = vadd.f32 %v17833_v34, %v12295_v24  ;;  %v12297_v34 = vld [vmem:[%s18298_s0 + $0x2c8] sm:$0xff]  ;;  %v12298_v23 = vld [vmem:[%s18298_s0 + $0x2d0] sm:$0xff] }
 0xd78   :  { %v15504_v42 = vpack.c.bf16 %v8628_v5, %v8621_v62  ;;  %v12293_v5 = vld [vmem:[%s18298_s0 + $0x2a8] sm:$0xff] }
 0xd79   :  { %v8462_v10 = vadd.f32 %v17829_v47, %v12293_v5  ;;  %v12311_v0 = vmul.f32 -1.442695, %v8464_v52 }
 0xd7a   :  { %14484 = vmatmul.mubr.f32.gmra.mrb[34].mxu0 %v16896_v43  ;;  %15505 = vmatprep.subr.bf16.mxu0 %v15504_v42 }
 0xd7b   :  { %15507 = vmatpush3.bf16.msra.mxu0 %v15504_v42  ;;  %14494 = vmatprep.mubr.f32.mxu0 %v16807_v30 }
 0xd7c   :  { %15509 = vmatprep.subr.bf16.mxu0 %v15508_v39 }
 0xd7e   :  { %14495 = vmatmul.mubr.f32.vlgmr.msra.gmra.mrb[32].mxu0 %v16852_v13 }
 0xd7f   :  { %15511 = vmatpush3.bf16.msra.mxu0 %v15508_v39  ;;  %14497 = vmatprep.mubr.f32.mxu0 %v16854_v9  ;;  %v12309_v39 = vmul.f32 -1.442695, %v8462_v10 }
 0xd80   :  { %15513 = vmatprep.subr.bf16.mxu0 %v15512_v28 }
 0xd81   :  { %16428 = vpow2.f32 %v12309_v39  ;;  %v12301_v39 = vld [vmem:[%s18298_s0 + $0x2e8] sm:$0xff] }
 0xd82   :  { %14498 = vmatmul.mubr.f32.gmra.mrb[34].mxu0 %v16860_v29 }
 0xd83   :  { %15515 = vmatpush3.bf16.msra.mxu0 %v15512_v28  ;;  %14508 = vmatprep.mubr.f32.mxu0 %v16810_v31 }
 0xd84   :  { %15517 = vmatprep.subr.bf16.mxu0 %v15492_v6 }
 0xd86   :  { %14509 = vmatmul.mubr.f32.vlgmr.msra.gmra.mrb[32].mxu0 %v16858_v22 }
 0xd87   :  { %15519 = vmatpush3.bf16.msra.mxu0 %v15492_v6  ;;  %14511 = vmatprep.mubr.f32.mxu0 %v16864_v15 }
 0xd88   :  { %15521 = vmatprep.subr.bf16.mxu0 %v15496_v46 }
 0xd8a   :  { %14512 = vmatmul.mubr.f32.gmra.mrb[34].mxu0 %v16871_v60 }
 0xd8b   :  { %15523 = vmatpush3.bf16.msra.mxu0 %v15496_v46  ;;  %14522 = vmatprep.mubr.f32.mxu0 %v16813_v38  ;;  %v16429_v3 = vpop.eup %16428 }
 0xd8c   :  { %15525 = vmatprep.subr.bf16.mxu0 %v15524_v48  ;;  %v8478_v53 = vadd.f32 1.0, %v16429_v3  ;;  %v12300_v3 = vld [vmem:[%s18298_s0 + $0x2e0] sm:$0xff] }
 0xd8e   :  { %14523 = vmatmul.mubr.f32.vlgmr.msra.gmra.mrb[32].mxu0 %v16868_v56 }
 0xd8f   :  { %15527 = vmatpush3.bf16.msra.mxu0 %v15524_v48  ;;  %14525 = vmatprep.mubr.f32.mxu0 %v16875_v12 }
 0xd90   :  { %15529 = vmatprep.subr.bf16.mxu0 %v15528_v25 }
 0xd92   :  { %14526 = vmatmul.mubr.f32.gmra.mrb[34].mxu0 %v16884_v57 }
 0xd93   :  { %15531 = vmatpush3.bf16.msra.mxu0 %v15528_v25  ;;  %14536 = vmatprep.mubr.f32.mxu0 %v16807_v30  ;;  %v12292_v25 = vld [vmem:[%s18298_s0 + $0x2a0] sm:$0xff] }
 0xd94   :  { %15533 = vmatprep.subr.bf16.mxu0 %v15492_v6  ;;  %v8461_v19 = vadd.f32 %v12292_v25, %v17831_v59 }
 0xd96   :  { %14537 = vmatmul.mubr.f32.vlgmr.msra.gmra.mrb[32].mxu0 %v16852_v13  ;;  %v12308_v20 = vmul.f32 -1.442695, %v8461_v19 }
 0xd97   :  { %15535 = vmatpush3.bf16.msra.mxu0 %v15492_v6  ;;  %14539 = vmatprep.mubr.f32.mxu0 %v16854_v9 }
 0xd98   :  { %15537 = vmatprep.subr.bf16.mxu0 %v15496_v46  ;;  %16430 = vpow2.f32 %v12308_v20 }
 0xd99   :  { %16432 = vpow2.f32 %v12311_v0 }
 0xd9a   :  { %14540 = vmatmul.mubr.f32.gmra.mrb[34].mxu0 %v16860_v29 }
 0xd9b   :  { %15539 = vmatpush3.bf16.msra.mxu0 %v15496_v46  ;;  %14550 = vmatprep.mubr.f32.mxu0 %v16807_v30  ;;  %v8463_v46 = vadd.f32 %v12294_v11, %v17835_v61  ;;  %v12296_v61 = vld [vmem:[%s18298_s0 + $0x2c0] sm:$0xff] }
 0xd9d   :  { %v12310_v6 = vmul.f32 -1.442695, %v8463_v46 }
 0xd9e   :  { %14551 = vmatmul.mubr.f32.vlgmr.msra.gmra.mrb[32].mxu0 %v16852_v13 }
 0xd9f   :  { %14553 = vmatprep.mubr.f32.mxu0 %v16854_v9  ;;  %16434 = vpow2.f32 %v12310_v6 }
 0xda0   :  { %16436 = vrcp.f32 %v8478_v53 }
 0xda2   :  { %14554 = vmatmul.mubr.f32.gmra.mrb[34].mxu0 %v16860_v29  ;;  %v16431_v47 = vpop.eup %16430 }
 0xda3   :  { %14564 = vmatprep.mubr.f32.mxu0 %v16688_v50  ;;  %v16433_v33 = vpop.eup %16432  ;;  %v8477_v40 = vadd.f32 1.0, %v16431_v47 }
 0xda4   :  { %v8480_v55 = vadd.f32 1.0, %v16433_v33 }
 0xda5   :  { %16438 = vrcp.f32 %v8477_v40 }
 0xda6   :  { %16440 = vrcp.f32 %v8480_v55 }
 0xda9   :  { %v16435_v32 = vpop.eup %16434 }
 0xdaa   :  { %v8479_v59 = vadd.f32 1.0, %v16435_v32  ;;  %v16437_v24 = vpop.eup %16436 }
 0xdab   :  { %v9120_v52 = vsub.f32 1.0, %v16437_v24  ;;  %v9116_v33 = vmul.f32 %v16437_v24, %v17716_v18 }
 0xdac   :  { %16442 = vrcp.f32 %v8479_v59 }
 0xdaf   :  { %v16439_v10 = vpop.eup %16438 }
 0xdb0   :  { %v16441_v11 = vpop.eup %16440  ;;  %v9119_v20 = vsub.f32 1.0, %v16439_v10  ;;  %v9115_v55 = vmul.f32 %v16439_v10, %v17721_v1 }
 0xdb1   :  { %v9122_v53 = vsub.f32 1.0, %v16441_v11 }
 0xdb6   :  { %v16443_v19 = vpop.eup %16442 }
 0xe71   :  { %v14552_v48 = vpop.f32.mrb[32].mxu0 }
 0xe72   :  { %v9108_v8 = vadd.f32 %v14552_v48, %v12297_v34  ;;  %v9085_v49 = vpop.f32.mrb[33].mxu0  ;;  %v12303_v34 = vld [vmem:[%s18298_s0 + $0x2f8] sm:$0xff] }
 0xe73   :  { %v9107_v28 = vadd.f32 %v12296_v61, %v9085_v49  ;;  %v9121_v61 = vsub.f32 1.0, %v16443_v19 }
 0xe74   :  { %16444 = vtanh.f32 %v9108_v8 }
 0xe75   :  { %16446 = vtanh.f32 %v9107_v28  ;;  %v14555_v62 = vpop.f32.mrb[34].mxu0  ;;  %v12302_v28 = vld [vmem:[%s18298_s0 + $0x2f0] sm:$0xff] }
 0xe76   :  { %v9110_v42 = vadd.f32 %v14555_v62, %v12299_v35  ;;  %v9097_v5 = vpop.f32.mrb[35].mxu0 }
 0xe77   :  { %v9109_v25 = vadd.f32 %v12298_v23, %v9097_v5  ;;  %v9118_v23 = vmul.f32 %v16441_v11, %v17735_v45 }
 0xe78   :  { %16448 = vtanh.f32 %v9110_v42  ;;  %v9117_v42 = vmul.f32 %v16443_v19, %v17738_v2 }
 0xe79   :  { %16450 = vtanh.f32 %v9109_v25 }
 0xe7e   :  { %v16445_v46 = vpop.eup %16444 }
 0xe7f   :  { %v16447_v0 = vpop.eup %16446  ;;  %v9124_v6 = vmul.f32 %v16445_v46, %v9120_v52 }
 0xe80   :  { %v9123_v47 = vmul.f32 %v16447_v0, %v9119_v20 }
 0xe81   :  { %v9128_v32 = vmul.f32 %v12301_v39, %v9124_v6 }
 0xe82   :  { %v16449_v40 = vpop.eup %16448  ;;  %v9127_v59 = vmul.f32 %v12300_v3, %v9123_v47 }
 0xe83   :  { %v16451_v48 = vpop.eup %16450  ;;  %v17904_v8 = vadd.f32 %v9128_v32, %v9116_v33  ;;  %v9126_v49 = vmul.f32 %v16449_v40, %v9122_v53 }
 0xe84   :  { %v17909_v18 = vadd.f32 %v9127_v59, %v9115_v55  ;;  %v9125_v35 = vmul.f32 %v16451_v48, %v9121_v61 }
 0xe85   :  { %12313 = vst [vmem:[%s18299_s4 + $0xa8] sm:$0xff] %v17904_v8  ;;  %v9130_v1 = vmul.f32 %v12303_v34, %v9126_v49  ;;  %v9161_v62 = vand.u32 4294901760, %v17904_v8 }
 0xe86   :  { %12312 = vst [vmem:[%s18299_s4 + $0xa0] sm:$0xff] %v17909_v18  ;;  %v9129_v5 = vmul.f32 %v12302_v28, %v9125_v35  ;;  %v9158_v25 = vand.u32 4294901760, %v17909_v18 }
 0xe87   :  { %v17923_v24 = vadd.f32 %v9130_v1, %v9118_v23  ;;  %v9315_v45 = vsub.f32 %v17904_v8, %v9161_v62  ;;  %v18446_v23 = vld [vmem:[#allocation15_spill] sm:$0xff] }
 0xe88   :  { %v17926_v10 = vadd.f32 %v9129_v5, %v9117_v42  ;;  %v17928_v11 = vpack.c.bf16 %v9161_v62, %v9158_v25  ;;  %v9308_v52 = vsub.f32 %v17909_v18, %v9158_v25  ;;  %v18447_v1 = vld [vmem:[#allocation3_spill] sm:$0xff]  ;;  %v18448_v62 = vld [vmem:[#allocation4_spill] sm:$0xff]  ;;  %v18449_v42 = vld [vmem:[#allocation5_spill] sm:$0xff] }
 0xe89   :  { %12315 = vst [vmem:[%s18299_s4 + $0xb8] sm:$0xff] %v17923_v24  ;;  %v9167_v2 = vand.u32 4294901760, %v17923_v24  ;;  %v9316_v19 = vand.u32 4294901760, %v9315_v45  ;;  %v18450_v5 = vld [vmem:[#allocation8_spill] sm:$0xff] }
 0xe8a   :  { %12314 = vst [vmem:[%s18299_s4 + $0xb0] sm:$0xff] %v17926_v10  ;;  %15541 = vmatprep.subr.bf16.mxu0 %v17928_v11  ;;  %v9164_v46 = vand.u32 4294901760, %v17926_v10  ;;  %v9309_v39 = vand.u32 4294901760, %v9308_v52  ;;  %v15556_v28 = vpack.c.bf16 %v9315_v45, %v9308_v52 }
 0xe8b   :  { %15543 = vmatpush3.bf16.msra.mxu0 %v17928_v11  ;;  %v9317_v20 = vsub.f32 %v9315_v45, %v9316_v19  ;;  %v9329_v0 = vsub.f32 %v17923_v24, %v9167_v2  ;;  %v18451_v45 = vld [vmem:[#allocation9_spill] sm:$0xff] }
 0xe8c   :  { %v17944_v6 = vpack.c.bf16 %v9167_v2, %v9164_v46  ;;  %v9310_v3 = vsub.f32 %v9308_v52, %v9309_v39  ;;  %v9322_v47 = vsub.f32 %v17926_v10, %v9164_v46  ;;  %v15572_v25 = vpack.c.bf16 %v9316_v19, %v9309_v39  ;;  %v18452_v52 = vld [vmem:[#allocation13_spill] sm:$0xff]  ;;  %v18453_v2 = vld [vmem:[#allocation16_spill] sm:$0xff]  ;;  %v18458_v19 = vld [vmem:[#allocation11_spill] sm:$0xff] }
 0xe8d   :  { %v9318_v33 = vand.u32 4294901760, %v9317_v20  ;;  %v9330_v32 = vand.u32 4294901760, %v9329_v0  ;;  %v18454_v46 = vld [vmem:[#allocation17_spill] sm:$0xff]  ;;  %v18455_v20 = vld [vmem:[#allocation6_spill] sm:$0xff]  ;;  %v18459_v39 = vld [vmem:[#allocation12_spill] sm:$0xff] }
 0xe8e   :  { %15545 = vmatprep.subr.bf16.mxu0 %v17944_v6  ;;  %v9311_v53 = vand.u32 4294901760, %v9310_v3  ;;  %v9323_v40 = vand.u32 4294901760, %v9322_v47  ;;  %v15560_v35 = vpack.c.bf16 %v9329_v0, %v9322_v47 }
 0xe8f   :  { %15547 = vmatpush3.bf16.msra.mxu0 %v17944_v6  ;;  %v9331_v55 = vsub.f32 %v9329_v0, %v9330_v32  ;;  %v18456_v0 = vld [vmem:[#allocation7_spill] sm:$0xff] }
 0xe90   :  { %v15548_v59 = vpack.c.bf16 %v9318_v33, %v9311_v53  ;;  %v9324_v34 = vsub.f32 %v9322_v47, %v9323_v40  ;;  %v15576_v3 = vpack.c.bf16 %v9330_v32, %v9323_v40  ;;  %v18457_v47 = vld [vmem:[#allocation10_spill] sm:$0xff]  ;;  %v12316_v32 = vld [vmem:[%s18298_s0 + $0x300] sm:$0xff] }
 0xe91   :  { %v9332_v61 = vand.u32 4294901760, %v9331_v55  ;;  %v18460_v33 = vld [vmem:[#allocation14_spill] sm:$0xff]  ;;  %v18462_v55 = vld [vmem:[#allocation19_spill] sm:$0xff] }
 0xe92   :  { %14565 = vmatmul.mubr.f32.vlgmr.msra.gmra.mrb[36].mxu0 %v16690_v51  ;;  %15549 = vmatprep.subr.bf16.mxu0 %v15548_v59  ;;  %v9325_v48 = vand.u32 4294901760, %v9324_v34  ;;  %v18461_v53 = vld [vmem:[#allocation18_spill] sm:$0xff] }
 0xe93   :  { %15551 = vmatpush3.bf16.msra.mxu0 %v15548_v59  ;;  %14567 = vmatprep.mubr.f32.mxu0 %v16696_v54 }
 0xe94   :  { %v15552_v49 = vpack.c.bf16 %v9332_v61, %v9325_v48  ;;  %v12319_v48 = vld [vmem:[%s18298_s0 + $0x318] sm:$0xff] }
 0xe96   :  { %14568 = vmatmul.mubr.f32.gmra.mrb[38].mxu0 %v16702_v58  ;;  %15553 = vmatprep.subr.bf16.mxu0 %v15552_v49 }
 0xe97   :  { %15555 = vmatpush3.bf16.msra.mxu0 %v15552_v49  ;;  %14570 = vmatprep.mubr.f32.mxu0 %v16714_v4 }
 0xe98   :  { %15557 = vmatprep.subr.bf16.mxu0 %v15556_v28 }
 0xe9a   :  { %14571 = vmatmul.mubr.f32.gmra.mrb[40].mxu0 %v16729_v14 }
 0xe9b   :  { %14573 = vmatprep.mubr.f32.mxu0 %v16743_v41 }
 0xe9e   :  { %14574 = vmatmul.mubr.f32.gmra.mrb[42].mxu0 %v16745_v44 }
 0xe9f   :  { %14584 = vmatprep.mubr.f32.mxu0 %v16600_v16 }
 0xea2   :  { %14585 = vmatmul.mubr.f32.vlgmr.msra.gmra.mrb[36].mxu0 %v16602_v17 }
 0xea3   :  { %15559 = vmatpush3.bf16.msra.mxu0 %v15556_v28  ;;  %14587 = vmatprep.mubr.f32.mxu0 %v16614_v21  ;;  %v12318_v28 = vld [vmem:[%s18298_s0 + $0x310] sm:$0xff] }
 0xea4   :  { %15561 = vmatprep.subr.bf16.mxu0 %v15560_v35 }
 0xea6   :  { %14588 = vmatmul.mubr.f32.gmra.mrb[38].mxu0 %v16625_v26 }
 0xea7   :  { %15563 = vmatpush3.bf16.msra.mxu0 %v15560_v35  ;;  %14590 = vmatprep.mubr.f32.mxu0 %v16627_v27 }
 0xea8   :  { %15565 = vmatprep.subr.bf16.mxu0 %v17928_v11 }
 0xeaa   :  { %14591 = vmatmul.mubr.f32.gmra.mrb[40].mxu0 %v16656_v37 }
 0xeab   :  { %14593 = vmatprep.mubr.f32.mxu0 %v16709_v63 }
 0xeae   :  { %14594 = vmatmul.mubr.f32.gmra.mrb[42].mxu0 %v18446_v23 }
 0xeaf   :  { %14604 = vmatprep.mubr.f32.mxu0 %v18447_v1 }
 0xeb2   :  { %14605 = vmatmul.mubr.f32.vlgmr.msra.gmra.mrb[36].mxu0 %v18448_v62 }
 0xeb3   :  { %15567 = vmatpush3.bf16.msra.mxu0 %v17928_v11  ;;  %14607 = vmatprep.mubr.f32.mxu0 %v18449_v42 }
 0xeb4   :  { %15569 = vmatprep.subr.bf16.mxu0 %v17944_v6 }
 0xeb6   :  { %14608 = vmatmul.mubr.f32.gmra.mrb[38].mxu0 %v18450_v5 }
 0xeb7   :  { %15571 = vmatpush3.bf16.msra.mxu0 %v17944_v6  ;;  %14610 = vmatprep.mubr.f32.mxu0 %v18451_v45 }
 0xeb8   :  { %15573 = vmatprep.subr.bf16.mxu0 %v15572_v25 }
 0xeba   :  { %14611 = vmatmul.mubr.f32.gmra.mrb[40].mxu0 %v18452_v52 }
 0xebb   :  { %14613 = vmatprep.mubr.f32.mxu0 %v18453_v2 }
 0xebe   :  { %14614 = vmatmul.mubr.f32.gmra.mrb[42].mxu0 %v18454_v46 }
 0xebf   :  { %14624 = vmatprep.mubr.f32.mxu0 %v18455_v20 }
 0xec2   :  { %14625 = vmatmul.mubr.f32.vlgmr.msra.gmra.mrb[36].mxu0 %v18456_v0 }
 0xec3   :  { %15575 = vmatpush3.bf16.msra.mxu0 %v15572_v25  ;;  %14627 = vmatprep.mubr.f32.mxu0 %v18457_v47 }
 0xec4   :  { %15577 = vmatprep.subr.bf16.mxu0 %v15576_v3 }
 0xec6   :  { %14628 = vmatmul.mubr.f32.gmra.mrb[38].mxu0 %v18458_v19 }
 0xec7   :  { %15579 = vmatpush3.bf16.msra.mxu0 %v15576_v3  ;;  %14630 = vmatprep.mubr.f32.mxu0 %v18459_v39 }
 0xec8   :  { %15581 = vmatprep.subr.bf16.mxu0 %v17928_v11 }
 0xeca   :  { %14631 = vmatmul.mubr.f32.gmra.mrb[40].mxu0 %v18460_v33 }
 0xecb   :  { %14633 = vmatprep.mubr.f32.mxu0 %v18461_v53 }
 0xece   :  { %14634 = vmatmul.mubr.f32.gmra.mrb[42].mxu0 %v18462_v55 }
 0xecf   :  { %14644 = vmatprep.mubr.f32.mxu0 %v16600_v16 }
 0xed2   :  { %14645 = vmatmul.mubr.f32.vlgmr.msra.gmra.mrb[36].mxu0 %v16602_v17 }
 0xed3   :  { %15583 = vmatpush3.bf16.msra.mxu0 %v17928_v11  ;;  %14647 = vmatprep.mubr.f32.mxu0 %v16614_v21  ;;  %v18463_v11 = vld [vmem:[#allocation20_spill] sm:$0xff] }
 0xed4   :  { %15585 = vmatprep.subr.bf16.mxu0 %v17944_v6 }
 0xed6   :  { %14648 = vmatmul.mubr.f32.gmra.mrb[38].mxu0 %v16625_v26 }
 0xed7   :  { %15587 = vmatpush3.bf16.msra.mxu0 %v17944_v6  ;;  %14650 = vmatprep.mubr.f32.mxu0 %v16627_v27  ;;  %v12317_v6 = vld [vmem:[%s18298_s0 + $0x308] sm:$0xff] }
 0xeda   :  { %14651 = vmatmul.mubr.f32.gmra.mrb[40].mxu0 %v16656_v37 }
 0xedb   :  { %14653 = vmatprep.mubr.f32.mxu0 %v16709_v63 }
 0xede   :  { %14654 = vmatmul.mubr.f32.gmra.mrb[42].mxu0 %v18446_v23 }
 0xedf   :  { %14664 = vmatprep.mubr.f32.mxu0 %v16600_v16 }
 0xee2   :  { %14665 = vmatmul.mubr.f32.vlgmr.msra.gmra.mrb[36].mxu0 %v16602_v17 }
 0xee3   :  { %14667 = vmatprep.mubr.f32.mxu0 %v16614_v21 }
 0xee6   :  { %14668 = vmatmul.mubr.f32.gmra.mrb[38].mxu0 %v16625_v26 }
 0xee7   :  { %14670 = vmatprep.mubr.f32.mxu0 %v16627_v27 }
 0xeea   :  { %14671 = vmatmul.mubr.f32.gmra.mrb[40].mxu0 %v16656_v37 }
 0xeeb   :  { %14673 = vmatprep.mubr.f32.mxu0 %v16709_v63 }
 0xeee   :  { %14674 = vmatmul.mubr.f32.gmra.mrb[42].mxu0 %v18446_v23 }
 0xeef   :  { %14888 = vmatprep.mubr.f32.mxu0 %v18463_v11 }
 0xfb5   :  { %v14666_v40 = vpop.f32.mrb[36].mxu0 }
 0xfb6   :  { %v9944_v59 = vadd.f32 %v14666_v40, %v12317_v6  ;;  %v9897_v34 = vpop.f32.mrb[37].mxu0 }
 0xfb7   :  { %v9943_v61 = vadd.f32 %v12316_v32, %v9897_v34 }
 0xfb8   :  { %v12333_v49 = vmul.f32 -1.442695, %v9944_v59 }
 0xfb9   :  { %v12332_v35 = vmul.f32 -1.442695, %v9943_v61  ;;  %v14669_v25 = vpop.f32.mrb[38].mxu0 }
 0xfba   :  { %16452 = vpow2.f32 %v12333_v49  ;;  %v9946_v3 = vadd.f32 %v14669_v25, %v12319_v48  ;;  %v9909_v11 = vpop.f32.mrb[39].mxu0 }
 0xfbb   :  { %16454 = vpow2.f32 %v12332_v35  ;;  %v9945_v55 = vadd.f32 %v12318_v28, %v9909_v11 }
 0xfbc   :  { %v12335_v53 = vmul.f32 -1.442695, %v9946_v3 }
 0xfbd   :  { %v12334_v6 = vmul.f32 -1.442695, %v9945_v55  ;;  %v18017_v40 = vpop.f32.mrb[40].mxu0 }
 0xfbe   :  { %16456 = vpow2.f32 %v12335_v53  ;;  %v18019_v32 = vpop.f32.mrb[41].mxu0 }
 0xfbf   :  { %16458 = vpow2.f32 %v12334_v6 }
 0xfc1   :  { %v18021_v59 = vpop.f32.mrb[42].mxu0 }
 0xfc2   :  { %v18023_v34 = vpop.f32.mrb[43].mxu0 }
 0xfc4   :  { %v16453_v33 = vpop.eup %16452 }
 0xfc5   :  { %v16455_v61 = vpop.eup %16454  ;;  %v9960_v39 = vadd.f32 1.0, %v16453_v33 }
 0xfc6   :  { %v9959_v49 = vadd.f32 1.0, %v16455_v61 }
 0xfc7   :  { %16460 = vrcp.f32 %v9960_v39 }
 0xfc8   :  { %v16457_v48 = vpop.eup %16456  ;;  %16462 = vrcp.f32 %v9959_v49 }
 0xfc9   :  { %v16459_v28 = vpop.eup %16458  ;;  %v9962_v35 = vadd.f32 1.0, %v16457_v48 }
 0xfca   :  { %v9961_v55 = vadd.f32 1.0, %v16459_v28 }
 0xfcb   :  { %16464 = vrcp.f32 %v9962_v35 }
 0xfcc   :  { %16466 = vrcp.f32 %v9961_v55 }
 0xfd1   :  { %v16461_v53 = vpop.eup %16460 }
 0xfd2   :  { %v16463_v25 = vpop.eup %16462  ;;  %v10000_v3 = vmul.f32 %v16461_v53, %v17904_v8 }
 0xfd3   :  { %v9999_v11 = vmul.f32 %v16463_v25, %v17909_v18 }
 0xfd4   :  { %v10007_v6 = vand.u32 4294901760, %v10000_v3 }
 0xfd5   :  { %v16465_v19 = vpop.eup %16464  ;;  %v10004_v47 = vand.u32 4294901760, %v9999_v11 }
 0xfd6   :  { %v16467_v0 = vpop.eup %16466  ;;  %v10002_v33 = vmul.f32 %v16465_v19, %v17923_v24  ;;  %v10121_v39 = vsub.f32 %v10000_v3, %v10007_v6 }
 0xfd7   :  { %v10001_v61 = vmul.f32 %v16467_v0, %v17926_v10  ;;  %v15588_v49 = vpack.c.bf16 %v10007_v6, %v10004_v47  ;;  %v10114_v48 = vsub.f32 %v9999_v11, %v10004_v47 }
 0xfd8   :  { %v10013_v28 = vand.u32 4294901760, %v10002_v33  ;;  %v10122_v35 = vand.u32 4294901760, %v10121_v39 }
 0xfd9   :  { %v10010_v55 = vand.u32 4294901760, %v10001_v61  ;;  %15589 = vmatprep.subr.bf16.mxu1 %v15588_v49  ;;  %v10115_v20 = vand.u32 4294901760, %v10114_v48  ;;  %v15604_v46 = vpack.c.bf16 %v10121_v39, %v10114_v48 }
 0xfda   :  { %15591 = vmatpush3.bf16.msra.mxu1 %v15588_v49  ;;  %v10123_v53 = vsub.f32 %v10121_v39, %v10122_v35  ;;  %v10135_v25 = vsub.f32 %v10002_v33, %v10013_v28 }
 0xfdb   :  { %v15592_v2 = vpack.c.bf16 %v10013_v28, %v10010_v55  ;;  %v10116_v52 = vsub.f32 %v10114_v48, %v10115_v20  ;;  %v10128_v45 = vsub.f32 %v10001_v61, %v10010_v55  ;;  %v15620_v19 = vpack.c.bf16 %v10122_v35, %v10115_v20 }
 0xfdc   :  { %v10124_v5 = vand.u32 4294901760, %v10123_v53  ;;  %v10136_v42 = vand.u32 4294901760, %v10135_v25 }
 0xfdd   :  { %15593 = vmatprep.subr.bf16.mxu1 %v15592_v2  ;;  %v10117_v3 = vand.u32 4294901760, %v10116_v52  ;;  %v10129_v0 = vand.u32 4294901760, %v10128_v45  ;;  %v15608_v6 = vpack.c.bf16 %v10135_v25, %v10128_v45 }
 0xfde   :  { %15595 = vmatpush3.bf16.msra.mxu1 %v15592_v2  ;;  %v10137_v47 = vsub.f32 %v10135_v25, %v10136_v42 }
 0xfdf   :  { %v15596_v11 = vpack.c.bf16 %v10124_v5, %v10117_v3  ;;  %v10130_v62 = vsub.f32 %v10128_v45, %v10129_v0  ;;  %v15624_v1 = vpack.c.bf16 %v10136_v42, %v10129_v0  ;;  %v12322_v5 = vld [vmem:[%s18298_s0 + $0x330] sm:$0xff] }
 0xfe0   :  { %v10138_v23 = vand.u32 4294901760, %v10137_v47  ;;  %v9973_v52 = vadd.f32 %v12322_v5, %v18023_v34  ;;  %v12324_v34 = vld [vmem:[%s18298_s0 + $0x340] sm:$0xff]  ;;  %v12326_v47 = vld [vmem:[%s18298_s0 + $0x350] sm:$0xff] }
 0xfe1   :  { %14685 = vmatmul.mubr.f32.vlgmr.msra.gmra.mrb[36].mxu1 %v16889_v36  ;;  %15597 = vmatprep.subr.bf16.mxu1 %v15596_v11  ;;  %v10131_v33 = vand.u32 4294901760, %v10130_v62  ;;  %v12323_v62 = vld [vmem:[%s18298_s0 + $0x338] sm:$0xff] }
 0xfe2   :  { %15599 = vmatpush3.bf16.msra.mxu1 %v15596_v11  ;;  %14687 = vmatprep.mubr.f32.mxu1 %v16893_v7  ;;  %v9974_v45 = vadd.f32 %v18021_v59, %v12323_v62  ;;  %v12338_v61 = vmul.f32 -1.442695, %v9973_v52  ;;  %v12325_v59 = vld [vmem:[%s18298_s0 + $0x348] sm:$0xff] }
 0xfe3   :  { %v15600_v39 = vpack.c.bf16 %v10138_v23, %v10131_v33  ;;  %v12321_v23 = vld [vmem:[%s18298_s0 + $0x328] sm:$0xff] }
 0xfe4   :  { %v9972_v42 = vadd.f32 %v18017_v40, %v12321_v23  ;;  %v12339_v20 = vmul.f32 -1.442695, %v9974_v45  ;;  %v12329_v52 = vld [vmem:[%s18298_s0 + $0x368] sm:$0xff] }
 0xfe5   :  { %14688 = vmatmul.mubr.f32.gmra.mrb[38].mxu1 %v16896_v43  ;;  %15601 = vmatprep.subr.bf16.mxu1 %v15600_v39 }
 0xfe6   :  { %15603 = vmatpush3.bf16.msra.mxu1 %v15600_v39  ;;  %14698 = vmatprep.mubr.f32.mxu1 %v16807_v30 }
 0xfe7   :  { %15605 = vmatprep.subr.bf16.mxu1 %v15604_v46 }
 0xfe9   :  { %14699 = vmatmul.mubr.f32.vlgmr.msra.gmra.mrb[36].mxu1 %v16852_v13 }
 0xfea   :  { %15607 = vmatpush3.bf16.msra.mxu1 %v15604_v46  ;;  %14701 = vmatprep.mubr.f32.mxu1 %v16854_v9 }
 0xfeb   :  { %15609 = vmatprep.subr.bf16.mxu1 %v15608_v6 }
 0xfed   :  { %14702 = vmatmul.mubr.f32.gmra.mrb[38].mxu1 %v16860_v29 }
 0xfee   :  { %15611 = vmatpush3.bf16.msra.mxu1 %v15608_v6  ;;  %14712 = vmatprep.mubr.f32.mxu1 %v16810_v31  ;;  %v12327_v6 = vld [vmem:[%s18298_s0 + $0x358] sm:$0xff] }
 0xfef   :  { %15613 = vmatprep.subr.bf16.mxu1 %v15588_v49 }
 0xff1   :  { %14713 = vmatmul.mubr.f32.vlgmr.msra.gmra.mrb[36].mxu1 %v16858_v22 }
 0xff2   :  { %15615 = vmatpush3.bf16.msra.mxu1 %v15588_v49  ;;  %14715 = vmatprep.mubr.f32.mxu1 %v16864_v15 }
 0xff3   :  { %15617 = vmatprep.subr.bf16.mxu1 %v15592_v2 }
 0xff5   :  { %14716 = vmatmul.mubr.f32.gmra.mrb[38].mxu1 %v16871_v60 }
 0xff6   :  { %15619 = vmatpush3.bf16.msra.mxu1 %v15592_v2  ;;  %14726 = vmatprep.mubr.f32.mxu1 %v16813_v38 }
 0xff7   :  { %15621 = vmatprep.subr.bf16.mxu1 %v15620_v19 }
 0xff9   :  { %14727 = vmatmul.mubr.f32.vlgmr.msra.gmra.mrb[36].mxu1 %v16868_v56 }
 0xffa   :  { %15623 = vmatpush3.bf16.msra.mxu1 %v15620_v19  ;;  %14729 = vmatprep.mubr.f32.mxu1 %v16875_v12 }
 0xffb   :  { %15625 = vmatprep.subr.bf16.mxu1 %v15624_v1 }
 0xffd   :  { %14730 = vmatmul.mubr.f32.gmra.mrb[38].mxu1 %v16884_v57 }
 0xffe   :  { %15627 = vmatpush3.bf16.msra.mxu1 %v15624_v1  ;;  %14740 = vmatprep.mubr.f32.mxu1 %v16807_v30  ;;  %v12320_v1 = vld [vmem:[%s18298_s0 + $0x320] sm:$0xff] }
 0xfff   :  { %15629 = vmatprep.subr.bf16.mxu1 %v15588_v49 }
0x1001   :  { %14741 = vmatmul.mubr.f32.vlgmr.msra.gmra.mrb[36].mxu1 %v16852_v13 }
0x1002   :  { %15631 = vmatpush3.bf16.msra.mxu1 %v15588_v49  ;;  %14743 = vmatprep.mubr.f32.mxu1 %v16854_v9 }
0x1003   :  { %15633 = vmatprep.subr.bf16.mxu1 %v15592_v2 }
0x1005   :  { %14744 = vmatmul.mubr.f32.gmra.mrb[38].mxu1 %v16860_v29 }
0x1006   :  { %15635 = vmatpush3.bf16.msra.mxu1 %v15592_v2  ;;  %14754 = vmatprep.mubr.f32.mxu1 %v16807_v30  ;;  %v12337_v2 = vmul.f32 -1.442695, %v9972_v42 }
0x1008   :  { %16468 = vpow2.f32 %v12337_v2 }
0x1009   :  { %14755 = vmatmul.mubr.f32.vlgmr.msra.gmra.mrb[36].mxu1 %v16852_v13 }
0x100a   :  { %14757 = vmatprep.mubr.f32.mxu1 %v16854_v9 }
0x100d   :  { %14758 = vmatmul.mubr.f32.gmra.mrb[38].mxu1 %v16860_v29 }
0x100e   :  { %14768 = vmatprep.mubr.f32.mxu1 %v16688_v50  ;;  %v9971_v50 = vadd.f32 %v12320_v1, %v18019_v32 }
0x1010   :  { %v12336_v46 = vmul.f32 -1.442695, %v9971_v50 }
0x1012   :  { %16470 = vpow2.f32 %v12336_v46  ;;  %v16469_v49 = vpop.eup %16468 }
0x1013   :  { %16472 = vpow2.f32 %v12339_v20  ;;  %v9988_v35 = vadd.f32 1.0, %v16469_v49 }
0x1014   :  { %16474 = vpow2.f32 %v12338_v61  ;;  %v12328_v61 = vld [vmem:[%s18298_s0 + $0x360] sm:$0xff] }
0x1015   :  { %16476 = vrcp.f32 %v9988_v35 }
0x101c   :  { %v16471_v40 = vpop.eup %16470 }
0x101d   :  { %v16473_v48 = vpop.eup %16472  ;;  %v9987_v55 = vadd.f32 1.0, %v16471_v40 }
0x101e   :  { %v16475_v28 = vpop.eup %16474  ;;  %v9990_v53 = vadd.f32 1.0, %v16473_v48 }
0x101f   :  { %v9989_v32 = vadd.f32 1.0, %v16475_v28  ;;  %16478 = vrcp.f32 %v9987_v55  ;;  %v16477_v1 = vpop.eup %16476 }
0x1020   :  { %16480 = vrcp.f32 %v9990_v53  ;;  %v10630_v50 = vsub.f32 1.0, %v16477_v1  ;;  %v10626_v40 = vmul.f32 %v16477_v1, %v17904_v8 }
0x1021   :  { %16482 = vrcp.f32 %v9989_v32  ;;  %v12331_v32 = vld [vmem:[%s18298_s0 + $0x378] sm:$0xff] }
0x1029   :  { %v16479_v62 = vpop.eup %16478 }
0x102a   :  { %v16481_v42 = vpop.eup %16480  ;;  %v10629_v2 = vsub.f32 1.0, %v16479_v62  ;;  %v10625_v55 = vmul.f32 %v16479_v62, %v17909_v18 }
0x102b   :  { %v16483_v5 = vpop.eup %16482  ;;  %v10632_v28 = vsub.f32 1.0, %v16481_v42 }
0x10dc   :  { %v14756_v25 = vpop.f32.mrb[36].mxu1 }
0x10dd   :  { %v10618_v19 = vadd.f32 %v14756_v25, %v12325_v59  ;;  %v10595_v3 = vpop.f32.mrb[37].mxu1  ;;  %v10631_v59 = vsub.f32 1.0, %v16483_v5 }
0x10de   :  { %v10617_v0 = vadd.f32 %v12324_v34, %v10595_v3  ;;  %v12330_v3 = vld [vmem:[%s18298_s0 + $0x370] sm:$0xff] }
0x10df   :  { %16484 = vtanh.f32 %v10618_v19 }
0x10e0   :  { %16486 = vtanh.f32 %v10617_v0  ;;  %v14759_v11 = vpop.f32.mrb[38].mxu1 }
0x10e1   :  { %v10620_v33 = vadd.f32 %v14759_v11, %v12327_v6  ;;  %v10607_v39 = vpop.f32.mrb[39].mxu1  ;;  %v10628_v6 = vmul.f32 %v16481_v42, %v17923_v24  ;;  %v10627_v11 = vmul.f32 %v16483_v5, %v17926_v10 }
0x10e2   :  { %v10619_v23 = vadd.f32 %v12326_v47, %v10607_v39 }
0x10e3   :  { %16488 = vtanh.f32 %v10620_v33 }
0x10e4   :  { %16490 = vtanh.f32 %v10619_v23 }
0x10e9   :  { %v16485_v45 = vpop.eup %16484 }
0x10ea   :  { %v16487_v46 = vpop.eup %16486  ;;  %v10634_v20 = vmul.f32 %v16485_v45, %v10630_v50 }
0x10eb   :  { %v10633_v49 = vmul.f32 %v16487_v46, %v10629_v2 }
0x10ec   :  { %v10638_v48 = vmul.f32 %v12329_v52, %v10634_v20 }
0x10ed   :  { %v16489_v35 = vpop.eup %16488  ;;  %v10637_v53 = vmul.f32 %v12328_v61, %v10633_v49 }
0x10ee   :  { %v16491_v34 = vpop.eup %16490  ;;  %v18092_v25 = vadd.f32 %v10638_v48, %v10626_v40  ;;  %v10636_v19 = vmul.f32 %v16489_v35, %v10632_v28 }
0x10ef   :  { %v18097_v8 = vadd.f32 %v10637_v53, %v10625_v55  ;;  %v10635_v0 = vmul.f32 %v16491_v34, %v10631_v59 }
0x10f0   :  { %12341 = vst [vmem:[%s18299_s4 + $0xc8] sm:$0xff] %v18092_v25  ;;  %v10640_v18 = vmul.f32 %v12331_v32, %v10636_v19  ;;  %v10671_v47 = vand.u32 4294901760, %v18092_v25 }
0x10f1   :  { %12340 = vst [vmem:[%s18299_s4 + $0xc0] sm:$0xff] %v18097_v8  ;;  %v10639_v33 = vmul.f32 %v12330_v3, %v10635_v0  ;;  %v10668_v39 = vand.u32 4294901760, %v18097_v8  ;;  %v18469_v3 = vld [vmem:[#allocation9_spill] sm:$0xff] }
0x10f2   :  { %v18111_v23 = vadd.f32 %v10640_v18, %v10628_v6  ;;  %v10825_v24 = vsub.f32 %v18092_v25, %v10671_v47  ;;  %v18470_v0 = vld [vmem:[#allocation13_spill] sm:$0xff]  ;;  %v18471_v6 = vld [vmem:[#allocation16_spill] sm:$0xff] }
0x10f3   :  { %v18114_v1 = vadd.f32 %v10639_v33, %v10627_v11  ;;  %v18116_v62 = vpack.c.bf16 %v10671_v47, %v10668_v39  ;;  %v10818_v42 = vsub.f32 %v18097_v8, %v10668_v39  ;;  %v18472_v18 = vld [vmem:[#allocation17_spill] sm:$0xff]  ;;  %v18473_v47 = vld [vmem:[#allocation6_spill] sm:$0xff]  ;;  %v18474_v11 = vld [vmem:[#allocation7_spill] sm:$0xff] }
0x10f4   :  { %12343 = vst [vmem:[%s18299_s4 + $0xd8] sm:$0xff] %v18111_v23  ;;  %v10677_v10 = vand.u32 4294901760, %v18111_v23  ;;  %v10826_v5 = vand.u32 4294901760, %v10825_v24  ;;  %v18475_v39 = vld [vmem:[#allocation10_spill] sm:$0xff] }
0x10f5   :  { %12342 = vst [vmem:[%s18299_s4 + $0xd0] sm:$0xff] %v18114_v1  ;;  %15637 = vmatprep.subr.bf16.mxu1 %v18116_v62  ;;  %v10674_v50 = vand.u32 4294901760, %v18114_v1  ;;  %v10819_v45 = vand.u32 4294901760, %v10818_v42  ;;  %v15652_v19 = vpack.c.bf16 %v10825_v24, %v10818_v42 }
0x10f6   :  { %15639 = vmatpush3.bf16.msra.mxu1 %v18116_v62  ;;  %v10827_v52 = vsub.f32 %v10825_v24, %v10826_v5  ;;  %v10839_v2 = vsub.f32 %v18111_v23, %v10677_v10  ;;  %v18476_v24 = vld [vmem:[#allocation11_spill] sm:$0xff] }
0x10f7   :  { %v18132_v46 = vpack.c.bf16 %v10677_v10, %v10674_v50  ;;  %v10820_v20 = vsub.f32 %v10818_v42, %v10819_v45  ;;  %v10832_v61 = vsub.f32 %v18114_v1, %v10674_v50  ;;  %v18477_v42 = vld [vmem:[#allocation12_spill] sm:$0xff]  ;;  %v18478_v10 = vld [vmem:[#allocation14_spill] sm:$0xff]  ;;  %v18480_v50 = vld [vmem:[#allocation19_spill] sm:$0xff] }
0x10f8   :  { %v10828_v49 = vand.u32 4294901760, %v10827_v52  ;;  %v10840_v40 = vand.u32 4294901760, %v10839_v2 }
0x10f9   :  { %15641 = vmatprep.subr.bf16.mxu1 %v18132_v46  ;;  %v10821_v48 = vand.u32 4294901760, %v10820_v20  ;;  %v10833_v28 = vand.u32 4294901760, %v10832_v61 }
0x10fa   :  { %15643 = vmatpush3.bf16.msra.mxu1 %v18132_v46  ;;  %v10841_v35 = vsub.f32 %v10839_v2, %v10840_v40 }
0x10fb   :  { %v15644_v55 = vpack.c.bf16 %v10828_v49, %v10821_v48  ;;  %v10834_v53 = vsub.f32 %v10832_v61, %v10833_v28  ;;  %v15672_v33 = vpack.c.bf16 %v10840_v40, %v10833_v28 }
0x10fc   :  { %v10842_v32 = vand.u32 4294901760, %v10841_v35 }
0x10fd   :  { %14769 = vmatmul.mubr.f32.vlgmr.msra.gmra.mrb[40].mxu1 %v16690_v51  ;;  %15645 = vmatprep.subr.bf16.mxu1 %v15644_v55  ;;  %v10835_v59 = vand.u32 4294901760, %v10834_v53  ;;  %v15656_v51 = vpack.c.bf16 %v10839_v2, %v10832_v61 }
0x10fe   :  { %15647 = vmatpush3.bf16.msra.mxu1 %v15644_v55  ;;  %14771 = vmatprep.mubr.f32.mxu1 %v16696_v54  ;;  %v18464_v54 = vld [vmem:[#allocation15_spill] sm:$0xff] }
0x10ff   :  { %v15648_v34 = vpack.c.bf16 %v10842_v32, %v10835_v59 }
0x1101   :  { %14772 = vmatmul.mubr.f32.gmra.mrb[42].mxu1 %v16702_v58  ;;  %15649 = vmatprep.subr.bf16.mxu1 %v15648_v34  ;;  %v18465_v58 = vld [vmem:[#allocation3_spill] sm:$0xff] }
0x1102   :  { %15651 = vmatpush3.bf16.msra.mxu1 %v15648_v34  ;;  %14774 = vmatprep.mubr.f32.mxu1 %v16714_v4  ;;  %v18466_v4 = vld [vmem:[#allocation4_spill] sm:$0xff] }
0x1103   :  { %15653 = vmatprep.subr.bf16.mxu1 %v15652_v19 }
0x1105   :  { %14775 = vmatmul.mubr.f32.gmra.mrb[44].mxu1 %v16729_v14  ;;  %v18467_v14 = vld [vmem:[#allocation5_spill] sm:$0xff] }
0x1106   :  { %14777 = vmatprep.mubr.f32.mxu1 %v16743_v41  ;;  %v18468_v41 = vld [vmem:[#allocation8_spill] sm:$0xff] }
0x1109   :  { %14778 = vmatmul.mubr.f32.gmra.mrb[46].mxu1 %v16745_v44  ;;  %v15668_v44 = vpack.c.bf16 %v10826_v5, %v10819_v45  ;;  %v18479_v5 = vld [vmem:[#allocation18_spill] sm:$0xff] }
0x110a   :  { %14788 = vmatprep.mubr.f32.mxu1 %v16600_v16 }
0x110d   :  { %14789 = vmatmul.mubr.f32.vlgmr.msra.gmra.mrb[40].mxu1 %v16602_v17 }
0x110e   :  { %15655 = vmatpush3.bf16.msra.mxu1 %v15652_v19  ;;  %14791 = vmatprep.mubr.f32.mxu1 %v16614_v21 }
0x110f   :  { %15657 = vmatprep.subr.bf16.mxu1 %v15656_v51 }
0x1111   :  { %14792 = vmatmul.mubr.f32.gmra.mrb[42].mxu1 %v16625_v26 }
0x1112   :  { %15659 = vmatpush3.bf16.msra.mxu1 %v15656_v51  ;;  %14794 = vmatprep.mubr.f32.mxu1 %v16627_v27 }
0x1113   :  { %15661 = vmatprep.subr.bf16.mxu1 %v18116_v62 }
0x1115   :  { %14795 = vmatmul.mubr.f32.gmra.mrb[44].mxu1 %v16656_v37 }
0x1116   :  { %14797 = vmatprep.mubr.f32.mxu1 %v16709_v63 }
0x1119   :  { %14798 = vmatmul.mubr.f32.gmra.mrb[46].mxu1 %v18464_v54 }
0x111a   :  { %14808 = vmatprep.mubr.f32.mxu1 %v18465_v58 }
0x111d   :  { %14809 = vmatmul.mubr.f32.vlgmr.msra.gmra.mrb[40].mxu1 %v18466_v4 }
0x111e   :  { %15663 = vmatpush3.bf16.msra.mxu1 %v18116_v62  ;;  %14811 = vmatprep.mubr.f32.mxu1 %v18467_v14 }
0x111f   :  { %15665 = vmatprep.subr.bf16.mxu1 %v18132_v46 }
0x1121   :  { %14812 = vmatmul.mubr.f32.gmra.mrb[42].mxu1 %v18468_v41 }
0x1122   :  { %15667 = vmatpush3.bf16.msra.mxu1 %v18132_v46  ;;  %14814 = vmatprep.mubr.f32.mxu1 %v18469_v3 }
0x1123   :  { %15669 = vmatprep.subr.bf16.mxu1 %v15668_v44 }
0x1125   :  { %14815 = vmatmul.mubr.f32.gmra.mrb[44].mxu1 %v18470_v0 }
0x1126   :  { %14817 = vmatprep.mubr.f32.mxu1 %v18471_v6 }
0x1129   :  { %14818 = vmatmul.mubr.f32.gmra.mrb[46].mxu1 %v18472_v18 }
0x112a   :  { %14828 = vmatprep.mubr.f32.mxu1 %v18473_v47 }
0x112d   :  { %14829 = vmatmul.mubr.f32.vlgmr.msra.gmra.mrb[40].mxu1 %v18474_v11 }
0x112e   :  { %15671 = vmatpush3.bf16.msra.mxu1 %v15668_v44  ;;  %14831 = vmatprep.mubr.f32.mxu1 %v18475_v39 }
0x112f   :  { %15673 = vmatprep.subr.bf16.mxu1 %v15672_v33 }
0x1131   :  { %14832 = vmatmul.mubr.f32.gmra.mrb[42].mxu1 %v18476_v24 }
0x1132   :  { %15675 = vmatpush3.bf16.msra.mxu1 %v15672_v33  ;;  %14834 = vmatprep.mubr.f32.mxu1 %v18477_v42 }
0x1133   :  { %15677 = vmatprep.subr.bf16.mxu1 %v18116_v62 }
0x1135   :  { %14835 = vmatmul.mubr.f32.gmra.mrb[44].mxu1 %v18478_v10 }
0x1136   :  { %14837 = vmatprep.mubr.f32.mxu1 %v18479_v5 }
0x1139   :  { %14838 = vmatmul.mubr.f32.gmra.mrb[46].mxu1 %v18480_v50 }
0x113a   :  { %14848 = vmatprep.mubr.f32.mxu1 %v16600_v16 }
0x113d   :  { %14849 = vmatmul.mubr.f32.vlgmr.msra.gmra.mrb[40].mxu1 %v16602_v17 }
0x113e   :  { %15679 = vmatpush3.bf16.msra.mxu1 %v18116_v62  ;;  %14851 = vmatprep.mubr.f32.mxu1 %v16614_v21  ;;  %v12345_v62 = vld [vmem:[%s18298_s0 + $0x388] sm:$0xff] }
0x113f   :  { %15681 = vmatprep.subr.bf16.mxu1 %v18132_v46 }
0x1141   :  { %14852 = vmatmul.mubr.f32.gmra.mrb[42].mxu1 %v16625_v26 }
0x1142   :  { %15683 = vmatpush3.bf16.msra.mxu1 %v18132_v46  ;;  %14854 = vmatprep.mubr.f32.mxu1 %v16627_v27 }
0x1145   :  { %14855 = vmatmul.mubr.f32.gmra.mrb[44].mxu1 %v16656_v37 }
0x1146   :  { %14857 = vmatprep.mubr.f32.mxu1 %v16709_v63 }
0x1149   :  { %14858 = vmatmul.mubr.f32.gmra.mrb[46].mxu1 %v18464_v54 }
0x114a   :  { %14868 = vmatprep.mubr.f32.mxu1 %v16600_v16  ;;  %v12344_v16 = vld [vmem:[%s18298_s0 + $0x380] sm:$0xff] }
0x114d   :  { %14869 = vmatmul.mubr.f32.vlgmr.msra.gmra.mrb[40].mxu1 %v16602_v17 }
0x114e   :  { %14871 = vmatprep.mubr.f32.mxu1 %v16614_v21 }
0x1151   :  { %14872 = vmatmul.mubr.f32.gmra.mrb[42].mxu1 %v16625_v26 }
0x1152   :  { %14874 = vmatprep.mubr.f32.mxu1 %v16627_v27  ;;  %v12347_v27 = vld [vmem:[%s18298_s0 + $0x398] sm:$0xff] }
0x1155   :  { %14875 = vmatmul.mubr.f32.gmra.mrb[44].mxu1 %v16656_v37 }
0x1156   :  { %14877 = vmatprep.mubr.f32.mxu1 %v16709_v63  ;;  %v12346_v63 = vld [vmem:[%s18298_s0 + $0x390] sm:$0xff] }
0x1159   :  { %14878 = vmatmul.mubr.f32.gmra.mrb[46].mxu1 %v18464_v54 }
0x1220   :  { %v14870_v17 = vpop.f32.mrb[40].mxu1 }
0x1221   :  { %v11454_v21 = vadd.f32 %v14870_v17, %v12345_v62  ;;  %v11407_v45 = vpop.f32.mrb[41].mxu1 }
0x1222   :  { %v11453_v26 = vadd.f32 %v12344_v16, %v11407_v45 }
0x1223   :  { %v12361_v37 = vmul.f32 -1.442695, %v11454_v21 }
0x1224   :  { %v12360_v52 = vmul.f32 -1.442695, %v11453_v26  ;;  %v14873_v2 = vpop.f32.mrb[42].mxu1 }
0x1225   :  { %16492 = vpow2.f32 %v12361_v37  ;;  %v11456_v46 = vadd.f32 %v14873_v2, %v12347_v27  ;;  %v11419_v20 = vpop.f32.mrb[43].mxu1 }
0x1226   :  { %16494 = vpow2.f32 %v12360_v52  ;;  %v11455_v61 = vadd.f32 %v12346_v63, %v11419_v20 }
0x1227   :  { %v12363_v49 = vmul.f32 -1.442695, %v11456_v46 }
0x1228   :  { %v12362_v40 = vmul.f32 -1.442695, %v11455_v61  ;;  %v18204_v48 = vpop.f32.mrb[44].mxu1 }
0x1229   :  { %16496 = vpow2.f32 %v12363_v49  ;;  %v18206_v28 = vpop.f32.mrb[45].mxu1 }
0x122a   :  { %16498 = vpow2.f32 %v12362_v40 }
0x122c   :  { %v18208_v35 = vpop.f32.mrb[46].mxu1 }
0x122d   :  { %v18210_v55 = vpop.f32.mrb[47].mxu1 }
0x122f   :  { %v16493_v53 = vpop.eup %16492 }
0x1230   :  { %v16495_v32 = vpop.eup %16494  ;;  %v11470_v59 = vadd.f32 1.0, %v16493_v53 }
0x1231   :  { %v11469_v34 = vadd.f32 1.0, %v16495_v32 }
0x1232   :  { %16500 = vrcp.f32 %v11470_v59 }
0x1233   :  { %v16497_v19 = vpop.eup %16496  ;;  %16502 = vrcp.f32 %v11469_v34 }
0x1234   :  { %v16499_v51 = vpop.eup %16498  ;;  %v11472_v54 = vadd.f32 1.0, %v16497_v19 }
0x1235   :  { %v11471_v58 = vadd.f32 1.0, %v16499_v51 }
0x1236   :  { %16504 = vrcp.f32 %v11472_v54 }
0x1237   :  { %16506 = vrcp.f32 %v11471_v58 }
0x123c   :  { %v16501_v4 = vpop.eup %16500 }
0x123d   :  { %v16503_v14 = vpop.eup %16502  ;;  %v11510_v41 = vmul.f32 %v16501_v4, %v18092_v25 }
0x123e   :  { %v11509_v44 = vmul.f32 %v16503_v14, %v18097_v8 }
0x123f   :  { %v11517_v3 = vand.u32 4294901760, %v11510_v41 }
0x1240   :  { %v16505_v0 = vpop.eup %16504  ;;  %v11514_v6 = vand.u32 4294901760, %v11509_v44 }
0x1241   :  { %v16507_v18 = vpop.eup %16506  ;;  %v11512_v47 = vmul.f32 %v16505_v0, %v18111_v23  ;;  %v11631_v11 = vsub.f32 %v11510_v41, %v11517_v3  ;;  %v12355_v41 = vld [vmem:[%s18298_s0 + $0x3d8] sm:$0xff] }
0x1242   :  { %v11511_v33 = vmul.f32 %v16507_v18, %v18114_v1  ;;  %v15684_v39 = vpack.c.bf16 %v11517_v3, %v11514_v6  ;;  %v11624_v24 = vsub.f32 %v11509_v44, %v11514_v6  ;;  %v12354_v44 = vld [vmem:[%s18298_s0 + $0x3d0] sm:$0xff] }
0x1243   :  { %v11523_v42 = vand.u32 4294901760, %v11512_v47  ;;  %v11632_v10 = vand.u32 4294901760, %v11631_v11 }
0x1244   :  { %v11520_v5 = vand.u32 4294901760, %v11511_v33  ;;  %15685 = vmatprep.subr.bf16.mxu0 %v15684_v39  ;;  %v11625_v50 = vand.u32 4294901760, %v11624_v24  ;;  %v15700_v62 = vpack.c.bf16 %v11631_v11, %v11624_v24 }
0x1245   :  { %15687 = vmatpush3.bf16.msra.mxu0 %v15684_v39  ;;  %v11633_v16 = vsub.f32 %v11631_v11, %v11632_v10  ;;  %v11645_v17 = vsub.f32 %v11512_v47, %v11523_v42 }
0x1246   :  { %v15688_v21 = vpack.c.bf16 %v11523_v42, %v11520_v5  ;;  %v11626_v45 = vsub.f32 %v11624_v24, %v11625_v50  ;;  %v11638_v26 = vsub.f32 %v11511_v33, %v11520_v5  ;;  %v15716_v63 = vpack.c.bf16 %v11632_v10, %v11625_v50  ;;  %v12357_v10 = vld [vmem:[%s18298_s0 + $0x3e8] sm:$0xff] }
0x1247   :  { %v11634_v27 = vand.u32 4294901760, %v11633_v16  ;;  %v11646_v37 = vand.u32 4294901760, %v11645_v17  ;;  %v12356_v16 = vld [vmem:[%s18298_s0 + $0x3e0] sm:$0xff] }
0x1248   :  { %15689 = vmatprep.subr.bf16.mxu0 %v15688_v21  ;;  %v11627_v52 = vand.u32 4294901760, %v11626_v45  ;;  %v11639_v2 = vand.u32 4294901760, %v11638_v26  ;;  %v15704_v46 = vpack.c.bf16 %v11645_v17, %v11638_v26 }
0x1249   :  { %15691 = vmatpush3.bf16.msra.mxu0 %v15688_v21  ;;  %v11647_v20 = vsub.f32 %v11645_v17, %v11646_v37 }
0x124a   :  { %v15692_v61 = vpack.c.bf16 %v11634_v27, %v11627_v52  ;;  %v11640_v49 = vsub.f32 %v11638_v26, %v11639_v2  ;;  %v15720_v40 = vpack.c.bf16 %v11646_v37, %v11639_v2  ;;  %v12359_v52 = vld [vmem:[%s18298_s0 + $0x3f8] sm:$0xff] }
0x124b   :  { %v11648_v53 = vand.u32 4294901760, %v11647_v20 }
0x124c   :  { %14889 = vmatmul.mubr.f32.vlgmr.msra.gmra.mrb[44].mxu0 %v16889_v36  ;;  %15693 = vmatprep.subr.bf16.mxu0 %v15692_v61  ;;  %v11641_v32 = vand.u32 4294901760, %v11640_v49  ;;  %v12349_v36 = vld [vmem:[%s18298_s0 + $0x3a8] sm:$0xff]  ;;  %v12358_v49 = vld [vmem:[%s18298_s0 + $0x3f0] sm:$0xff] }
0x124d   :  { %15695 = vmatpush3.bf16.msra.mxu0 %v15692_v61  ;;  %14891 = vmatprep.mubr.f32.mxu0 %v16893_v7 }
0x124e   :  { %v15696_v59 = vpack.c.bf16 %v11648_v53, %v11641_v32 }
0x1250   :  { %14892 = vmatmul.mubr.f32.gmra.mrb[46].mxu0 %v16896_v43  ;;  %15697 = vmatprep.subr.bf16.mxu0 %v15696_v59 }
0x1251   :  { %15699 = vmatpush3.bf16.msra.mxu0 %v15696_v59  ;;  %14902 = vmatprep.mubr.f32.mxu0 %v16807_v30 }
0x1252   :  { %15701 = vmatprep.subr.bf16.mxu0 %v15700_v62 }
0x1254   :  { %14903 = vmatmul.mubr.f32.vlgmr.msra.gmra.mrb[44].mxu0 %v16852_v13 }
0x1255   :  { %15703 = vmatpush3.bf16.msra.mxu0 %v15700_v62  ;;  %14905 = vmatprep.mubr.f32.mxu0 %v16854_v9 }
0x1256   :  { %15705 = vmatprep.subr.bf16.mxu0 %v15704_v46 }
0x1258   :  { %14906 = vmatmul.mubr.f32.gmra.mrb[46].mxu0 %v16860_v29 }
0x1259   :  { %15707 = vmatpush3.bf16.msra.mxu0 %v15704_v46  ;;  %14916 = vmatprep.mubr.f32.mxu0 %v16810_v31  ;;  %v12348_v31 = vld [vmem:[%s18298_s0 + $0x3a0] sm:$0xff] }
0x125a   :  { %15709 = vmatprep.subr.bf16.mxu0 %v15684_v39 }
0x125c   :  { %14917 = vmatmul.mubr.f32.vlgmr.msra.gmra.mrb[44].mxu0 %v16858_v22 }
0x125d   :  { %15711 = vmatpush3.bf16.msra.mxu0 %v15684_v39  ;;  %14919 = vmatprep.mubr.f32.mxu0 %v16864_v15 }
0x125e   :  { %15713 = vmatprep.subr.bf16.mxu0 %v15688_v21 }
0x1260   :  { %14920 = vmatmul.mubr.f32.gmra.mrb[46].mxu0 %v16871_v60 }
0x1261   :  { %15715 = vmatpush3.bf16.msra.mxu0 %v15688_v21  ;;  %14930 = vmatprep.mubr.f32.mxu0 %v16813_v38  ;;  %v12351_v38 = vld [vmem:[%s18298_s0 + $0x3b8] sm:$0xff] }
0x1262   :  { %15717 = vmatprep.subr.bf16.mxu0 %v15716_v63  ;;  %v11484_v22 = vadd.f32 %v18208_v35, %v12351_v38  ;;  %v12353_v35 = vld [vmem:[%s18298_s0 + $0x3c8] sm:$0xff] }
0x1264   :  { %14931 = vmatmul.mubr.f32.vlgmr.msra.gmra.mrb[44].mxu0 %v16868_v56  ;;  %v12367_v60 = vmul.f32 -1.442695, %v11484_v22 }
0x1265   :  { %15719 = vmatpush3.bf16.msra.mxu0 %v15716_v63  ;;  %14933 = vmatprep.mubr.f32.mxu0 %v16875_v12 }
0x1266   :  { %15721 = vmatprep.subr.bf16.mxu0 %v15720_v40 }
0x1268   :  { %14934 = vmatmul.mubr.f32.gmra.mrb[46].mxu0 %v16884_v57 }
0x1269   :  { %15723 = vmatpush3.bf16.msra.mxu0 %v15720_v40  ;;  %14944 = vmatprep.mubr.f32.mxu0 %v16807_v30 }
0x126a   :  { %15725 = vmatprep.subr.bf16.mxu0 %v15684_v39 }
0x126c   :  { %14945 = vmatmul.mubr.f32.vlgmr.msra.gmra.mrb[44].mxu0 %v16852_v13 }
0x126d   :  { %15727 = vmatpush3.bf16.msra.mxu0 %v15684_v39  ;;  %14947 = vmatprep.mubr.f32.mxu0 %v16854_v9 }
0x126e   :  { %15729 = vmatprep.subr.bf16.mxu0 %v15688_v21 }
0x1270   :  { %14948 = vmatmul.mubr.f32.gmra.mrb[46].mxu0 %v16860_v29 }
0x1271   :  { %15731 = vmatpush3.bf16.msra.mxu0 %v15688_v21  ;;  %14958 = vmatprep.mubr.f32.mxu0 %v16807_v30  ;;  %v11482_v30 = vadd.f32 %v18204_v48, %v12349_v36 }
0x1273   :  { %v12365_v15 = vmul.f32 -1.442695, %v11482_v30 }
0x1274   :  { %14959 = vmatmul.mubr.f32.vlgmr.msra.gmra.mrb[44].mxu0 %v16852_v13  ;;  %v12350_v13 = vld [vmem:[%s18298_s0 + $0x3b0] sm:$0xff] }
0x1275   :  { %14961 = vmatprep.mubr.f32.mxu0 %v16854_v9  ;;  %v11481_v9 = vadd.f32 %v12348_v31, %v18206_v28  ;;  %16508 = vpow2.f32 %v12365_v15 }
0x1277   :  { %v12364_v56 = vmul.f32 -1.442695, %v11481_v9 }
0x1278   :  { %14962 = vmatmul.mubr.f32.gmra.mrb[46].mxu0 %v16860_v29  ;;  %v11483_v29 = vadd.f32 %v12350_v13, %v18210_v55  ;;  %v12352_v55 = vld [vmem:[%s18298_s0 + $0x3c0] sm:$0xff] }
0x1279   :  { %16510 = vpow2.f32 %v12364_v56 }
0x127a   :  { %v12366_v12 = vmul.f32 -1.442695, %v11483_v29  ;;  %16512 = vpow2.f32 %v12367_v60 }
0x127c   :  { %16514 = vpow2.f32 %v12366_v12 }
0x127f   :  { %v16509_v57 = vpop.eup %16508 }
0x1280   :  { %v11498_v34 = vadd.f32 1.0, %v16509_v57 }
0x1282   :  { %16516 = vrcp.f32 %v11498_v34 }
0x1283   :  { %v16511_v7 = vpop.eup %16510 }
0x1284   :  { %v16513_v43 = vpop.eup %16512  ;;  %v11497_v19 = vadd.f32 1.0, %v16511_v7 }
0x1285   :  { %v11500_v51 = vadd.f32 1.0, %v16513_v43 }
0x1286   :  { %v16515_v48 = vpop.eup %16514  ;;  %16518 = vrcp.f32 %v11497_v19 }
0x1287   :  { %v11499_v28 = vadd.f32 1.0, %v16515_v48  ;;  %16520 = vrcp.f32 %v11500_v51 }
0x1289   :  { %16522 = vrcp.f32 %v11499_v28 }
0x128c   :  { %v16517_v47 = vpop.eup %16516 }
0x128d   :  { %v12140_v24 = vsub.f32 1.0, %v16517_v47  ;;  %v12136_v21 = vmul.f32 %v16517_v47, %v18092_v25 }
0x1290   :  { %v16519_v11 = vpop.eup %16518 }
0x1291   :  { %v16521_v33 = vpop.eup %16520  ;;  %v12139_v5 = vsub.f32 1.0, %v16519_v11  ;;  %v12135_v37 = vmul.f32 %v16519_v11, %v18097_v8 }
0x1292   :  { %v12142_v26 = vsub.f32 1.0, %v16521_v33  ;;  %v12138_v53 = vmul.f32 %v16521_v33, %v18111_v23 }
0x1293   :  { %v16523_v39 = vpop.eup %16522 }
0x1294   :  { %v12141_v2 = vsub.f32 1.0, %v16523_v39  ;;  %v12137_v32 = vmul.f32 %v16523_v39, %v18114_v1 }
0x1347   :  { %v14960_v54 = vpop.f32.mrb[44].mxu0 }
0x1348   :  { %v12128_v58 = vadd.f32 %v14960_v54, %v12353_v35  ;;  %v12105_v4 = vpop.f32.mrb[45].mxu0 }
0x1349   :  { %v12127_v14 = vadd.f32 %v12352_v55, %v12105_v4 }
0x134a   :  { %16524 = vtanh.f32 %v12128_v58 }
0x134b   :  { %16526 = vtanh.f32 %v12127_v14  ;;  %v14963_v3 = vpop.f32.mrb[46].mxu0 }
0x134c   :  { %v12130_v0 = vadd.f32 %v14963_v3, %v12355_v41  ;;  %v12117_v6 = vpop.f32.mrb[47].mxu0 }
0x134d   :  { %v12129_v18 = vadd.f32 %v12354_v44, %v12117_v6 }
0x134e   :  { %16528 = vtanh.f32 %v12130_v0 }
0x134f   :  { %16530 = vtanh.f32 %v12129_v18 }
0x1354   :  { %v16525_v42 = vpop.eup %16524 }
0x1355   :  { %v16527_v50 = vpop.eup %16526  ;;  %v12144_v62 = vmul.f32 %v16525_v42, %v12140_v24 }
0x1356   :  { %v12143_v17 = vmul.f32 %v16527_v50, %v12139_v5 }
0x1357   :  { %v12148_v45 = vmul.f32 %v12357_v10, %v12144_v62 }
0x1358   :  { %v16529_v27 = vpop.eup %16528  ;;  %v12147_v63 = vmul.f32 %v12356_v16, %v12143_v17 }
0x1359   :  { %v16531_v46 = vpop.eup %16530  ;;  %v12152_v20 = vadd.f32 %v12148_v45, %v12136_v21  ;;  %v12146_v61 = vmul.f32 %v16529_v27, %v12142_v26 }
0x135a   :  { %v12151_v40 = vadd.f32 %v12147_v63, %v12135_v37  ;;  %v12145_v25 = vmul.f32 %v16531_v46, %v12141_v2 }
0x135b   :  { %12369 = vst [vmem:[%s18299_s4 + $0xe8] sm:$0xff] %v12152_v20  ;;  %v12150_v8 = vmul.f32 %v12359_v52, %v12146_v61 }
0x135c   :  { %12368 = vst [vmem:[%s18299_s4 + $0xe0] sm:$0xff] %v12151_v40  ;;  %v12149_v59 = vmul.f32 %v12358_v49, %v12145_v25 }
0x135d   :  { %v12154_v36 = vadd.f32 %v12150_v8, %v12138_v53 }
0x135e   :  { %v12153_v31 = vadd.f32 %v12149_v59, %v12137_v32 }
0x135f   :  { %12371 = vst [vmem:[%s18299_s4 + $0xf8] sm:$0xff] %v12154_v36 }
0x1360   :  { %12370 = vst [vmem:[%s18299_s4 + $0xf0] sm:$0xff] %v12153_v31 }

</bundles_post_ra>
